<compile_context>
chip_gen: v6e
topology: v6e:2x2x1
jax: 0.10.0
libtpu: 0.0.40
codegen_flags: <defaults>
</compile_context>

<pallas_src>
import functools

import jax
import jax.numpy as jnp
from jax.experimental import pallas as pl
from jax.experimental.pallas import tpu as pltpu

H1 = 512   # encoder hidden 1 / decoder hidden 2
H2 = 256   # encoder hidden 2 / decoder hidden 1
PAD = 128  # lane-dense padding for the tiny concept/style dims
assert H2 == 2 * PAD  # packing below relies on this

# ---- packed bias slab offsets (all 128-aligned) -----------------------------
_OFF_B1 = 0                       # [c_b1 || s_b1]            len 2*H1 = 1024
_OFF_CB2 = _OFF_B1 + 2 * H1       # c_b2                      len H2
_OFF_SB2 = _OFF_CB2 + H2          # s_b2                      len H2
_OFF_CBH = _OFF_SB2 + H2          # {mean|logvar} head bias   len 2*PAD
_OFF_SBH = _OFF_CBH + 2 * PAD     # style mean head bias      len PAD
_OFF_DB1 = _OFF_SBH + PAD         # d_b1                      len H2
_OFF_DB2 = _OFF_DB1 + H2          # d_b2                      len H1
_OFF_DB3 = _OFF_DB2 + H1          # d_b3                      len in_dim

# ---- packed small-head weight slab offsets (lanes, 128-aligned) -------------
_HOFF_CWH = 0                     # (H2, 2*PAD)  mean at [0:nc), logvar at [PAD:PAD+nc)
_HOFF_SWH = 2 * PAD               # (H2, PAD)    style mean at [0:ns)
_HOFF_DW1 = 3 * PAD               # (2*PAD, H2)  rows: z at [0:nc), styles at [PAD:PAD+ns)
_HEADS_W = 5 * PAD


def _mm(a_f32, w):
    # Cast activation to the (bf16) weight dtype at the MXU input; accumulate f32.
    return jnp.dot(a_f32.astype(w.dtype), w, preferred_element_type=jnp.float32)


# -----------------------------------------------------------------------------
# Fused kernel: encoder_concepts + encoder_styles + reparam + decoder_concepts
# -----------------------------------------------------------------------------
def _fused_kernel(*refs, use_eps):
    if use_eps:
        (x_ref, w1_hbm, cw2_hbm, sw2_hbm, dw2_hbm, dw3_hbm,
         heads_ref, bias_ref, eps_ref,
         enc_out_ref, z_out_ref, dec_out_ref,
         w1_v, cw2_v, sw2_v, dw2_v, dw3_v, sems) = refs
    else:
        (x_ref, w1_hbm, cw2_hbm, sw2_hbm, dw2_hbm, dw3_hbm,
         heads_ref, bias_ref,
         enc_out_ref, z_out_ref, dec_out_ref,
         w1_v, cw2_v, sw2_v, dw2_v, dw3_v, sems) = refs
        eps_ref = None

    in_dim = dec_out_ref.shape[1]

    # ---- kick off ALL big-weight DMAs up front (first-use order) -----------
    cp_w1 = pltpu.make_async_copy(w1_hbm, w1_v, sems.at[0])
    cp_cw2 = pltpu.make_async_copy(cw2_hbm, cw2_v, sems.at[1])
    cp_sw2 = pltpu.make_async_copy(sw2_hbm, sw2_v, sems.at[2])
    cp_dw2 = pltpu.make_async_copy(dw2_hbm, dw2_v, sems.at[3])
    cp_dw3 = pltpu.make_async_copy(dw3_hbm, dw3_v, sems.at[4])
    cp_w1.start()
    cp_cw2.start()
    cp_sw2.start()
    cp_dw2.start()
    cp_dw3.start()

    x = x_ref[...]                                            # (B, D) f32

    # ---- fused layer 1 of both encoders: x @ [c_w1 || s_w1] ----------------
    cp_w1.wait()
    h_both = jnp.maximum(
        _mm(x, w1_v[...]) + bias_ref[:, _OFF_B1:_OFF_B1 + 2 * H1], 0.0)
    h = h_both[:, :H1]                                        # concept branch
    hs = h_both[:, H1:]                                       # style branch

    # ---- concept encoder: H1 -> H2 -> merged {mean | logvar} head ----------
    cp_cw2.wait()
    h = jnp.maximum(
        _mm(h, cw2_v[...]) + bias_ref[:, _OFF_CB2:_OFF_CB2 + H2], 0.0)
    enc_c = (_mm(h, heads_ref[:, _HOFF_CWH:_HOFF_CWH + 2 * PAD])
             + bias_ref[:, _OFF_CBH:_OFF_CBH + 2 * PAD])      # (B, 2*PAD)
    mean_slab = enc_c[:, :PAD]                                # mean   in [0:nc)
    logv_slab = enc_c[:, PAD:]                                # logvar in [0:nc)

    # ---- style encoder (forward() only consumes its mean head) -------------
    cp_sw2.wait()
    hs = jnp.maximum(
        _mm(hs, sw2_v[...]) + bias_ref[:, _OFF_SB2:_OFF_SB2 + H2], 0.0)
    mean_s = (_mm(hs, heads_ref[:, _HOFF_SWH:_HOFF_SWH + PAD])
              + bias_ref[:, _OFF_SBH:_OFF_SBH + PAD])         # (B, PAD)

    # ---- reparameterization (no mask needed: padding lanes of mean/logvar
    # are exactly zero and padded decoder-w1 rows are zero) -------------------
    if use_eps:
        z_slab = mean_slab + jnp.exp(0.5 * logv_slab) * eps_ref[...]
    else:
        z_slab = mean_slab                                    # eval: z == mean

    # ---- decoder: [z | mean_styles] -> H2 -> H1 -> D, sigmoid --------------
    zin = jnp.concatenate([z_slab, mean_s], axis=1)           # (B, 2*PAD)
    h1d = jnp.maximum(
        _mm(zin, heads_ref[:, _HOFF_DW1:_HOFF_DW1 + H2])
        + bias_ref[:, _OFF_DB1:_OFF_DB1 + H2], 0.0)

    cp_dw2.wait()
    h2d = jnp.maximum(
        _mm(h1d, dw2_v[...]) + bias_ref[:, _OFF_DB2:_OFF_DB2 + H1], 0.0)

    cp_dw3.wait()
    logits = _mm(h2d, dw3_v[...]) + bias_ref[:, _OFF_DB3:_OFF_DB3 + in_dim]
    # sigmoid(x) == 0.5 * (tanh(0.5 * x) + 1): single EUP op, f32 (v5e-safe).
    dec_out_ref[...] = 0.5 * (jnp.tanh(0.5 * logits) + 1.0)

    enc_out_ref[...] = enc_c
    z_out_ref[...] = z_slab


# -----------------------------------------------------------------------------
# VAEConceptizer.forward
# -----------------------------------------------------------------------------
def vae_conceptizer_forward(x, params, training=False, epsilon=None,
                            rng_key=None):
    """Returns (z, mean, log_var, x_decoded) matching the PyTorch forward."""
    B = x.shape[0]
    x_flat = x.reshape(B, -1).astype(jnp.float32)
    in_dim = x_flat.shape[1]
    nc = params["n_concepts"]
    p = params

    use_eps = bool(training)
    if use_eps:
        if epsilon is None:
            if rng_key is None:
                rng_key = jax.random.PRNGKey(0)
            # PyTorch samples randn_like(std); lanes >= nc are harmless
            # (they only ever multiply zero-padded weights).
            eps = jax.random.normal(rng_key, (B, PAD), jnp.float32)
        else:
            epsilon = jnp.asarray(epsilon, jnp.float32)
            if epsilon.shape != (B, nc):
                raise ValueError(
                    f"epsilon must have shape {(B, nc)}, got {epsilon.shape}")
            eps = jnp.pad(epsilon, ((0, 0), (0, PAD - nc)))

    vmem = pl.BlockSpec(memory_space=pltpu.MemorySpace.VMEM)
    hbm = pl.BlockSpec(memory_space=pl.ANY)

    args = [x_flat, p["w1"], p["c_w2"], p["s_w2"], p["d_w2"], p["d_w3"],
            p["heads"], p["biases"]]
    in_specs = [vmem, hbm, hbm, hbm, hbm, hbm, vmem, vmem]
    if use_eps:
        args.append(eps)
        in_specs.append(vmem)

    wdt = p["w1"].dtype
    scratch_shapes = [
        pltpu.VMEM((in_dim, 2 * H1), wdt),   # fused [c_w1 || s_w1]
        pltpu.VMEM((H1, H2), wdt),           # c_w2
        pltpu.VMEM((H1, H2), wdt),           # s_w2
        pltpu.VMEM((H2, H1), wdt),           # d_w2
        pltpu.VMEM((H1, in_dim), wdt),       # d_w3
        pltpu.SemaphoreType.DMA((5,)),
    ]

    enc_out, z_out, dec_out = pl.pallas_call(
        functools.partial(_fused_kernel, use_eps=use_eps),
        in_specs=in_specs,
        out_specs=(vmem, vmem, vmem),
        out_shape=(jax.ShapeDtypeStruct((B, 2 * PAD), jnp.float32),
                   jax.ShapeDtypeStruct((B, PAD), jnp.float32),
                   jax.ShapeDtypeStruct((B, in_dim), jnp.float32)),
        scratch_shapes=scratch_shapes,
    )(*args)

    mean = enc_out[:, :nc]
    log_var = enc_out[:, PAD:PAD + nc]
    z = z_out[:, :nc]
    return z, mean, log_var, dec_out.reshape(x.shape)


# -----------------------------------------------------------------------------
# Parameter construction (PyTorch nn.Linear-style init, packed for the kernel)
# -----------------------------------------------------------------------------
def _init_linear(key, fan_in, fan_out):
    kw, kb = jax.random.split(key)
    bound = 1.0 / float(fan_in) ** 0.5
    w = jax.random.uniform(kw, (fan_in, fan_out), jnp.float32, -bound, bound)
    b = jax.random.uniform(kb, (1, fan_out), jnp.float32, -bound, bound)
    return w, b


def init_vae_conceptizer_params(key, n_concepts, n_styles, in_dim,
                                weight_dtype=jnp.bfloat16):
    assert n_concepts <= PAD and n_styles <= PAD
    kc1, kc2, kcm, kcv, ks1, ks2, ksm, kd1, kd2, kd3 = jax.random.split(key, 10)

    # concept encoder
    c_w1, c_b1 = _init_linear(kc1, in_dim, H1)
    c_w2, c_b2 = _init_linear(kc2, H1, H2)
    c_wm, c_bm = _init_linear(kcm, H2, n_concepts)
    c_wv, c_bv = _init_linear(kcv, H2, n_concepts)

    # style encoder (only the mean head is consumed by forward())
    s_w1, s_b1 = _init_linear(ks1, in_dim, H1)
    s_w2, s_b2 = _init_linear(ks2, H1, H2)
    s_wm, s_bm = _init_linear(ksm, H2, n_styles)

    # decoder for [z | mean_styles]: (nc + ns) -> H2 -> H1 -> in_dim, sigmoid
    d_w1, d_b1 = _init_linear(kd1, n_concepts + n_styles, H2)
    d_w2, d_b2 = _init_linear(kd2, H2, H1)
    d_w3, d_b3 = _init_linear(kd3, H1, in_dim)

    # merged lane-padded concept head: mean cols [0:nc), logvar cols [PAD:PAD+nc)
    c_wh = (jnp.zeros((H2, 2 * PAD), jnp.float32)
            .at[:, :n_concepts].set(c_wm)
            .at[:, PAD:PAD + n_concepts].set(c_wv))
    c_bh = (jnp.zeros((1, 2 * PAD), jnp.float32)
            .at[:, :n_concepts].set(c_bm)
            .at[:, PAD:PAD + n_concepts].set(c_bv))
    s_wh = jnp.zeros((H2, PAD), jnp.float32).at[:, :n_styles].set(s_wm)
    s_bh = jnp.zeros((1, PAD), jnp.float32).at[:, :n_styles].set(s_bm)
    # decoder first layer on concat([z_pad, mean_s_pad]): z rows at [0:nc),
    # style rows at [PAD:PAD+ns), rest zero
    d_w1p = (jnp.zeros((2 * PAD, H2), jnp.float32)
             .at[:n_concepts].set(d_w1[:n_concepts])
             .at[PAD:PAD + n_styles].set(d_w1[n_concepts:n_concepts + n_styles]))

    # packed slabs
    w1_both = jnp.concatenate([c_w1, s_w1], axis=1)            # (in_dim, 2*H1)
    heads = jnp.concatenate([c_wh, s_wh, d_w1p], axis=1)       # (H2, 5*PAD)
    biases = jnp.concatenate(
        [c_b1, s_b1, c_b2, s_b2, c_bh, s_bh, d_b1, d_b2, d_b3],
        axis=1).astype(jnp.float32)                            # (1, 2688+in_dim)
    assert biases.shape[1] == _OFF_DB3 + in_dim
    assert heads.shape[1] == _HEADS_W

    wd = weight_dtype
    return dict(
        n_concepts=n_concepts, n_styles=n_styles, in_dim=in_dim,
        w1=w1_both.astype(wd),
        c_w2=c_w2.astype(wd), s_w2=s_w2.astype(wd),
        d_w2=d_w2.astype(wd), d_w3=d_w3.astype(wd),
        heads=heads.astype(wd), biases=biases,
    )


# -----------------------------------------------------------------------------
# Pure-JAX reference (same packed params, same bf16-at-MXU casts)
# -----------------------------------------------------------------------------
def _ref_forward(x, params, eps_pad):
    def mm(a, w):
        return jnp.dot(a.astype(w.dtype), w, preferred_element_type=jnp.float32)

    p = params
    nc = p["n_concepts"]
    B = x.shape[0]
    xf = x.reshape(B, -1).astype(jnp.float32)
    b = p["biases"]
    in_dim = xf.shape[1]

    h_both = jnp.maximum(mm(xf, p["w1"]) + b[:, :2 * H1], 0.0)
    h, hs = h_both[:, :H1], h_both[:, H1:]

    h = jnp.maximum(mm(h, p["c_w2"]) + b[:, _OFF_CB2:_OFF_CB2 + H2], 0.0)
    enc_c = (mm(h, p["heads"][:, :2 * PAD])
             + b[:, _OFF_CBH:_OFF_CBH + 2 * PAD])
    mean, log_var = enc_c[:, :nc], enc_c[:, PAD:PAD + nc]

    hs = jnp.maximum(mm(hs, p["s_w2"]) + b[:, _OFF_SB2:_OFF_SB2 + H2], 0.0)
    mean_s = (mm(hs, p["heads"][:, 2 * PAD:3 * PAD])
              + b[:, _OFF_SBH:_OFF_SBH + PAD])

    z_slab = enc_c[:, :PAD] + jnp.exp(0.5 * enc_c[:, PAD:]) * eps_pad
    zin = jnp.concatenate([z_slab, mean_s], axis=1)
    h1d = jnp.maximum(mm(zin, p["heads"][:, 3 * PAD:5 * PAD])
                      + b[:, _OFF_DB1:_OFF_DB1 + H2], 0.0)
    h2d = jnp.maximum(mm(h1d, p["d_w2"]) + b[:, _OFF_DB2:_OFF_DB2 + H1], 0.0)
    dec = jax.nn.sigmoid(mm(h2d, p["d_w3"]) + b[:, _OFF_DB3:_OFF_DB3 + in_dim])
    return z_slab[:, :nc], mean, log_var, dec.reshape(x.shape)


if __name__ == "__main__":
    n_concepts, n_styles = 5, 12
    B, C, Himg, Wimg = 8, 1, 28, 28   # dataset='MNIST' -> 1 channel, 28x28
    in_dim = C * Himg * Wimg

    key = jax.random.PRNGKey(0)
    k_x, k_p, k_e = jax.random.split(key, 3)
    x = jax.random.normal(k_x, (B, C, Himg, Wimg), jnp.float32)
    params = init_vae_conceptizer_params(k_p, n_concepts, n_styles, in_dim)

    # ---- eval mode (z == mean, no epsilon DMA) ------------------------------
    fwd_eval = jax.jit(lambda xi: vae_conceptizer_forward(xi, params,
                                                          training=False))
    z, mean, log_var, x_dec = fwd_eval(x)
    jax.block_until_ready((z, mean, log_var, x_dec))

    assert z.shape == (B, n_concepts)
    assert mean.shape == (B, n_concepts)
    assert log_var.shape == (B, n_concepts)
    assert x_dec.shape == x.shape
    assert bool(jnp.all(jnp.isfinite(x_dec)))

    eps0 = jnp.zeros((B, PAD), jnp.float32)
    z_r, m_r, lv_r, xd_r = _ref_forward(x, params, eps0)
    for got, ref in ((z, z_r), (mean, m_r), (log_var, lv_r), (x_dec, xd_r)):
        assert float(jnp.max(jnp.abs(got - ref))) < 2e-2

    # ---- training mode with explicit epsilon (reparameterization path) -----
    epsilon = jax.random.normal(k_e, (B, n_concepts), jnp.float32)
    fwd_train = jax.jit(lambda xi, ep: vae_conceptizer_forward(
        xi, params, training=True, epsilon=ep))
    z_t, m_t, lv_t, xd_t = fwd_train(x, epsilon)
    jax.block_until_ready((z_t, m_t, lv_t, xd_t))

    eps_pad = jnp.zeros((B, PAD), jnp.float32).at[:, :n_concepts].set(epsilon)
    z_tr, m_tr, lv_tr, xd_tr = _ref_forward(x, params, eps_pad)
    for got, ref in ((z_t, z_tr), (m_t, m_tr), (lv_t, lv_tr), (xd_t, xd_tr)):
        assert float(jnp.max(jnp.abs(got - ref))) < 2e-2

    print("KERNEL_OK")
</pallas_src>

<mosaic_0001>
module attributes {stable_mosaic.version = 11 : i64} {
  func.func @_fused_kernel(%arg0: memref<8x784xf32, #tpu.memory_space<vmem>>, %arg1: memref<784x1024xbf16, #tpu.memory_space<any>>, %arg2: memref<512x256xbf16, #tpu.memory_space<any>>, %arg3: memref<512x256xbf16, #tpu.memory_space<any>>, %arg4: memref<256x512xbf16, #tpu.memory_space<any>>, %arg5: memref<512x784xbf16, #tpu.memory_space<any>>, %arg6: memref<256x640xbf16, #tpu.memory_space<vmem>>, %arg7: memref<1x3472xf32, #tpu.memory_space<vmem>>, %arg8: memref<8x256xf32, #tpu.memory_space<vmem>>, %arg9: memref<8x128xf32, #tpu.memory_space<vmem>>, %arg10: memref<8x784xf32, #tpu.memory_space<vmem>>, %arg11: memref<784x1024xbf16, #tpu.memory_space<vmem>>, %arg12: memref<512x256xbf16, #tpu.memory_space<vmem>>, %arg13: memref<512x256xbf16, #tpu.memory_space<vmem>>, %arg14: memref<256x512xbf16, #tpu.memory_space<vmem>>, %arg15: memref<512x784xbf16, #tpu.memory_space<vmem>>, %arg16: memref<5x!tpu.dma_semaphore, #tpu.memory_space<semaphore_mem>>) attributes {dimension_semantics = [], scalar_prefetch = 0 : i64, scratch_operands = 6 : i64, tpu.core_type = #tpu.core_type<tc>} {
    %c0_i32 = arith.constant 0 : i32
    %0 = tpu.memref_slice %arg16[%c0_i32] : memref<5x!tpu.dma_semaphore, #tpu.memory_space<semaphore_mem>> -> memref<1x!tpu.dma_semaphore, #tpu.memory_space<semaphore_mem>>
    %1 = tpu.memref_squeeze %0 : memref<1x!tpu.dma_semaphore, #tpu.memory_space<semaphore_mem>> -> memref<!tpu.dma_semaphore, #tpu.memory_space<semaphore_mem>>
    tpu.enqueue_dma source(%arg1 : memref<784x1024xbf16, #tpu.memory_space<any>>) target(%arg11 : memref<784x1024xbf16, #tpu.memory_space<vmem>>) target_semaphore(%1 : memref<!tpu.dma_semaphore, #tpu.memory_space<semaphore_mem>>)
    %c1_i32 = arith.constant 1 : i32
    %2 = tpu.memref_slice %arg16[%c1_i32] : memref<5x!tpu.dma_semaphore, #tpu.memory_space<semaphore_mem>> -> memref<1x!tpu.dma_semaphore, #tpu.memory_space<semaphore_mem>>
    %3 = tpu.memref_squeeze %2 : memref<1x!tpu.dma_semaphore, #tpu.memory_space<semaphore_mem>> -> memref<!tpu.dma_semaphore, #tpu.memory_space<semaphore_mem>>
    tpu.enqueue_dma source(%arg2 : memref<512x256xbf16, #tpu.memory_space<any>>) target(%arg12 : memref<512x256xbf16, #tpu.memory_space<vmem>>) target_semaphore(%3 : memref<!tpu.dma_semaphore, #tpu.memory_space<semaphore_mem>>)
    %c2_i32 = arith.constant 2 : i32
    %4 = tpu.memref_slice %arg16[%c2_i32] : memref<5x!tpu.dma_semaphore, #tpu.memory_space<semaphore_mem>> -> memref<1x!tpu.dma_semaphore, #tpu.memory_space<semaphore_mem>>
    %5 = tpu.memref_squeeze %4 : memref<1x!tpu.dma_semaphore, #tpu.memory_space<semaphore_mem>> -> memref<!tpu.dma_semaphore, #tpu.memory_space<semaphore_mem>>
    tpu.enqueue_dma source(%arg3 : memref<512x256xbf16, #tpu.memory_space<any>>) target(%arg13 : memref<512x256xbf16, #tpu.memory_space<vmem>>) target_semaphore(%5 : memref<!tpu.dma_semaphore, #tpu.memory_space<semaphore_mem>>)
    %c3_i32 = arith.constant 3 : i32
    %6 = tpu.memref_slice %arg16[%c3_i32] : memref<5x!tpu.dma_semaphore, #tpu.memory_space<semaphore_mem>> -> memref<1x!tpu.dma_semaphore, #tpu.memory_space<semaphore_mem>>
    %7 = tpu.memref_squeeze %6 : memref<1x!tpu.dma_semaphore, #tpu.memory_space<semaphore_mem>> -> memref<!tpu.dma_semaphore, #tpu.memory_space<semaphore_mem>>
    tpu.enqueue_dma source(%arg4 : memref<256x512xbf16, #tpu.memory_space<any>>) target(%arg14 : memref<256x512xbf16, #tpu.memory_space<vmem>>) target_semaphore(%7 : memref<!tpu.dma_semaphore, #tpu.memory_space<semaphore_mem>>)
    %c4_i32 = arith.constant 4 : i32
    %8 = tpu.memref_slice %arg16[%c4_i32] : memref<5x!tpu.dma_semaphore, #tpu.memory_space<semaphore_mem>> -> memref<1x!tpu.dma_semaphore, #tpu.memory_space<semaphore_mem>>
    %9 = tpu.memref_squeeze %8 : memref<1x!tpu.dma_semaphore, #tpu.memory_space<semaphore_mem>> -> memref<!tpu.dma_semaphore, #tpu.memory_space<semaphore_mem>>
    tpu.enqueue_dma source(%arg5 : memref<512x784xbf16, #tpu.memory_space<any>>) target(%arg15 : memref<512x784xbf16, #tpu.memory_space<vmem>>) target_semaphore(%9 : memref<!tpu.dma_semaphore, #tpu.memory_space<semaphore_mem>>)
    %c0 = arith.constant 0 : index
    %c0_0 = arith.constant 0 : index
    %10 = vector.load %arg0[%c0, %c0_0] : memref<8x784xf32, #tpu.memory_space<vmem>>, vector<8x784xf32>
    %c0_i32_1 = arith.constant 0 : i32
    %11 = tpu.memref_slice %arg16[%c0_i32_1] : memref<5x!tpu.dma_semaphore, #tpu.memory_space<semaphore_mem>> -> memref<1x!tpu.dma_semaphore, #tpu.memory_space<semaphore_mem>>
    %12 = tpu.memref_squeeze %11 : memref<1x!tpu.dma_semaphore, #tpu.memory_space<semaphore_mem>> -> memref<!tpu.dma_semaphore, #tpu.memory_space<semaphore_mem>>
    tpu.wait_dma2 semaphore(%12 : memref<!tpu.dma_semaphore, #tpu.memory_space<semaphore_mem>>) src(%arg1 : memref<784x1024xbf16, #tpu.memory_space<any>>) dst(%arg11 : memref<784x1024xbf16, #tpu.memory_space<vmem>>)
    %c0_2 = arith.constant 0 : index
    %c0_3 = arith.constant 0 : index
    %13 = vector.load %arg11[%c0_2, %c0_3] : memref<784x1024xbf16, #tpu.memory_space<vmem>>, vector<784x1024xbf16>
    %14 = arith.truncf %10 : vector<8x784xf32> to vector<8x784xbf16>
    %cst = arith.constant dense<0.000000e+00> : vector<8x1024xf32>
    %15 = tpu.matmul %14, %13, %cst {dimension_numbers = #tpu.dot_dimension_numbers<[1], [0], [0], [1], [0, 0, 1, 1], [], []>} : vector<8x784xbf16>, vector<784x1024xbf16>, vector<8x1024xf32> -> vector<8x1024xf32>
    %c0_4 = arith.constant 0 : index
    %c0_5 = arith.constant 0 : index
    %16 = vector.load %arg7[%c0_4, %c0_5] : memref<1x3472xf32, #tpu.memory_space<vmem>>, vector<1x1024xf32>
    %17 = vector.broadcast %16 : vector<1x1024xf32> to vector<8x1024xf32>
    %18 = arith.addf %15, %17 : vector<8x1024xf32>
    %cst_6 = arith.constant 0.000000e+00 : f32
    %19 = vector.broadcast %cst_6 : f32 to vector<8x1024xf32>
    %20 = arith.maximumf %18, %19 : vector<8x1024xf32>
    %21 = vector.extract_strided_slice %20 {offsets = [0, 0], sizes = [8, 512], strides = [1, 1]} : vector<8x1024xf32> to vector<8x512xf32>
    %22 = vector.extract_strided_slice %20 {offsets = [0, 512], sizes = [8, 512], strides = [1, 1]} : vector<8x1024xf32> to vector<8x512xf32>
    %c1_i32_7 = arith.constant 1 : i32
    %23 = tpu.memref_slice %arg16[%c1_i32_7] : memref<5x!tpu.dma_semaphore, #tpu.memory_space<semaphore_mem>> -> memref<1x!tpu.dma_semaphore, #tpu.memory_space<semaphore_mem>>
    %24 = tpu.memref_squeeze %23 : memref<1x!tpu.dma_semaphore, #tpu.memory_space<semaphore_mem>> -> memref<!tpu.dma_semaphore, #tpu.memory_space<semaphore_mem>>
    tpu.wait_dma2 semaphore(%24 : memref<!tpu.dma_semaphore, #tpu.memory_space<semaphore_mem>>) src(%arg2 : memref<512x256xbf16, #tpu.memory_space<any>>) dst(%arg12 : memref<512x256xbf16, #tpu.memory_space<vmem>>)
    %c0_8 = arith.constant 0 : index
    %c0_9 = arith.constant 0 : index
    %25 = vector.load %arg12[%c0_8, %c0_9] : memref<512x256xbf16, #tpu.memory_space<vmem>>, vector<512x256xbf16>
    %26 = arith.truncf %21 : vector<8x512xf32> to vector<8x512xbf16>
    %cst_10 = arith.constant dense<0.000000e+00> : vector<8x256xf32>
    %27 = tpu.matmul %26, %25, %cst_10 {dimension_numbers = #tpu.dot_dimension_numbers<[1], [0], [0], [1], [0, 0, 1, 1], [], []>} : vector<8x512xbf16>, vector<512x256xbf16>, vector<8x256xf32> -> vector<8x256xf32>
    %c0_11 = arith.constant 0 : index
    %c1024 = arith.constant 1024 : index
    %28 = vector.load %arg7[%c0_11, %c1024] : memref<1x3472xf32, #tpu.memory_space<vmem>>, vector<1x256xf32>
    %29 = vector.broadcast %28 : vector<1x256xf32> to vector<8x256xf32>
    %30 = arith.addf %27, %29 : vector<8x256xf32>
    %cst_12 = arith.constant 0.000000e+00 : f32
    %31 = vector.broadcast %cst_12 : f32 to vector<8x256xf32>
    %32 = arith.maximumf %30, %31 : vector<8x256xf32>
    %c0_13 = arith.constant 0 : index
    %c0_14 = arith.constant 0 : index
    %33 = vector.load %arg6[%c0_13, %c0_14] : memref<256x640xbf16, #tpu.memory_space<vmem>>, vector<256x256xbf16>
    %34 = arith.truncf %32 : vector<8x256xf32> to vector<8x256xbf16>
    %cst_15 = arith.constant dense<0.000000e+00> : vector<8x256xf32>
    %35 = tpu.matmul %34, %33, %cst_15 {dimension_numbers = #tpu.dot_dimension_numbers<[1], [0], [0], [1], [0, 0, 1, 1], [], []>} : vector<8x256xbf16>, vector<256x256xbf16>, vector<8x256xf32> -> vector<8x256xf32>
    %c0_16 = arith.constant 0 : index
    %c1536 = arith.constant 1536 : index
    %36 = vector.load %arg7[%c0_16, %c1536] : memref<1x3472xf32, #tpu.memory_space<vmem>>, vector<1x256xf32>
    %37 = vector.broadcast %36 : vector<1x256xf32> to vector<8x256xf32>
    %38 = arith.addf %35, %37 : vector<8x256xf32>
    %39 = vector.extract_strided_slice %38 {offsets = [0, 0], sizes = [8, 128], strides = [1, 1]} : vector<8x256xf32> to vector<8x128xf32>
    %c2_i32_17 = arith.constant 2 : i32
    %40 = tpu.memref_slice %arg16[%c2_i32_17] : memref<5x!tpu.dma_semaphore, #tpu.memory_space<semaphore_mem>> -> memref<1x!tpu.dma_semaphore, #tpu.memory_space<semaphore_mem>>
    %41 = tpu.memref_squeeze %40 : memref<1x!tpu.dma_semaphore, #tpu.memory_space<semaphore_mem>> -> memref<!tpu.dma_semaphore, #tpu.memory_space<semaphore_mem>>
    tpu.wait_dma2 semaphore(%41 : memref<!tpu.dma_semaphore, #tpu.memory_space<semaphore_mem>>) src(%arg3 : memref<512x256xbf16, #tpu.memory_space<any>>) dst(%arg13 : memref<512x256xbf16, #tpu.memory_space<vmem>>)
    %c0_18 = arith.constant 0 : index
    %c0_19 = arith.constant 0 : index
    %42 = vector.load %arg13[%c0_18, %c0_19] : memref<512x256xbf16, #tpu.memory_space<vmem>>, vector<512x256xbf16>
    %43 = arith.truncf %22 : vector<8x512xf32> to vector<8x512xbf16>
    %cst_20 = arith.constant dense<0.000000e+00> : vector<8x256xf32>
    %44 = tpu.matmul %43, %42, %cst_20 {dimension_numbers = #tpu.dot_dimension_numbers<[1], [0], [0], [1], [0, 0, 1, 1], [], []>} : vector<8x512xbf16>, vector<512x256xbf16>, vector<8x256xf32> -> vector<8x256xf32>
    %c0_21 = arith.constant 0 : index
    %c1280 = arith.constant 1280 : index
    %45 = vector.load %arg7[%c0_21, %c1280] : memref<1x3472xf32, #tpu.memory_space<vmem>>, vector<1x256xf32>
    %46 = vector.broadcast %45 : vector<1x256xf32> to vector<8x256xf32>
    %47 = arith.addf %44, %46 : vector<8x256xf32>
    %cst_22 = arith.constant 0.000000e+00 : f32
    %48 = vector.broadcast %cst_22 : f32 to vector<8x256xf32>
    %49 = arith.maximumf %47, %48 : vector<8x256xf32>
    %c0_23 = arith.constant 0 : index
    %c256 = arith.constant 256 : index
    %50 = vector.load %arg6[%c0_23, %c256] : memref<256x640xbf16, #tpu.memory_space<vmem>>, vector<256x128xbf16>
    %51 = arith.truncf %49 : vector<8x256xf32> to vector<8x256xbf16>
    %cst_24 = arith.constant dense<0.000000e+00> : vector<8x128xf32>
    %52 = tpu.matmul %51, %50, %cst_24 {dimension_numbers = #tpu.dot_dimension_numbers<[1], [0], [0], [1], [0, 0, 1, 1], [], []>} : vector<8x256xbf16>, vector<256x128xbf16>, vector<8x128xf32> -> vector<8x128xf32>
    %c0_25 = arith.constant 0 : index
    %c1792 = arith.constant 1792 : index
    %53 = vector.load %arg7[%c0_25, %c1792] : memref<1x3472xf32, #tpu.memory_space<vmem>>, vector<1x128xf32>
    %54 = vector.broadcast %53 : vector<1x128xf32> to vector<8x128xf32>
    %55 = arith.addf %52, %54 : vector<8x128xf32>
    %56 = tpu.concatenate %39, %55 in 1 : vector<8x128xf32>, vector<8x128xf32> -> vector<8x256xf32>
    %c0_26 = arith.constant 0 : index
    %c384 = arith.constant 384 : index
    %57 = vector.load %arg6[%c0_26, %c384] : memref<256x640xbf16, #tpu.memory_space<vmem>>, vector<256x256xbf16>
    %58 = arith.truncf %56 : vector<8x256xf32> to vector<8x256xbf16>
    %cst_27 = arith.constant dense<0.000000e+00> : vector<8x256xf32>
    %59 = tpu.matmul %58, %57, %cst_27 {dimension_numbers = #tpu.dot_dimension_numbers<[1], [0], [0], [1], [0, 0, 1, 1], [], []>} : vector<8x256xbf16>, vector<256x256xbf16>, vector<8x256xf32> -> vector<8x256xf32>
    %c0_28 = arith.constant 0 : index
    %c1920 = arith.constant 1920 : index
    %60 = vector.load %arg7[%c0_28, %c1920] : memref<1x3472xf32, #tpu.memory_space<vmem>>, vector<1x256xf32>
    %61 = vector.broadcast %60 : vector<1x256xf32> to vector<8x256xf32>
    %62 = arith.addf %59, %61 : vector<8x256xf32>
    %cst_29 = arith.constant 0.000000e+00 : f32
    %63 = vector.broadcast %cst_29 : f32 to vector<8x256xf32>
    %64 = arith.maximumf %62, %63 : vector<8x256xf32>
    %c3_i32_30 = arith.constant 3 : i32
    %65 = tpu.memref_slice %arg16[%c3_i32_30] : memref<5x!tpu.dma_semaphore, #tpu.memory_space<semaphore_mem>> -> memref<1x!tpu.dma_semaphore, #tpu.memory_space<semaphore_mem>>
    %66 = tpu.memref_squeeze %65 : memref<1x!tpu.dma_semaphore, #tpu.memory_space<semaphore_mem>> -> memref<!tpu.dma_semaphore, #tpu.memory_space<semaphore_mem>>
    tpu.wait_dma2 semaphore(%66 : memref<!tpu.dma_semaphore, #tpu.memory_space<semaphore_mem>>) src(%arg4 : memref<256x512xbf16, #tpu.memory_space<any>>) dst(%arg14 : memref<256x512xbf16, #tpu.memory_space<vmem>>)
    %c0_31 = arith.constant 0 : index
    %c0_32 = arith.constant 0 : index
    %67 = vector.load %arg14[%c0_31, %c0_32] : memref<256x512xbf16, #tpu.memory_space<vmem>>, vector<256x512xbf16>
    %68 = arith.truncf %64 : vector<8x256xf32> to vector<8x256xbf16>
    %cst_33 = arith.constant dense<0.000000e+00> : vector<8x512xf32>
    %69 = tpu.matmul %68, %67, %cst_33 {dimension_numbers = #tpu.dot_dimension_numbers<[1], [0], [0], [1], [0, 0, 1, 1], [], []>} : vector<8x256xbf16>, vector<256x512xbf16>, vector<8x512xf32> -> vector<8x512xf32>
    %c0_34 = arith.constant 0 : index
    %c2176 = arith.constant 2176 : index
    %70 = vector.load %arg7[%c0_34, %c2176] : memref<1x3472xf32, #tpu.memory_space<vmem>>, vector<1x512xf32>
    %71 = vector.broadcast %70 : vector<1x512xf32> to vector<8x512xf32>
    %72 = arith.addf %69, %71 : vector<8x512xf32>
    %cst_35 = arith.constant 0.000000e+00 : f32
    %73 = vector.broadcast %cst_35 : f32 to vector<8x512xf32>
    %74 = arith.maximumf %72, %73 : vector<8x512xf32>
    %c4_i32_36 = arith.constant 4 : i32
    %75 = tpu.memref_slice %arg16[%c4_i32_36] : memref<5x!tpu.dma_semaphore, #tpu.memory_space<semaphore_mem>> -> memref<1x!tpu.dma_semaphore, #tpu.memory_space<semaphore_mem>>
    %76 = tpu.memref_squeeze %75 : memref<1x!tpu.dma_semaphore, #tpu.memory_space<semaphore_mem>> -> memref<!tpu.dma_semaphore, #tpu.memory_space<semaphore_mem>>
    tpu.wait_dma2 semaphore(%76 : memref<!tpu.dma_semaphore, #tpu.memory_space<semaphore_mem>>) src(%arg5 : memref<512x784xbf16, #tpu.memory_space<any>>) dst(%arg15 : memref<512x784xbf16, #tpu.memory_space<vmem>>)
    %c0_37 = arith.constant 0 : index
    %c0_38 = arith.constant 0 : index
    %77 = vector.load %arg15[%c0_37, %c0_38] : memref<512x784xbf16, #tpu.memory_space<vmem>>, vector<512x784xbf16>
    %78 = arith.truncf %74 : vector<8x512xf32> to vector<8x512xbf16>
    %cst_39 = arith.constant dense<0.000000e+00> : vector<8x784xf32>
    %79 = tpu.matmul %78, %77, %cst_39 {dimension_numbers = #tpu.dot_dimension_numbers<[1], [0], [0], [1], [0, 0, 1, 1], [], []>} : vector<8x512xbf16>, vector<512x784xbf16>, vector<8x784xf32> -> vector<8x784xf32>
    %c0_40 = arith.constant 0 : index
    %c2688 = arith.constant 2688 : index
    %80 = vector.load %arg7[%c0_40, %c2688] : memref<1x3472xf32, #tpu.memory_space<vmem>>, vector<1x784xf32>
    %81 = vector.broadcast %80 : vector<1x784xf32> to vector<8x784xf32>
    %82 = arith.addf %79, %81 : vector<8x784xf32>
    %cst_41 = arith.constant 5.000000e-01 : f32
    %83 = vector.broadcast %cst_41 : f32 to vector<8x784xf32>
    %84 = arith.mulf %83, %82 : vector<8x784xf32>
    %85 = math.tanh %84 : vector<8x784xf32>
    %cst_42 = arith.constant 1.000000e+00 : f32
    %86 = vector.broadcast %cst_42 : f32 to vector<8x784xf32>
    %87 = arith.addf %85, %86 : vector<8x784xf32>
    %cst_43 = arith.constant 5.000000e-01 : f32
    %88 = vector.broadcast %cst_43 : f32 to vector<8x784xf32>
    %89 = arith.mulf %88, %87 : vector<8x784xf32>
    %c0_44 = arith.constant 0 : index
    %c0_45 = arith.constant 0 : index
    %90 = vector.load %arg10[%c0_44, %c0_45] : memref<8x784xf32, #tpu.memory_space<vmem>>, vector<8x784xf32>
    tpu.vector_store %arg10[%c0_44, %c0_45], %89 {strides = array<i32>} : memref<8x784xf32, #tpu.memory_space<vmem>>, vector<8x784xf32>,
    %c0_46 = arith.constant 0 : index
    %c0_47 = arith.constant 0 : index
    %91 = vector.load %arg8[%c0_46, %c0_47] : memref<8x256xf32, #tpu.memory_space<vmem>>, vector<8x256xf32>
    tpu.vector_store %arg8[%c0_46, %c0_47], %38 {strides = array<i32>} : memref<8x256xf32, #tpu.memory_space<vmem>>, vector<8x256xf32>,
    %c0_48 = arith.constant 0 : index
    %c0_49 = arith.constant 0 : index
    %92 = vector.load %arg9[%c0_48, %c0_49] : memref<8x128xf32, #tpu.memory_space<vmem>>, vector<8x128xf32>
    tpu.vector_store %arg9[%c0_48, %c0_49], %39 {strides = array<i32>} : memref<8x128xf32, #tpu.memory_space<vmem>>, vector<8x128xf32>,
    return
  }
}

</mosaic_0001>

<bundles_post_ra>
// kernel: _lambda_.1
= control target key start
LH: loop header
LB: loop body
LE: loop exit
PB: predicated region body
PF: predicated region fallthrough
CT: control target
= control target key end

     0   :  { %16 = vsyncpa [#allocation9], 0  ;;  %s9487_s0 = inlined_call_operand.vmem [shape: f32[8,784], index: 0, kind: input, shape index: {}]   ;;  %s9488_s1 = inlined_call_operand.hbm [shape: bf16[784,1024], index: 1, kind: input, shape index: {}]   ;;  %s9489_s2 = inlined_call_operand.hbm [shape: bf16[512,256], index: 2, kind: input, shape index: {}]   ;;  %s9490_s3 = inlined_call_operand.hbm [shape: bf16[512,256], index: 3, kind: input, shape index: {}]   ;;  %s9491_s4 = inlined_call_operand.hbm [shape: bf16[256,512], index: 4, kind: input, shape index: {}]   ;;  %s9492_s5 = inlined_call_operand.hbm [shape: bf16[512,784], index: 5, kind: input, shape index: {}]   ;;  %s9493_s6 = inlined_call_operand.hbm [shape: bf16[256,640], index: 6, kind: input, shape index: {}]   ;;  %s9494_s7 = inlined_call_operand.hbm [shape: f32[1,3472], index: 7, kind: input, shape index: {}]   ;;  %s9495_s8 = inlined_call_operand.vmem [shape: f32[8,256], index: 8, kind: output, shape index: {0}]   ;;  %s9496_s9 = inlined_call_operand.hbm [shape: f32[8,128], index: 9, kind: output, shape index: {1}]   ;;  %s9497_s10 = inlined_call_operand.vmem [shape: f32[8,784], index: 10, kind: output, shape index: {2}]  }
   0x1   :  { %17 = vsyncpa [#allocation12], 0 }
   0x2   :  { %18 = vsyncpa [#allocation10], 0  ;;  %s9094_s13 = smov [#allocation8]  }
   0x3   :  { %s26_s14 = sshll.u32 %s9094_s13, 4  ;;  %s27_s14 = int_to_ptr.vmem [resolvable:$true] %s26_s14 }
   0x4   :  { %s8926_s15 = scalar_lea.vmem %s27_s14, 10240  ;;  %p8931_p1 = scmp.lt.s32.totalorder %s27_s14, %s27_s14 }
   0x5   :  { %p8927_p0 = scmp.ne.s32.totalorder %s27_s14, %s8926_s15  ;;  %p8932_p2 = scmp.lt.s32.totalorder %s8926_s15, %s8926_s15 }
   0x7   :  { %p8933_p3 = por %p8932_p2, %p8931_p1 }
   0x9   :  { %p8934_p4 = pnand %p8933_p3, %p8927_p0 }
   0xb   :  { %8937 = shalt.err (!%p8934_p4)
}
   0xc   :  { %s9095_s16 = smov 320   ;;  %s9096_s17 = smov 20  }
   0xd   :  { %32 = dma.hbm_to_vmem [thread:$0]  %s9493_s6, 10240, %s27_s14, [#allocation9], %s9095_s16, %s9095_s16, %s9096_s17  }
   0xe   :  { %s9097_s20 = smov [#allocation11]  }
   0xf   :  { %s39_s21 = sshll.u32 %s9097_s20, 4  ;;  %s40_s21 = int_to_ptr.vmem [resolvable:$true] %s39_s21 }
  0x10   :  { %s8946_s22 = scalar_lea.vmem %s40_s21, 448  ;;  %p8951_p6 = scmp.lt.s32.totalorder %s40_s21, %s40_s21 }
  0x11   :  { %p8947_p5 = scmp.ne.s32.totalorder %s40_s21, %s8946_s22  ;;  %p8952_p7 = scmp.lt.s32.totalorder %s8946_s22, %s8946_s22 }
  0x13   :  { %p8953_p8 = por %p8952_p7, %p8951_p6 }
  0x15   :  { %p8954_p9 = pnand %p8953_p8, %p8947_p5 }
  0x17   :  { %8957 = shalt.err (!%p8954_p9)
}
  0x18   :  { %42 = dma.hbm_to_vmem [thread:$0]  %s9494_s7, 448, %s40_s21, [#allocation12]  }
  0x19   :  { %9078 = dma.done.wait [#allocation9], 10240  }
  0x1a   :  { %9079 = vsyncadd [#allocation9], 4294957056 }
  0x1b   :  { %9080 = dma.done.wait [#allocation12], 448  }
  0x1c   :  { %9081 = vsyncadd [#allocation12], 4294966848  ;;  %s9098_s25 = smov [#allocation2]   ;;  %s9099_s26 = smov [#allocation3]  }
  0x1d   :  { %s57_s6 = sshll.u32 %s9098_s25, 4  ;;  %s69_s27 = sshll.u32 %s9099_s26, 4  ;;  %s58_s6 = int_to_ptr.vmem [resolvable:$true] %s57_s6  ;;  %s70_s27 = int_to_ptr.vmem [resolvable:$true] %s69_s27 }
  0x1e   :  { %s8966_s28 = scalar_lea.vmem %s58_s6, 50176  ;;  %p8971_p11 = scmp.lt.s32.totalorder %s58_s6, %s58_s6 }
  0x1f   :  { %p8967_p10 = scmp.ne.s32.totalorder %s58_s6, %s8966_s28  ;;  %p8972_p12 = scmp.lt.s32.totalorder %s8966_s28, %s8966_s28 }
  0x21   :  { %p8973_p13 = por %p8972_p12, %p8971_p11 }
  0x23   :  { %p8974_p0 = pnand %p8973_p13, %p8967_p10 }
  0x25   :  { %8977 = shalt.err (!%p8974_p0)  }
  0x26   :  { %60 = dma.hbm_to_vmem [thread:$0]  %s9488_s1, 50176, %s58_s6, [#allocation7] }
  0x27   :  { %s8986_s7 = scalar_lea.vmem %s70_s27, 8192  ;;  %p8991_p2 = scmp.lt.s32.totalorder %s70_s27, %s70_s27 }
  0x28   :  { %p8987_p1 = scmp.ne.s32.totalorder %s70_s27, %s8986_s7  ;;  %p8992_p3 = scmp.lt.s32.totalorder %s8986_s7, %s8986_s7 }
  0x2a   :  { %p8993_p4 = por %p8992_p3, %p8991_p2 }
  0x2c   :  { %p8994_p5 = pnand %p8993_p4, %p8987_p1 }
  0x2e   :  { %8997 = shalt.err (!%p8994_p5)  }
  0x2f   :  { %72 = dma.hbm_to_vmem [thread:$0]  %s9489_s2, 8192, %s70_s27, [#allocation7 + $0x1]  ;;  %v9175_v0 = vld [vmem:[%s9487_s0] sm:$0xff]  ;;  %v110_v1 = vld [vmem:[%s9487_s0 + $0x8] sm:$0xff]  ;;  %v9183_v2 = vld [vmem:[%s9487_s0 + $0x10] sm:$0xff] }
  0x30   :  { %s9100_s13 = smov [#allocation4]   ;;  %s9101_s15 = smov [#allocation5]   ;;  %v112_v3 = vld [vmem:[%s9487_s0 + $0x18] sm:$0xff]  ;;  %v9191_v4 = vld [vmem:[%s9487_s0 + $0x20] sm:$0xff]  ;;  %v9196_v5 = vld [vmem:[%s9487_s0 + $0x28] sm:$0xff] }
  0x31   :  { %s81_s14 = sshll.u32 %s9100_s13, 4  ;;  %s93_s16 = sshll.u32 %s9101_s15, 4  ;;  %s82_s14 = int_to_ptr.vmem [resolvable:$true] %s81_s14  ;;  %s94_s16 = int_to_ptr.vmem [resolvable:$true] %s93_s16 }
  0x32   :  { %s9006_s26 = scalar_lea.vmem %s82_s14, 8192  ;;  %p9011_p7 = scmp.lt.s32.totalorder %s82_s14, %s82_s14 }
  0x33   :  { %p9007_p6 = scmp.ne.s32.totalorder %s82_s14, %s9006_s26  ;;  %p9012_p8 = scmp.lt.s32.totalorder %s9006_s26, %s9006_s26 }
  0x35   :  { %p9013_p9 = por %p9012_p8, %p9011_p7 }
  0x37   :  { %p9014_p10 = pnand %p9013_p9, %p9007_p6 }
  0x39   :  { %9017 = shalt.err (!%p9014_p10)  }
  0x3a   :  { %84 = dma.hbm_to_vmem [thread:$0]  %s9490_s3, 8192, %s82_s14, [#allocation7 + $0x2]  ;;  %v9204_v6 = vld [vmem:[%s9487_s0 + $0x30] sm:$0xff] }
  0x3b   :  { %s9026_s7 = scalar_lea.vmem %s94_s16, 8192  ;;  %p9031_p12 = scmp.lt.s32.totalorder %s94_s16, %s94_s16 }
  0x3c   :  { %p9027_p11 = scmp.ne.s32.totalorder %s94_s16, %s9026_s7  ;;  %p9032_p13 = scmp.lt.s32.totalorder %s9026_s7, %s9026_s7 }
  0x3e   :  { %p9033_p0 = por %p9032_p13, %p9031_p12 }
  0x40   :  { %p9034_p1 = pnand %p9033_p0, %p9027_p11 }
  0x42   :  { %9037 = shalt.err (!%p9034_p1)  }
  0x43   :  { %96 = dma.hbm_to_vmem [thread:$0]  %s9491_s4, 8192, %s94_s16, [#allocation7 + $0x3] }
  0x44   :  { %s9102_s13 = smov [#allocation6]  }
  0x45   :  { %s105_s15 = sshll.u32 %s9102_s13, 4  ;;  %s106_s15 = int_to_ptr.vmem [resolvable:$true] %s105_s15 }
  0x46   :  { %s9046_s3 = scalar_lea.vmem %s106_s15, 28672  ;;  %p9051_p3 = scmp.lt.s32.totalorder %s106_s15, %s106_s15 }
  0x47   :  { %p9047_p2 = scmp.ne.s32.totalorder %s106_s15, %s9046_s3  ;;  %p9052_p4 = scmp.lt.s32.totalorder %s9046_s3, %s9046_s3 }
  0x49   :  { %p9053_p5 = por %p9052_p4, %p9051_p3 }
  0x4b   :  { %p9054_p6 = pnand %p9053_p5, %p9047_p2 }
  0x4d   :  { %9057 = shalt.err (!%p9054_p6)  }
  0x4e   :  { %108 = dma.hbm_to_vmem [thread:$0]  %s9492_s5, 28672, %s106_s15, [#allocation7 + $0x4] }
  0x4f   :  { %9082 = dma.done.wait [#allocation7], 50176 }
  0x50   :  { %9083 = vsyncadd [#allocation7], 4294917120  ;;  %v9212_v7 = vpack.c.bf16 %v110_v1, %v110_v1  ;;  %v9214_v8 = vpack.c.bf16 %v112_v3, %v112_v3  ;;  %v176_v9 = vld [vmem:[#allocation2 + $0x1c0] sm:$0xff]  ;;  %vm2521_vm0 = vcmask 130048  }
  0x51   :  { %v180_v10 = vld [vmem:[#allocation2 + $0x1e0] sm:$0xff] }
  0x52   :  { %2557 = vmatprep.mubr.bf16.mxu0 %v9212_v7  ;;  %2598 = vmatprep.mubr.bf16.mxu1 %v9214_v8  ;;  %v304_v11 = vld [vmem:[#allocation2 + $0x5c0] sm:$0xff]  ;;  %v7265_v12 = vcombine.high %v176_v9, %v180_v10  ;;  %v7264_v14 = vcombine.low %v176_v9, %v180_v10 }
  0x53   :  { %v308_v13 = vld [vmem:[#allocation2 + $0x5e0] sm:$0xff] }
  0x54   :  { %v168_v15 = vld [vmem:[#allocation2 + $0x180] sm:$0xff]  ;;  %v7393_v17 = vcombine.high %v304_v11, %v308_v13  ;;  %v7392_v18 = vcombine.low %v304_v11, %v308_v13  ;;  %2525 = vmatprep.subr.bf16.mxu0 %v7265_v12 }
  0x55   :  { %v172_v16 = vld [vmem:[#allocation2 + $0x1a0] sm:$0xff]  ;;  %2526 = vmatpush1.bf16.msra.mxu0 %v7264_v14 }
  0x56   :  { %v7257_v19 = vcombine.high %v168_v15, %v172_v16  ;;  %v296_v20 = vld [vmem:[#allocation2 + $0x580] sm:$0xff]  ;;  %2566 = vmatprep.subr.bf16.mxu1 %v7393_v17  ;;  %v7256_v27 = vcombine.low %v168_v15, %v172_v16 }
  0x57   :  { %v300_v21 = vld [vmem:[#allocation2 + $0x5a0] sm:$0xff]  ;;  %2567 = vmatpush1.bf16.msra.mxu1 %v7392_v18 }
  0x58   :  { %v160_v22 = vld [vmem:[#allocation2 + $0x140] sm:$0xff]  ;;  %v7385_v23 = vcombine.high %v296_v20, %v300_v21  ;;  %2527 = vmatprep.subr.bf16.mxu0 %v7257_v19  ;;  %v7384_v28 = vcombine.low %v296_v20, %v300_v21 }
  0x59   :  { %v164_v24 = vld [vmem:[#allocation2 + $0x160] sm:$0xff]  ;;  %2528 = vmatpush1.bf16.msra.mxu0 %v7256_v27 }
  0x5a   :  { %v288_v25 = vld [vmem:[#allocation2 + $0x540] sm:$0xff]  ;;  %v7249_v29 = vcombine.high %v160_v22, %v164_v24  ;;  %2568 = vmatprep.subr.bf16.mxu1 %v7385_v23  ;;  %v7248_v35 = vcombine.low %v160_v22, %v164_v24 }
  0x5b   :  { %v292_v26 = vld [vmem:[#allocation2 + $0x560] sm:$0xff]  ;;  %2569 = vmatpush1.bf16.msra.mxu1 %v7384_v28 }
  0x5c   :  { %v7377_v30 = vcombine.high %v288_v25, %v292_v26  ;;  %v152_v31 = vld [vmem:[#allocation2 + $0x100] sm:$0xff]  ;;  %2529 = vmatprep.subr.bf16.mxu0 %v7249_v29  ;;  %v7376_v36 = vcombine.low %v288_v25, %v292_v26 }
  0x5d   :  { %v156_v32 = vld [vmem:[#allocation2 + $0x120] sm:$0xff]  ;;  %2530 = vmatpush1.bf16.msra.mxu0 %v7248_v35 }
  0x5e   :  { %v280_v33 = vld [vmem:[#allocation2 + $0x500] sm:$0xff]  ;;  %v7241_v37 = vcombine.high %v152_v31, %v156_v32  ;;  %2570 = vmatprep.subr.bf16.mxu1 %v7377_v30  ;;  %v7240_v43 = vcombine.low %v152_v31, %v156_v32 }
  0x5f   :  { %v284_v34 = vld [vmem:[#allocation2 + $0x520] sm:$0xff]  ;;  %2571 = vmatpush1.bf16.msra.mxu1 %v7376_v36 }
  0x60   :  { %v7369_v38 = vcombine.high %v280_v33, %v284_v34  ;;  %v144_v39 = vld [vmem:[#allocation2 + $0xc0] sm:$0xff]  ;;  %2531 = vmatprep.subr.bf16.mxu0 %v7241_v37  ;;  %v7368_v44 = vcombine.low %v280_v33, %v284_v34 }
  0x61   :  { %v148_v40 = vld [vmem:[#allocation2 + $0xe0] sm:$0xff]  ;;  %2532 = vmatpush1.bf16.msra.mxu0 %v7240_v43 }
  0x62   :  { %v272_v41 = vld [vmem:[#allocation2 + $0x4c0] sm:$0xff]  ;;  %v7233_v45 = vcombine.high %v144_v39, %v148_v40  ;;  %2572 = vmatprep.subr.bf16.mxu1 %v7369_v38  ;;  %v7232_v51 = vcombine.low %v144_v39, %v148_v40 }
  0x63   :  { %v276_v42 = vld [vmem:[#allocation2 + $0x4e0] sm:$0xff]  ;;  %2573 = vmatpush1.bf16.msra.mxu1 %v7368_v44 }
  0x64   :  { %v7361_v46 = vcombine.high %v272_v41, %v276_v42  ;;  %v136_v47 = vld [vmem:[#allocation2 + $0x80] sm:$0xff]  ;;  %2533 = vmatprep.subr.bf16.mxu0 %v7233_v45  ;;  %v7360_v52 = vcombine.low %v272_v41, %v276_v42 }
  0x65   :  { %v140_v48 = vld [vmem:[#allocation2 + $0xa0] sm:$0xff]  ;;  %2534 = vmatpush1.bf16.msra.mxu0 %v7232_v51 }
  0x66   :  { %v264_v49 = vld [vmem:[#allocation2 + $0x480] sm:$0xff]  ;;  %v7225_v53 = vcombine.high %v136_v47, %v140_v48  ;;  %2574 = vmatprep.subr.bf16.mxu1 %v7361_v46  ;;  %v7224_v59 = vcombine.low %v136_v47, %v140_v48 }
  0x67   :  { %v268_v50 = vld [vmem:[#allocation2 + $0x4a0] sm:$0xff]  ;;  %2575 = vmatpush1.bf16.msra.mxu1 %v7360_v52 }
  0x68   :  { %v7353_v54 = vcombine.high %v264_v49, %v268_v50  ;;  %v128_v55 = vld [vmem:[#allocation2 + $0x40] sm:$0xff]  ;;  %2535 = vmatprep.subr.bf16.mxu0 %v7225_v53  ;;  %v7352_v60 = vcombine.low %v264_v49, %v268_v50 }
  0x69   :  { %v132_v56 = vld [vmem:[#allocation2 + $0x60] sm:$0xff]  ;;  %2536 = vmatpush1.bf16.msra.mxu0 %v7224_v59 }
  0x6a   :  { %v256_v57 = vld [vmem:[#allocation2 + $0x440] sm:$0xff]  ;;  %v7217_v61 = vcombine.high %v128_v55, %v132_v56  ;;  %2576 = vmatprep.subr.bf16.mxu1 %v7353_v54  ;;  %v7216_v10 = vcombine.low %v128_v55, %v132_v56 }
  0x6b   :  { %v260_v58 = vld [vmem:[#allocation2 + $0x460] sm:$0xff]  ;;  %2577 = vmatpush1.bf16.msra.mxu1 %v7352_v60 }
  0x6c   :  { %v7345_v62 = vcombine.high %v256_v57, %v260_v58  ;;  %v120_v63 = vld [vmem:[#allocation2] sm:$0xff]  ;;  %2537 = vmatprep.subr.bf16.mxu0 %v7217_v61  ;;  %v7344_v11 = vcombine.low %v256_v57, %v260_v58 }
  0x6d   :  { %v124_v1 = vld [vmem:[#allocation2 + $0x20] sm:$0xff]  ;;  %2538 = vmatpush1.bf16.msra.mxu0 %v7216_v10 }
  0x6e   :  { %v248_v3 = vld [vmem:[#allocation2 + $0x400] sm:$0xff]  ;;  %v7209_v12 = vcombine.high %v120_v63, %v124_v1  ;;  %2578 = vmatprep.subr.bf16.mxu1 %v7345_v62  ;;  %v7208_v18 = vcombine.low %v120_v63, %v124_v1 }
  0x6f   :  { %v252_v9 = vld [vmem:[#allocation2 + $0x420] sm:$0xff]  ;;  %2579 = vmatpush1.bf16.msra.mxu1 %v7344_v11 }
  0x70   :  { %v7337_v13 = vcombine.high %v248_v3, %v252_v9  ;;  %v240_v14 = vld [vmem:[#allocation2 + $0x3c0] sm:$0xff]  ;;  %2539 = vmatprep.subr.bf16.mxu0 %v7209_v12  ;;  %v7336_v19 = vcombine.low %v248_v3, %v252_v9 }
  0x71   :  { %v244_v15 = vld [vmem:[#allocation2 + $0x3e0] sm:$0xff]  ;;  %2540 = vmatpush1.bf16.msra.mxu0 %v7208_v18 }
  0x72   :  { %v368_v16 = vld [vmem:[#allocation2 + $0x7c0] sm:$0xff]  ;;  %v7329_v20 = vcombine.high %v240_v14, %v244_v15  ;;  %2580 = vmatprep.subr.bf16.mxu1 %v7337_v13  ;;  %v7328_v26 = vcombine.low %v240_v14, %v244_v15 }
  0x73   :  { %v372_v17 = vld [vmem:[#allocation2 + $0x7e0] sm:$0xff]  ;;  %2581 = vmatpush1.bf16.msra.mxu1 %v7336_v19 }
  0x74   :  { %v7457_v21 = vcombine.high %v368_v16, %v372_v17  ;;  %v232_v22 = vld [vmem:[#allocation2 + $0x380] sm:$0xff]  ;;  %2541 = vmatprep.subr.bf16.mxu0 %v7329_v20  ;;  %v7456_v27 = vcombine.low %v368_v16, %v372_v17 }
  0x75   :  { %v236_v23 = vld [vmem:[#allocation2 + $0x3a0] sm:$0xff]  ;;  %2542 = vmatpush2.bf16.msra.mxu0 %v7328_v26 }
  0x76   :  { %v360_v24 = vld [vmem:[#allocation2 + $0x780] sm:$0xff]  ;;  %v7321_v28 = vcombine.high %v232_v22, %v236_v23  ;;  %2582 = vmatprep.subr.bf16.mxu1 %v7457_v21  ;;  %v7320_v34 = vcombine.low %v232_v22, %v236_v23 }
  0x77   :  { %v364_v25 = vld [vmem:[#allocation2 + $0x7a0] sm:$0xff]  ;;  %2583 = vmatpush2.bf16.msra.mxu1 %v7456_v27 }
  0x78   :  { %v7449_v29 = vcombine.high %v360_v24, %v364_v25  ;;  %v224_v30 = vld [vmem:[#allocation2 + $0x340] sm:$0xff]  ;;  %2543 = vmatprep.subr.bf16.mxu0 %v7321_v28  ;;  %v7448_v35 = vcombine.low %v360_v24, %v364_v25 }
  0x79   :  { %v228_v31 = vld [vmem:[#allocation2 + $0x360] sm:$0xff]  ;;  %2544 = vmatpush2.bf16.msra.mxu0 %v7320_v34  ;;  %v9224_v34 = vpack.c.bf16 %v9183_v2, %v9183_v2 }
  0x7a   :  { %v352_v32 = vld [vmem:[#allocation2 + $0x740] sm:$0xff]  ;;  %v7313_v36 = vcombine.high %v224_v30, %v228_v31  ;;  %2584 = vmatprep.subr.bf16.mxu1 %v7449_v29  ;;  %v7312_v42 = vcombine.low %v224_v30, %v228_v31  ;;  %v9220_v31 = vpack.c.bf16 %v9175_v0, %v9175_v0  ;;  %v9229_v0 = vpack.c.bf16 %v9196_v5, %v9196_v5 }
  0x7b   :  { %v356_v33 = vld [vmem:[#allocation2 + $0x760] sm:$0xff]  ;;  %2585 = vmatpush2.bf16.msra.mxu1 %v7448_v35 }
  0x7c   :  { %v7441_v37 = vcombine.high %v352_v32, %v356_v33  ;;  %v216_v38 = vld [vmem:[#allocation2 + $0x300] sm:$0xff]  ;;  %2545 = vmatprep.subr.bf16.mxu0 %v7313_v36  ;;  %v7440_v43 = vcombine.low %v352_v32, %v356_v33  ;;  %v177_v32 = vld [vmem:[#allocation2 + $0x1c8] sm:$0xff] }
  0x7d   :  { %v220_v39 = vld [vmem:[#allocation2 + $0x320] sm:$0xff]  ;;  %2546 = vmatpush2.bf16.msra.mxu0 %v7312_v42  ;;  %v181_v33 = vld [vmem:[#allocation2 + $0x1e8] sm:$0xff]  ;;  %v9103_v42 = vmov 0  }
  0x7e   :  { %v344_v40 = vld [vmem:[#allocation2 + $0x700] sm:$0xff]  ;;  %v7305_v44 = vcombine.high %v216_v38, %v220_v39  ;;  %2586 = vmatprep.subr.bf16.mxu1 %v7441_v37  ;;  %v7304_v50 = vcombine.low %v216_v38, %v220_v39  ;;  %v7267_v38 = vcombine.high %v177_v32, %v181_v33 }
  0x7f   :  { %v348_v41 = vld [vmem:[#allocation2 + $0x720] sm:$0xff]  ;;  %2587 = vmatpush2.bf16.msra.mxu1 %v7440_v43 }
  0x80   :  { %v7433_v45 = vcombine.high %v344_v40, %v348_v41  ;;  %v208_v46 = vld [vmem:[#allocation2 + $0x2c0] sm:$0xff]  ;;  %2547 = vmatprep.subr.bf16.mxu0 %v7305_v44  ;;  %v7432_v51 = vcombine.low %v344_v40, %v348_v41 }
  0x81   :  { %v212_v47 = vld [vmem:[#allocation2 + $0x2e0] sm:$0xff]  ;;  %2548 = vmatpush2.bf16.msra.mxu0 %v7304_v50 }
  0x82   :  { %v336_v48 = vld [vmem:[#allocation2 + $0x6c0] sm:$0xff]  ;;  %v7297_v52 = vcombine.high %v208_v46, %v212_v47  ;;  %2588 = vmatprep.subr.bf16.mxu1 %v7433_v45  ;;  %v7296_v58 = vcombine.low %v208_v46, %v212_v47  ;;  %v169_v45 = vld [vmem:[#allocation2 + $0x188] sm:$0xff]  ;;  %v9236_v47 = vpack.c.bf16 %v9204_v6, %v9204_v6 }
  0x83   :  { %v340_v49 = vld [vmem:[#allocation2 + $0x6e0] sm:$0xff]  ;;  %2589 = vmatpush2.bf16.msra.mxu1 %v7432_v51  ;;  %v173_v46 = vld [vmem:[#allocation2 + $0x1a8] sm:$0xff] }
  0x84   :  { %v7425_v53 = vcombine.high %v336_v48, %v340_v49  ;;  %v200_v54 = vld [vmem:[#allocation2 + $0x280] sm:$0xff]  ;;  %2549 = vmatprep.subr.bf16.mxu0 %v7297_v52  ;;  %v7424_v59 = vcombine.low %v336_v48, %v340_v49  ;;  %v7266_v48 = vcombine.low %v177_v32, %v181_v33  ;;  %v7259_v50 = vcombine.high %v169_v45, %v173_v46 }
  0x85   :  { %v204_v55 = vld [vmem:[#allocation2 + $0x2a0] sm:$0xff]  ;;  %2550 = vmatpush2.bf16.msra.mxu0 %v7296_v58 }
  0x86   :  { %v328_v56 = vld [vmem:[#allocation2 + $0x680] sm:$0xff]  ;;  %v7289_v60 = vcombine.high %v200_v54, %v204_v55  ;;  %2590 = vmatprep.subr.bf16.mxu1 %v7425_v53  ;;  %v7288_v9 = vcombine.low %v200_v54, %v204_v55  ;;  %v161_v53 = vld [vmem:[#allocation2 + $0x148] sm:$0xff] }
  0x87   :  { %v332_v57 = vld [vmem:[#allocation2 + $0x6a0] sm:$0xff]  ;;  %2591 = vmatpush2.bf16.msra.mxu1 %v7424_v59  ;;  %v165_v54 = vld [vmem:[#allocation2 + $0x168] sm:$0xff] }
  0x88   :  { %v7417_v61 = vcombine.high %v328_v56, %v332_v57  ;;  %v192_v62 = vld [vmem:[#allocation2 + $0x240] sm:$0xff]  ;;  %2551 = vmatprep.subr.bf16.mxu0 %v7289_v60  ;;  %v7416_v10 = vcombine.low %v328_v56, %v332_v57  ;;  %v7258_v56 = vcombine.low %v169_v45, %v173_v46  ;;  %v7251_v6 = vcombine.high %v161_v53, %v165_v54  ;;  %v153_v60 = vld [vmem:[#allocation2 + $0x108] sm:$0xff] }
  0x89   :  { %v196_v63 = vld [vmem:[#allocation2 + $0x260] sm:$0xff]  ;;  %2552 = vmatpush2.bf16.msra.mxu0 %v7288_v9  ;;  %v241_v45 = vld [vmem:[#allocation2 + $0x3c8] sm:$0xff] }
  0x8a   :  { %v320_v1 = vld [vmem:[#allocation2 + $0x640] sm:$0xff]  ;;  %v7281_v11 = vcombine.high %v192_v62, %v196_v63  ;;  %2592 = vmatprep.subr.bf16.mxu1 %v7417_v61  ;;  %v7280_v17 = vcombine.low %v192_v62, %v196_v63  ;;  %v157_v61 = vld [vmem:[#allocation2 + $0x128] sm:$0xff]  ;;  %v7250_v63 = vcombine.low %v161_v53, %v165_v54 }
  0x8b   :  { %v324_v3 = vld [vmem:[#allocation2 + $0x660] sm:$0xff]  ;;  %2593 = vmatpush2.bf16.msra.mxu1 %v7416_v10  ;;  %v245_v46 = vld [vmem:[#allocation2 + $0x3e8] sm:$0xff] }
  0x8c   :  { %v7409_v12 = vcombine.high %v320_v1, %v324_v3  ;;  %v184_v13 = vld [vmem:[#allocation2 + $0x200] sm:$0xff]  ;;  %2553 = vmatprep.subr.bf16.mxu0 %v7281_v11  ;;  %v7408_v18 = vcombine.low %v320_v1, %v324_v3  ;;  %v7243_v3 = vcombine.high %v153_v60, %v157_v61  ;;  %v145_v11 = vld [vmem:[#allocation2 + $0xc8] sm:$0xff] }
  0x8d   :  { %v188_v14 = vld [vmem:[#allocation2 + $0x220] sm:$0xff]  ;;  %2554 = vmatpush2.bf16.msra.mxu0 %v7280_v17  ;;  %v233_v53 = vld [vmem:[#allocation2 + $0x388] sm:$0xff] }
  0x8e   :  { %v312_v15 = vld [vmem:[#allocation2 + $0x600] sm:$0xff]  ;;  %v7273_v19 = vcombine.high %v184_v13, %v188_v14  ;;  %2594 = vmatprep.subr.bf16.mxu1 %v7409_v12  ;;  %v7272_v25 = vcombine.low %v184_v13, %v188_v14  ;;  %v149_v12 = vld [vmem:[#allocation2 + $0xe8] sm:$0xff]  ;;  %v7242_v14 = vcombine.low %v153_v60, %v157_v61 }
  0x8f   :  { %v316_v16 = vld [vmem:[#allocation2 + $0x620] sm:$0xff]  ;;  %2595 = vmatpush2.bf16.msra.mxu1 %v7408_v18  ;;  %v237_v54 = vld [vmem:[#allocation2 + $0x3a8] sm:$0xff] }
  0x90   :  { %v7401_v20 = vcombine.high %v312_v15, %v316_v16  ;;  %v432_v21 = vld [vmem:[#allocation2 + $0x9c0] sm:$0xff]  ;;  %2555 = vmatprep.subr.bf16.mxu0 %v7273_v19  ;;  %v7400_v26 = vcombine.low %v312_v15, %v316_v16  ;;  %v7235_v16 = vcombine.high %v145_v11, %v149_v12  ;;  %v137_v19 = vld [vmem:[#allocation2 + $0x88] sm:$0xff] }
  0x91   :  { %v436_v22 = vld [vmem:[#allocation2 + $0x9e0] sm:$0xff]  ;;  %2556 = vmatpush2.bf16.msra.mxu0 %v7272_v25  ;;  %v225_v60 = vld [vmem:[#allocation2 + $0x348] sm:$0xff] }
  0x92   :  { %v504_v23 = vld [vmem:[#allocation2 + $0xc00] sm:$0xff]  ;;  %v7521_v27 = vcombine.high %v432_v21, %v436_v22  ;;  %2596 = vmatprep.subr.bf16.mxu1 %v7401_v20  ;;  %v7520_v35 = vcombine.low %v432_v21, %v436_v22  ;;  %v141_v20 = vld [vmem:[#allocation2 + $0xa8] sm:$0xff]  ;;  %v7234_v22 = vcombine.low %v145_v11, %v149_v12 }
  0x93   :  { %v508_v24 = vld [vmem:[#allocation2 + $0xc20] sm:$0xff]  ;;  %2597 = vmatpush2.bf16.msra.mxu1 %v7400_v26  ;;  %v229_v61 = vld [vmem:[#allocation2 + $0x368] sm:$0xff] }
  0x94   :  { %v7593_v28 = vcombine.high %v504_v23, %v508_v24  ;;  %v424_v29 = vld [vmem:[#allocation2 + $0x980] sm:$0xff]  ;;  %2607 = vmatprep.subr.bf16.mxu0 %v7521_v27  ;;  %v7592_v36 = vcombine.low %v504_v23, %v508_v24  ;;  %2558 = vmatmul.mubr.bf16.vlgmr.msra.gmra.mxu0 %v9220_v31  ;;  %v7227_v24 = vcombine.high %v137_v19, %v141_v20  ;;  %v129_v27 = vld [vmem:[#allocation2 + $0x48] sm:$0xff] }
  0x95   :  { %v428_v30 = vld [vmem:[#allocation2 + $0x9a0] sm:$0xff]  ;;  %2608 = vmatpush1.bf16.msra.mxu0 %v7520_v35  ;;  %2639 = vmatprep.mubr.bf16.mxu0 %v9229_v0  ;;  %v217_v11 = vld [vmem:[#allocation2 + $0x308] sm:$0xff] }
  0x96   :  { %v7513_v37 = vcombine.high %v424_v29, %v428_v30  ;;  %2662 = vmatprep.subr.bf16.mxu1 %v7593_v28  ;;  %v416_v39 = vld [vmem:[#allocation2 + $0x940] sm:$0xff]  ;;  %2599 = vmatmul.mubr.bf16.vlgmr.msra.gmra.mxu1 %v9224_v34  ;;  %v7512_v2 = vcombine.low %v424_v29, %v428_v30  ;;  %v133_v28 = vld [vmem:[#allocation2 + $0x68] sm:$0xff]  ;;  %v7226_v30 = vcombine.low %v137_v19, %v141_v20 }
  0x97   :  { %v420_v40 = vld [vmem:[#allocation2 + $0x960] sm:$0xff]  ;;  %2663 = vmatpush1.bf16.msra.mxu1 %v7592_v36  ;;  %2680 = vmatprep.mubr.bf16.mxu1 %v9103_v42  ;;  %v7219_v33 = vcombine.high %v129_v27, %v133_v28  ;;  %v221_v12 = vld [vmem:[#allocation2 + $0x328] sm:$0xff] }
  0x98   :  { %2609 = vmatprep.subr.bf16.mxu0 %v7513_v37  ;;  %v7505_v41 = vcombine.high %v416_v39, %v420_v40  ;;  %2689 = vmatprep.subr.bf16.mxu1 %v7267_v38  ;;  %v408_v43 = vld [vmem:[#allocation2 + $0x900] sm:$0xff]  ;;  %v7504_v5 = vcombine.low %v416_v39, %v420_v40  ;;  %v121_v37 = vld [vmem:[#allocation2 + $0x8] sm:$0xff]  ;;  %v7218_v40 = vcombine.low %v129_v27, %v133_v28 }
  0x99   :  { %v412_v44 = vld [vmem:[#allocation2 + $0x920] sm:$0xff]  ;;  %2610 = vmatpush1.bf16.msra.mxu0 %v7512_v2  ;;  %v125_v38 = vld [vmem:[#allocation2 + $0x28] sm:$0xff] }
  0x9a   :  { %2611 = vmatprep.subr.bf16.mxu0 %v7505_v41  ;;  %v7497_v49 = vcombine.high %v408_v43, %v412_v44  ;;  %v400_v51 = vld [vmem:[#allocation2 + $0x8c0] sm:$0xff]  ;;  %v7496_v55 = vcombine.low %v408_v43, %v412_v44  ;;  %v7211_v41 = vcombine.high %v121_v37, %v125_v38  ;;  %v209_v19 = vld [vmem:[#allocation2 + $0x2c8] sm:$0xff] }
  0x9b   :  { %v404_v52 = vld [vmem:[#allocation2 + $0x8e0] sm:$0xff]  ;;  %v213_v20 = vld [vmem:[#allocation2 + $0x2e8] sm:$0xff] }
  0x9c   :  { %v7489_v57 = vcombine.high %v400_v51, %v404_v52  ;;  %v392_v58 = vld [vmem:[#allocation2 + $0x880] sm:$0xff]  ;;  %v7488_v62 = vcombine.low %v400_v51, %v404_v52  ;;  %v201_v27 = vld [vmem:[#allocation2 + $0x288] sm:$0xff] }
  0x9d   :  { %2612 = vmatpush1.bf16.msra.mxu0 %v7504_v5  ;;  %v396_v59 = vld [vmem:[#allocation2 + $0x8a0] sm:$0xff]  ;;  %v205_v28 = vld [vmem:[#allocation2 + $0x2a8] sm:$0xff] }
  0x9e   :  { %7600 = vmatmul.mubr.msk.bf16.vlgmr.msra.gmra.mxu1 %vm2521_vm0, %v9236_v47  ;;  %2613 = vmatprep.subr.bf16.mxu0 %v7497_v49  ;;  %v7481_v1 = vcombine.high %v392_v58, %v396_v59  ;;  %v384_v9 = vld [vmem:[#allocation2 + $0x840] sm:$0xff]  ;;  %v7480_v13 = vcombine.low %v392_v58, %v396_v59 }
  0x9f   :  { %2690 = vmatpush1.bf16.msra.mxu1 %v7266_v48  ;;  %2721 = vmatprep.mubr.bf16.mxu1 %v9212_v7  ;;  %v388_v10 = vld [vmem:[#allocation2 + $0x860] sm:$0xff]  ;;  %v7210_v48 = vcombine.low %v121_v37, %v125_v38  ;;  %v193_v37 = vld [vmem:[#allocation2 + $0x248] sm:$0xff] }
  0xa0   :  { %2691 = vmatprep.subr.bf16.mxu1 %v7259_v50  ;;  %v7473_v15 = vcombine.high %v384_v9, %v388_v10  ;;  %v376_v17 = vld [vmem:[#allocation2 + $0x800] sm:$0xff]  ;;  %v7472_v21 = vcombine.low %v384_v9, %v388_v10  ;;  %v7331_v50 = vcombine.high %v241_v45, %v245_v46  ;;  %v197_v38 = vld [vmem:[#allocation2 + $0x268] sm:$0xff] }
  0xa1   :  { %2614 = vmatpush1.bf16.msra.mxu0 %v7496_v55  ;;  %v380_v18 = vld [vmem:[#allocation2 + $0x820] sm:$0xff] }
  0xa2   :  { %2615 = vmatprep.subr.bf16.mxu0 %v7489_v57  ;;  %v7465_v23 = vcombine.high %v376_v17, %v380_v18  ;;  %v496_v25 = vld [vmem:[#allocation2 + $0xbc0] sm:$0xff]  ;;  %v7464_v29 = vcombine.low %v376_v17, %v380_v18 }
  0xa3   :  { %2692 = vmatpush1.bf16.msra.mxu1 %v7258_v56  ;;  %v500_v26 = vld [vmem:[#allocation2 + $0xbe0] sm:$0xff]  ;;  %v7330_v56 = vcombine.low %v241_v45, %v245_v46  ;;  %v9243_v45 = vpack.c.bf16 %v9191_v4, %v9191_v4  ;;  %v185_v46 = vld [vmem:[#allocation2 + $0x208] sm:$0xff] }
  0xa4   :  { %2693 = vmatprep.subr.bf16.mxu1 %v7251_v6  ;;  %v7585_v32 = vcombine.high %v496_v25, %v500_v26  ;;  %v488_v35 = vld [vmem:[#allocation2 + $0xb80] sm:$0xff]  ;;  %v7584_v39 = vcombine.low %v496_v25, %v500_v26  ;;  %v7323_v6 = vcombine.high %v233_v53, %v237_v54 }
  0xa5   :  { %2616 = vmatpush1.bf16.msra.mxu0 %v7488_v62  ;;  %v492_v36 = vld [vmem:[#allocation2 + $0xba0] sm:$0xff] }
  0xa6   :  { %2617 = vmatprep.subr.bf16.mxu0 %v7481_v1  ;;  %v7577_v2 = vcombine.high %v488_v35, %v492_v36  ;;  %v480_v43 = vld [vmem:[#allocation2 + $0xb40] sm:$0xff]  ;;  %v7576_v5 = vcombine.low %v488_v35, %v492_v36  ;;  %v305_v35 = vld [vmem:[#allocation2 + $0x5c8] sm:$0xff] }
  0xa7   :  { %2694 = vmatpush1.bf16.msra.mxu1 %v7250_v63  ;;  %v484_v44 = vld [vmem:[#allocation2 + $0xb60] sm:$0xff]  ;;  %v7322_v63 = vcombine.low %v233_v53, %v237_v54  ;;  %v309_v36 = vld [vmem:[#allocation2 + $0x5e8] sm:$0xff] }
  0xa8   :  { %2695 = vmatprep.subr.bf16.mxu1 %v7243_v3  ;;  %v7569_v49 = vcombine.high %v480_v43, %v484_v44  ;;  %v472_v51 = vld [vmem:[#allocation2 + $0xb00] sm:$0xff]  ;;  %v7568_v55 = vcombine.low %v480_v43, %v484_v44  ;;  %v7315_v3 = vcombine.high %v225_v60, %v229_v61  ;;  %v297_v43 = vld [vmem:[#allocation2 + $0x588] sm:$0xff] }
  0xa9   :  { %2618 = vmatpush1.bf16.msra.mxu0 %v7480_v13  ;;  %v476_v52 = vld [vmem:[#allocation2 + $0xb20] sm:$0xff]  ;;  %v301_v44 = vld [vmem:[#allocation2 + $0x5a8] sm:$0xff] }
  0xaa   :  { %2619 = vmatprep.subr.bf16.mxu0 %v7473_v15  ;;  %v7561_v57 = vcombine.high %v472_v51, %v476_v52  ;;  %v464_v58 = vld [vmem:[#allocation2 + $0xac0] sm:$0xff]  ;;  %v7560_v62 = vcombine.low %v472_v51, %v476_v52  ;;  %v289_v52 = vld [vmem:[#allocation2 + $0x548] sm:$0xff] }
  0xab   :  { %2696 = vmatpush1.bf16.msra.mxu1 %v7242_v14  ;;  %v468_v59 = vld [vmem:[#allocation2 + $0xae0] sm:$0xff]  ;;  %v7314_v14 = vcombine.low %v225_v60, %v229_v61  ;;  %v293_v53 = vld [vmem:[#allocation2 + $0x568] sm:$0xff] }
  0xac   :  { %2697 = vmatprep.subr.bf16.mxu1 %v7235_v16  ;;  %v7553_v1 = vcombine.high %v464_v58, %v468_v59  ;;  %v456_v9 = vld [vmem:[#allocation2 + $0xa80] sm:$0xff]  ;;  %v7552_v13 = vcombine.low %v464_v58, %v468_v59  ;;  %v7307_v16 = vcombine.high %v217_v11, %v221_v12  ;;  %v433_v54 = vld [vmem:[#allocation2 + $0x9c8] sm:$0xff] }
  0xad   :  { %2620 = vmatpush1.bf16.msra.mxu0 %v7472_v21  ;;  %v460_v10 = vld [vmem:[#allocation2 + $0xaa0] sm:$0xff]  ;;  %v281_v58 = vld [vmem:[#allocation2 + $0x508] sm:$0xff] }
  0xae   :  { %2621 = vmatprep.subr.bf16.mxu0 %v7465_v23  ;;  %v7545_v15 = vcombine.high %v456_v9, %v460_v10  ;;  %v448_v17 = vld [vmem:[#allocation2 + $0xa40] sm:$0xff]  ;;  %v7544_v21 = vcombine.low %v456_v9, %v460_v10  ;;  %v285_v59 = vld [vmem:[#allocation2 + $0x528] sm:$0xff] }
  0xaf   :  { %2698 = vmatpush1.bf16.msra.mxu1 %v7234_v22  ;;  %v452_v18 = vld [vmem:[#allocation2 + $0xa60] sm:$0xff]  ;;  %v7306_v22 = vcombine.low %v217_v11, %v221_v12  ;;  %v425_v60 = vld [vmem:[#allocation2 + $0x988] sm:$0xff] }
  0xb0   :  { %2699 = vmatprep.subr.bf16.mxu1 %v7227_v24  ;;  %v7537_v23 = vcombine.high %v448_v17, %v452_v18  ;;  %v7299_v24 = vcombine.high %v209_v19, %v213_v20  ;;  %v440_v25 = vld [vmem:[#allocation2 + $0xa00] sm:$0xff]  ;;  %v429_v61 = vld [vmem:[#allocation2 + $0x9a8] sm:$0xff] }
  0xb1   :  { %2622 = vmatpush1.bf16.msra.mxu0 %v7464_v29  ;;  %v444_v26 = vld [vmem:[#allocation2 + $0xa20] sm:$0xff]  ;;  %v7536_v29 = vcombine.low %v448_v17, %v452_v18  ;;  %v273_v9 = vld [vmem:[#allocation2 + $0x4c8] sm:$0xff] }
  0xb2   :  { %2623 = vmatprep.subr.bf16.mxu0 %v7585_v32  ;;  %v7529_v32 = vcombine.high %v440_v25, %v444_v26  ;;  %v277_v10 = vld [vmem:[#allocation2 + $0x4e8] sm:$0xff] }
  0xb3   :  { %2700 = vmatpush1.bf16.msra.mxu1 %v7226_v30  ;;  %v7298_v30 = vcombine.low %v209_v19, %v213_v20  ;;  %v417_v11 = vld [vmem:[#allocation2 + $0x948] sm:$0xff] }
  0xb4   :  { %2701 = vmatprep.subr.bf16.mxu1 %v7219_v33  ;;  %v7291_v33 = vcombine.high %v201_v27, %v205_v28  ;;  %v421_v12 = vld [vmem:[#allocation2 + $0x968] sm:$0xff] }
  0xb5   :  { %2624 = vmatpush2.bf16.msra.mxu0 %v7584_v39  ;;  %v7528_v39 = vcombine.low %v440_v25, %v444_v26  ;;  %v265_v17 = vld [vmem:[#allocation2 + $0x488] sm:$0xff] }
  0xb6   :  { %2625 = vmatprep.subr.bf16.mxu0 %v7577_v2  ;;  %v7395_v2 = vcombine.high %v305_v35, %v309_v36  ;;  %v269_v18 = vld [vmem:[#allocation2 + $0x4a8] sm:$0xff] }
  0xb7   :  { %2702 = vmatpush1.bf16.msra.mxu1 %v7218_v40  ;;  %v7290_v40 = vcombine.low %v201_v27, %v205_v28  ;;  %v409_v19 = vld [vmem:[#allocation2 + $0x908] sm:$0xff] }
  0xb8   :  { %2703 = vmatprep.subr.bf16.mxu1 %v7211_v41  ;;  %v7283_v41 = vcombine.high %v193_v37, %v197_v38  ;;  %v413_v20 = vld [vmem:[#allocation2 + $0x928] sm:$0xff] }
  0xb9   :  { %2626 = vmatpush2.bf16.msra.mxu0 %v7576_v5  ;;  %v189_v5 = vld [vmem:[#allocation2 + $0x228] sm:$0xff] }
  0xba   :  { %2627 = vmatprep.subr.bf16.mxu0 %v7569_v49  ;;  %v7282_v49 = vcombine.low %v193_v37, %v197_v38  ;;  %v7275_v51 = vcombine.high %v185_v46, %v189_v5  ;;  %v7274_v4 = vcombine.low %v185_v46, %v189_v5  ;;  %v257_v25 = vld [vmem:[#allocation2 + $0x448] sm:$0xff] }
  0xbb   :  { %2704 = vmatpush1.bf16.msra.mxu1 %v7210_v48  ;;  %v7394_v48 = vcombine.low %v305_v35, %v309_v36  ;;  %v261_v26 = vld [vmem:[#allocation2 + $0x468] sm:$0xff] }
  0xbc   :  { %2705 = vmatprep.subr.bf16.mxu1 %v7331_v50  ;;  %v7387_v50 = vcombine.high %v297_v43, %v301_v44  ;;  %v401_v27 = vld [vmem:[#allocation2 + $0x8c8] sm:$0xff] }
  0xbd   :  { %2628 = vmatpush2.bf16.msra.mxu0 %v7568_v55  ;;  %v437_v55 = vld [vmem:[#allocation2 + $0x9e8] sm:$0xff] }
  0xbe   :  { %2629 = vmatprep.subr.bf16.mxu0 %v7561_v57  ;;  %v7379_v57 = vcombine.high %v289_v52, %v293_v53  ;;  %v405_v28 = vld [vmem:[#allocation2 + $0x8e8] sm:$0xff] }
  0xbf   :  { %2706 = vmatpush2.bf16.msra.mxu1 %v7330_v56  ;;  %v7386_v56 = vcombine.low %v297_v43, %v301_v44  ;;  %v249_v35 = vld [vmem:[#allocation2 + $0x408] sm:$0xff] }
  0xc0   :  { %2707 = vmatprep.subr.bf16.mxu1 %v7323_v6  ;;  %v7523_v6 = vcombine.high %v433_v54, %v437_v55  ;;  %v253_v36 = vld [vmem:[#allocation2 + $0x428] sm:$0xff] }
  0xc1   :  { %2630 = vmatpush2.bf16.msra.mxu0 %v7560_v62  ;;  %v7378_v62 = vcombine.low %v289_v52, %v293_v53  ;;  %v393_v37 = vld [vmem:[#allocation2 + $0x888] sm:$0xff] }
  0xc2   :  { %2631 = vmatprep.subr.bf16.mxu0 %v7553_v1  ;;  %v7371_v1 = vcombine.high %v281_v58, %v285_v59  ;;  %v397_v38 = vld [vmem:[#allocation2 + $0x8a8] sm:$0xff] }
  0xc3   :  { %2708 = vmatpush2.bf16.msra.mxu1 %v7322_v63  ;;  %v7522_v63 = vcombine.low %v433_v54, %v437_v55  ;;  %v369_v43 = vld [vmem:[#allocation2 + $0x7c8] sm:$0xff] }
  0xc4   :  { %2709 = vmatprep.subr.bf16.mxu1 %v7315_v3  ;;  %v7515_v3 = vcombine.high %v425_v60, %v429_v61  ;;  %v373_v44 = vld [vmem:[#allocation2 + $0x7e8] sm:$0xff] }
  0xc5   :  { %2632 = vmatpush2.bf16.msra.mxu0 %v7552_v13  ;;  %v7370_v13 = vcombine.low %v281_v58, %v285_v59  ;;  %v385_v46 = vld [vmem:[#allocation2 + $0x848] sm:$0xff] }
  0xc6   :  { %2633 = vmatprep.subr.bf16.mxu0 %v7545_v15  ;;  %v7363_v15 = vcombine.high %v273_v9, %v277_v10  ;;  %v389_v5 = vld [vmem:[#allocation2 + $0x868] sm:$0xff] }
  0xc7   :  { %2710 = vmatpush2.bf16.msra.mxu1 %v7314_v14  ;;  %v7514_v14 = vcombine.low %v425_v60, %v429_v61  ;;  %v361_v52 = vld [vmem:[#allocation2 + $0x788] sm:$0xff] }
  0xc8   :  { %2711 = vmatprep.subr.bf16.mxu1 %v7307_v16  ;;  %v7507_v16 = vcombine.high %v417_v11, %v421_v12  ;;  %v365_v53 = vld [vmem:[#allocation2 + $0x7a8] sm:$0xff] }
  0xc9   :  { %2634 = vmatpush2.bf16.msra.mxu0 %v7544_v21  ;;  %v7362_v21 = vcombine.low %v273_v9, %v277_v10  ;;  %v377_v54 = vld [vmem:[#allocation2 + $0x808] sm:$0xff] }
  0xca   :  { %2635 = vmatprep.subr.bf16.mxu0 %v7537_v23  ;;  %v7355_v23 = vcombine.high %v265_v17, %v269_v18  ;;  %v381_v55 = vld [vmem:[#allocation2 + $0x828] sm:$0xff] }
  0xcb   :  { %2712 = vmatpush2.bf16.msra.mxu1 %v7306_v22  ;;  %v7506_v22 = vcombine.low %v417_v11, %v421_v12  ;;  %v353_v58 = vld [vmem:[#allocation2 + $0x748] sm:$0xff] }
  0xcc   :  { %2713 = vmatprep.subr.bf16.mxu1 %v7299_v24  ;;  %v7499_v24 = vcombine.high %v409_v19, %v413_v20  ;;  %v357_v59 = vld [vmem:[#allocation2 + $0x768] sm:$0xff] }
  0xcd   :  { %2636 = vmatpush2.bf16.msra.mxu0 %v7536_v29  ;;  %v7354_v29 = vcombine.low %v265_v17, %v269_v18  ;;  %v497_v60 = vld [vmem:[#allocation2 + $0xbc8] sm:$0xff] }
  0xce   :  { %2637 = vmatprep.subr.bf16.mxu0 %v7529_v32  ;;  %v7347_v32 = vcombine.high %v257_v25, %v261_v26  ;;  %v501_v61 = vld [vmem:[#allocation2 + $0xbe8] sm:$0xff] }
  0xcf   :  { %2714 = vmatpush2.bf16.msra.mxu1 %v7298_v30  ;;  %v7498_v30 = vcombine.low %v409_v19, %v413_v20  ;;  %v345_v9 = vld [vmem:[#allocation2 + $0x708] sm:$0xff] }
  0xd0   :  { %2715 = vmatprep.subr.bf16.mxu1 %v7291_v33  ;;  %v7491_v33 = vcombine.high %v401_v27, %v405_v28  ;;  %v349_v10 = vld [vmem:[#allocation2 + $0x728] sm:$0xff] }
  0xd1   :  { %2638 = vmatpush2.bf16.msra.mxu0 %v7528_v39  ;;  %v7346_v39 = vcombine.low %v257_v25, %v261_v26  ;;  %v489_v11 = vld [vmem:[#allocation2 + $0xb88] sm:$0xff] }
  0xd2   :  { %2730 = vmatprep.subr.bf16.mxu0 %v7395_v2  ;;  %v7339_v2 = vcombine.high %v249_v35, %v253_v36  ;;  %v493_v12 = vld [vmem:[#allocation2 + $0xba8] sm:$0xff] }
  0xd3   :  { %2716 = vmatpush2.bf16.msra.mxu1 %v7290_v40  ;;  %v7490_v40 = vcombine.low %v401_v27, %v405_v28  ;;  %v337_v17 = vld [vmem:[#allocation2 + $0x6c8] sm:$0xff] }
  0xd4   :  { %2717 = vmatprep.subr.bf16.mxu1 %v7283_v41  ;;  %2640 = vmatmul.mubr.bf16.vlgmr.msra.gmra.mxu0 %v9243_v45  ;;  %v7483_v41 = vcombine.high %v393_v37, %v397_v38  ;;  %v341_v18 = vld [vmem:[#allocation2 + $0x6e8] sm:$0xff] }
  0xd5   :  { %2731 = vmatpush1.bf16.msra.mxu0 %v7394_v48  ;;  %2762 = vmatprep.mubr.bf16.mxu0 %v9214_v8  ;;  %v7338_v48 = vcombine.low %v249_v35, %v253_v36  ;;  %v481_v19 = vld [vmem:[#allocation2 + $0xb48] sm:$0xff] }
  0xd6   :  { %2732 = vmatprep.subr.bf16.mxu0 %v7387_v50  ;;  %v7459_v50 = vcombine.high %v369_v43, %v373_v44  ;;  %v485_v20 = vld [vmem:[#allocation2 + $0xb68] sm:$0xff] }
  0xd7   :  { %2718 = vmatpush2.bf16.msra.mxu1 %v7282_v49  ;;  %v7482_v49 = vcombine.low %v393_v37, %v397_v38  ;;  %v329_v25 = vld [vmem:[#allocation2 + $0x688] sm:$0xff] }
  0xd8   :  { %2719 = vmatprep.subr.bf16.mxu1 %v7275_v51  ;;  %v7475_v51 = vcombine.high %v385_v46, %v389_v5  ;;  %v333_v26 = vld [vmem:[#allocation2 + $0x6a8] sm:$0xff] }
  0xd9   :  { %2733 = vmatpush1.bf16.msra.mxu0 %v7386_v56  ;;  %v7458_v56 = vcombine.low %v369_v43, %v373_v44  ;;  %v473_v27 = vld [vmem:[#allocation2 + $0xb08] sm:$0xff] }
  0xda   :  { %2734 = vmatprep.subr.bf16.mxu0 %v7379_v57  ;;  %v7451_v57 = vcombine.high %v361_v52, %v365_v53  ;;  %v477_v28 = vld [vmem:[#allocation2 + $0xb28] sm:$0xff] }
  0xdb   :  { %2720 = vmatpush2.bf16.msra.mxu1 %v7274_v4  ;;  %v7474_v4 = vcombine.low %v385_v46, %v389_v5  ;;  %v321_v35 = vld [vmem:[#allocation2 + $0x648] sm:$0xff] }
  0xdc   :  { %2771 = vmatprep.subr.bf16.mxu1 %v7523_v6  ;;  %v7467_v6 = vcombine.high %v377_v54, %v381_v55  ;;  %v325_v36 = vld [vmem:[#allocation2 + $0x668] sm:$0xff] }
  0xdd   :  { %2735 = vmatpush1.bf16.msra.mxu0 %v7378_v62  ;;  %v7450_v62 = vcombine.low %v361_v52, %v365_v53  ;;  %v465_v37 = vld [vmem:[#allocation2 + $0xac8] sm:$0xff]  ;;  %v178_v52 = vld [vmem:[#allocation2 + $0x1d0] sm:$0xff] }
  0xde   :  { %2722 = vmatmul.mubr.bf16.vlgmr.msra.gmra.mxu1 %v9220_v31  ;;  %2736 = vmatprep.subr.bf16.mxu0 %v7371_v1  ;;  %v7443_v1 = vcombine.high %v353_v58, %v357_v59  ;;  %v469_v38 = vld [vmem:[#allocation2 + $0xae8] sm:$0xff]  ;;  %v182_v53 = vld [vmem:[#allocation2 + $0x1f0] sm:$0xff] }
  0xdf   :  { %2772 = vmatpush1.bf16.msra.mxu1 %v7522_v63  ;;  %2803 = vmatprep.mubr.bf16.mxu1 %v9229_v0  ;;  %v7466_v63 = vcombine.low %v377_v54, %v381_v55  ;;  %v313_v43 = vld [vmem:[#allocation2 + $0x608] sm:$0xff] }
  0xe0   :  { %2773 = vmatprep.subr.bf16.mxu1 %v7515_v3  ;;  %v7587_v3 = vcombine.high %v497_v60, %v501_v61  ;;  %v317_v44 = vld [vmem:[#allocation2 + $0x628] sm:$0xff] }
  0xe1   :  { %2737 = vmatpush1.bf16.msra.mxu0 %v7370_v13  ;;  %v7442_v13 = vcombine.low %v353_v58, %v357_v59  ;;  %v457_v46 = vld [vmem:[#allocation2 + $0xa88] sm:$0xff]  ;;  %v170_v58 = vld [vmem:[#allocation2 + $0x190] sm:$0xff] }
  0xe2   :  { %2738 = vmatprep.subr.bf16.mxu0 %v7363_v15  ;;  %v7435_v15 = vcombine.high %v345_v9, %v349_v10  ;;  %v461_v5 = vld [vmem:[#allocation2 + $0xaa8] sm:$0xff]  ;;  %v174_v59 = vld [vmem:[#allocation2 + $0x1b0] sm:$0xff] }
  0xe3   :  { %2774 = vmatpush1.bf16.msra.mxu1 %v7514_v14  ;;  %v7586_v14 = vcombine.low %v497_v60, %v501_v61  ;;  %v449_v54 = vld [vmem:[#allocation2 + $0xa48] sm:$0xff] }
  0xe4   :  { %2775 = vmatprep.subr.bf16.mxu1 %v7507_v16  ;;  %v7579_v16 = vcombine.high %v489_v11, %v493_v12  ;;  %v453_v55 = vld [vmem:[#allocation2 + $0xa68] sm:$0xff] }
  0xe5   :  { %2739 = vmatpush1.bf16.msra.mxu0 %v7362_v21  ;;  %v7434_v21 = vcombine.low %v345_v9, %v349_v10  ;;  %v441_v60 = vld [vmem:[#allocation2 + $0xa08] sm:$0xff]  ;;  %v162_v9 = vld [vmem:[#allocation2 + $0x150] sm:$0xff] }
  0xe6   :  { %2740 = vmatprep.subr.bf16.mxu0 %v7355_v23  ;;  %v7427_v23 = vcombine.high %v337_v17, %v341_v18  ;;  %v445_v61 = vld [vmem:[#allocation2 + $0xa28] sm:$0xff]  ;;  %v166_v10 = vld [vmem:[#allocation2 + $0x170] sm:$0xff] }
  0xe7   :  { %2776 = vmatpush1.bf16.msra.mxu1 %v7506_v22  ;;  %v7578_v22 = vcombine.low %v489_v11, %v493_v12  ;;  %v505_v11 = vld [vmem:[#allocation2 + $0xc08] sm:$0xff] }
  0xe8   :  { %2777 = vmatprep.subr.bf16.mxu1 %v7499_v24  ;;  %v7571_v24 = vcombine.high %v481_v19, %v485_v20  ;;  %v509_v12 = vld [vmem:[#allocation2 + $0xc28] sm:$0xff] }
  0xe9   :  { %2741 = vmatpush1.bf16.msra.mxu0 %v7354_v29  ;;  %v7426_v29 = vcombine.low %v337_v17, %v341_v18  ;;  %v154_v17 = vld [vmem:[#allocation2 + $0x110] sm:$0xff] }
  0xea   :  { %2742 = vmatprep.subr.bf16.mxu0 %v7347_v32  ;;  %v7419_v32 = vcombine.high %v329_v25, %v333_v26  ;;  %v158_v18 = vld [vmem:[#allocation2 + $0x130] sm:$0xff] }
  0xeb   :  { %2778 = vmatpush1.bf16.msra.mxu1 %v7498_v30  ;;  %v7570_v30 = vcombine.low %v481_v19, %v485_v20  ;;  %v306_v19 = vld [vmem:[#allocation2 + $0x5d0] sm:$0xff] }
  0xec   :  { %2779 = vmatprep.subr.bf16.mxu1 %v7491_v33  ;;  %v7563_v33 = vcombine.high %v473_v27, %v477_v28  ;;  %v310_v20 = vld [vmem:[#allocation2 + $0x5f0] sm:$0xff] }
  0xed   :  { %2743 = vmatpush1.bf16.msra.mxu0 %v7346_v39  ;;  %v7418_v39 = vcombine.low %v329_v25, %v333_v26  ;;  %v146_v25 = vld [vmem:[#allocation2 + $0xd0] sm:$0xff] }
  0xee   :  { %2744 = vmatprep.subr.bf16.mxu0 %v7339_v2  ;;  %v7411_v2 = vcombine.high %v321_v35, %v325_v36  ;;  %v150_v26 = vld [vmem:[#allocation2 + $0xf0] sm:$0xff] }
  0xef   :  { %2780 = vmatpush1.bf16.msra.mxu1 %v7490_v40  ;;  %v7562_v40 = vcombine.low %v473_v27, %v477_v28  ;;  %v7244_v27 = vcombine.low %v154_v17, %v158_v18  ;;  %v7237_v28 = vcombine.high %v146_v25, %v150_v26 }
  0xf0   :  { %2781 = vmatprep.subr.bf16.mxu1 %v7483_v41  ;;  %v7555_v41 = vcombine.high %v465_v37, %v469_v38 }
  0xf1   :  { %2745 = vmatpush1.bf16.msra.mxu0 %v7338_v48  ;;  %v7410_v48 = vcombine.low %v321_v35, %v325_v36  ;;  %v7236_v35 = vcombine.low %v146_v25, %v150_v26  ;;  %v7396_v36 = vcombine.low %v306_v19, %v310_v20 }
  0xf2   :  { %2746 = vmatprep.subr.bf16.mxu0 %v7459_v50  ;;  %v7403_v50 = vcombine.high %v313_v43, %v317_v44 }
  0xf3   :  { %2782 = vmatpush1.bf16.msra.mxu1 %v7482_v49  ;;  %v7554_v49 = vcombine.low %v465_v37, %v469_v38 }
  0xf4   :  { %2783 = vmatprep.subr.bf16.mxu1 %v7475_v51  ;;  %v7547_v51 = vcombine.high %v457_v46, %v461_v5 }
  0xf5   :  { %2747 = vmatpush2.bf16.msra.mxu0 %v7458_v56  ;;  %v7402_v56 = vcombine.low %v313_v43, %v317_v44 }
  0xf6   :  { %2748 = vmatprep.subr.bf16.mxu0 %v7451_v57  ;;  %v7269_v57 = vcombine.high %v178_v52, %v182_v53 }
  0xf7   :  { %2784 = vmatpush1.bf16.msra.mxu1 %v7474_v4  ;;  %v7546_v4 = vcombine.low %v457_v46, %v461_v5 }
  0xf8   :  { %2785 = vmatprep.subr.bf16.mxu1 %v7467_v6  ;;  %v7539_v6 = vcombine.high %v449_v54, %v453_v55 }
  0xf9   :  { %2749 = vmatpush2.bf16.msra.mxu0 %v7450_v62  ;;  %v7268_v62 = vcombine.low %v178_v52, %v182_v53 }
  0xfa   :  { %2750 = vmatprep.subr.bf16.mxu0 %v7443_v1  ;;  %v7261_v1 = vcombine.high %v170_v58, %v174_v59 }
  0xfb   :  { %2786 = vmatpush1.bf16.msra.mxu1 %v7466_v63  ;;  %v7538_v63 = vcombine.low %v449_v54, %v453_v55 }
  0xfc   :  { %2787 = vmatprep.subr.bf16.mxu1 %v7587_v3  ;;  %v7531_v3 = vcombine.high %v441_v60, %v445_v61 }
  0xfd   :  { %2751 = vmatpush2.bf16.msra.mxu0 %v7442_v13  ;;  %v7260_v13 = vcombine.low %v170_v58, %v174_v59 }
  0xfe   :  { %2752 = vmatprep.subr.bf16.mxu0 %v7435_v15  ;;  %v7253_v15 = vcombine.high %v162_v9, %v166_v10 }
  0xff   :  { %2788 = vmatpush2.bf16.msra.mxu1 %v7586_v14  ;;  %v7530_v14 = vcombine.low %v441_v60, %v445_v61 }
 0x100   :  { %2789 = vmatprep.subr.bf16.mxu1 %v7579_v16  ;;  %v7595_v16 = vcombine.high %v505_v11, %v509_v12 }
 0x101   :  { %2753 = vmatpush2.bf16.msra.mxu0 %v7434_v21  ;;  %v7252_v21 = vcombine.low %v162_v9, %v166_v10 }
 0x102   :  { %2754 = vmatprep.subr.bf16.mxu0 %v7427_v23  ;;  %v7245_v23 = vcombine.high %v154_v17, %v158_v18 }
 0x103   :  { %2790 = vmatpush2.bf16.msra.mxu1 %v7578_v22  ;;  %v7594_v22 = vcombine.low %v505_v11, %v509_v12 }
 0x104   :  { %2791 = vmatprep.subr.bf16.mxu1 %v7571_v24  ;;  %v7397_v24 = vcombine.high %v306_v19, %v310_v20 }
 0x105   :  { %2755 = vmatpush2.bf16.msra.mxu0 %v7426_v29  ;;  %v138_v29 = vld [vmem:[#allocation2 + $0x90] sm:$0xff] }
 0x106   :  { %2756 = vmatprep.subr.bf16.mxu0 %v7419_v32  ;;  %v298_v32 = vld [vmem:[#allocation2 + $0x590] sm:$0xff] }
 0x107   :  { %2792 = vmatpush2.bf16.msra.mxu1 %v7570_v30  ;;  %v142_v30 = vld [vmem:[#allocation2 + $0xb0] sm:$0xff] }
 0x108   :  { %2793 = vmatprep.subr.bf16.mxu1 %v7563_v33  ;;  %v302_v33 = vld [vmem:[#allocation2 + $0x5b0] sm:$0xff]  ;;  %v7229_v37 = vcombine.high %v138_v29, %v142_v30  ;;  %v7228_v43 = vcombine.low %v138_v29, %v142_v30 }
 0x109   :  { %2757 = vmatpush2.bf16.msra.mxu0 %v7418_v39  ;;  %v7389_v38 = vcombine.high %v298_v32, %v302_v33  ;;  %v130_v39 = vld [vmem:[#allocation2 + $0x50] sm:$0xff]  ;;  %v7388_v44 = vcombine.low %v298_v32, %v302_v33 }
 0x10a   :  { %2758 = vmatprep.subr.bf16.mxu0 %v7411_v2  ;;  %v290_v2 = vld [vmem:[#allocation2 + $0x550] sm:$0xff] }
 0x10b   :  { %2794 = vmatpush2.bf16.msra.mxu1 %v7562_v40  ;;  %v134_v40 = vld [vmem:[#allocation2 + $0x70] sm:$0xff] }
 0x10c   :  { %2795 = vmatprep.subr.bf16.mxu1 %v7555_v41  ;;  %v294_v41 = vld [vmem:[#allocation2 + $0x570] sm:$0xff]  ;;  %v7221_v46 = vcombine.high %v130_v39, %v134_v40  ;;  %v7220_v52 = vcombine.low %v130_v39, %v134_v40 }
 0x10d   :  { %2759 = vmatpush2.bf16.msra.mxu0 %v7410_v48  ;;  %v7381_v5 = vcombine.high %v290_v2, %v294_v41  ;;  %v122_v48 = vld [vmem:[#allocation2 + $0x10] sm:$0xff]  ;;  %v7380_v53 = vcombine.low %v290_v2, %v294_v41 }
 0x10e   :  { %2760 = vmatprep.subr.bf16.mxu0 %v7403_v50  ;;  %v282_v50 = vld [vmem:[#allocation2 + $0x510] sm:$0xff] }
 0x10f   :  { %2796 = vmatpush2.bf16.msra.mxu1 %v7554_v49  ;;  %v126_v49 = vld [vmem:[#allocation2 + $0x30] sm:$0xff] }
 0x110   :  { %2797 = vmatprep.subr.bf16.mxu1 %v7547_v51  ;;  %v286_v51 = vld [vmem:[#allocation2 + $0x530] sm:$0xff]  ;;  %v7213_v54 = vcombine.high %v122_v48, %v126_v49  ;;  %v7212_v58 = vcombine.low %v122_v48, %v126_v49 }
 0x111   :  { %2761 = vmatpush2.bf16.msra.mxu0 %v7402_v56  ;;  %v7373_v55 = vcombine.high %v282_v50, %v286_v51  ;;  %v242_v56 = vld [vmem:[#allocation2 + $0x3d0] sm:$0xff]  ;;  %v7372_v59 = vcombine.low %v282_v50, %v286_v51 }
 0x112   :  { %2853 = vmatprep.subr.bf16.mxu0 %v7269_v57  ;;  %v274_v57 = vld [vmem:[#allocation2 + $0x4d0] sm:$0xff] }
 0x113   :  { %2798 = vmatpush2.bf16.msra.mxu1 %v7546_v4  ;;  %v246_v4 = vld [vmem:[#allocation2 + $0x3f0] sm:$0xff] }
 0x114   :  { %2799 = vmatprep.subr.bf16.mxu1 %v7539_v6  ;;  %2763 = vmatmul.mubr.bf16.vlgmr.msra.gmra.mxu0 %v9224_v34  ;;  %v278_v6 = vld [vmem:[#allocation2 + $0x4f0] sm:$0xff]  ;;  %v7333_v60 = vcombine.high %v242_v56, %v246_v4  ;;  %v7332_v9 = vcombine.low %v242_v56, %v246_v4 }
 0x115   :  { %2854 = vmatpush1.bf16.msra.mxu0 %v7268_v62  ;;  %2885 = vmatprep.mubr.bf16.mxu0 %v9212_v7  ;;  %v7365_v61 = vcombine.high %v274_v57, %v278_v6  ;;  %v234_v62 = vld [vmem:[#allocation2 + $0x390] sm:$0xff]  ;;  %v7364_v10 = vcombine.low %v274_v57, %v278_v6 }
 0x116   :  { %2855 = vmatprep.subr.bf16.mxu0 %v7261_v1  ;;  %v266_v1 = vld [vmem:[#allocation2 + $0x490] sm:$0xff] }
 0x117   :  { %2800 = vmatpush2.bf16.msra.mxu1 %v7538_v63  ;;  %v238_v63 = vld [vmem:[#allocation2 + $0x3b0] sm:$0xff] }
 0x118   :  { %2801 = vmatprep.subr.bf16.mxu1 %v7531_v3  ;;  %v270_v3 = vld [vmem:[#allocation2 + $0x4b0] sm:$0xff]  ;;  %v7325_v11 = vcombine.high %v234_v62, %v238_v63  ;;  %v7324_v17 = vcombine.low %v234_v62, %v238_v63 }
 0x119   :  { %2856 = vmatpush1.bf16.msra.mxu0 %v7260_v13  ;;  %v7357_v12 = vcombine.high %v266_v1, %v270_v3  ;;  %v226_v13 = vld [vmem:[#allocation2 + $0x350] sm:$0xff]  ;;  %v7356_v18 = vcombine.low %v266_v1, %v270_v3 }
 0x11a   :  { %2857 = vmatprep.subr.bf16.mxu0 %v7253_v15  ;;  %v258_v15 = vld [vmem:[#allocation2 + $0x450] sm:$0xff] }
 0x11b   :  { %2802 = vmatpush2.bf16.msra.mxu1 %v7530_v14  ;;  %v230_v14 = vld [vmem:[#allocation2 + $0x370] sm:$0xff] }
 0x11c   :  { %2826 = vmatprep.subr.bf16.mxu1 %v7595_v16  ;;  %v262_v16 = vld [vmem:[#allocation2 + $0x470] sm:$0xff]  ;;  %v7317_v19 = vcombine.high %v226_v13, %v230_v14  ;;  %v7316_v25 = vcombine.low %v226_v13, %v230_v14  ;;  %v9261_v14 = vld [vmem:[#allocation11] sm:$0xff] }
 0x11d   :  { %2858 = vmatpush1.bf16.msra.mxu0 %v7252_v21  ;;  %v7349_v20 = vcombine.high %v258_v15, %v262_v16  ;;  %v218_v21 = vld [vmem:[#allocation2 + $0x310] sm:$0xff]  ;;  %v7348_v26 = vcombine.low %v258_v15, %v262_v16 }
 0x11e   :  { %2804 = vmatmul.mubr.bf16.vlgmr.msra.gmra.mxu1 %v9243_v45  ;;  %2859 = vmatprep.subr.bf16.mxu0 %v7245_v23  ;;  %v250_v23 = vld [vmem:[#allocation2 + $0x410] sm:$0xff] }
 0x11f   :  { %2827 = vmatpush1.bf16.msra.mxu1 %v7594_v22  ;;  %2844 = vmatprep.mubr.bf16.mxu1 %v9103_v42  ;;  %v222_v22 = vld [vmem:[#allocation2 + $0x330] sm:$0xff] }
 0x120   :  { %2894 = vmatprep.subr.bf16.mxu1 %v7397_v24  ;;  %v254_v24 = vld [vmem:[#allocation2 + $0x430] sm:$0xff] }
 0x121   :  { %2860 = vmatpush1.bf16.msra.mxu0 %v7244_v27  ;;  %v7309_v27 = vcombine.high %v218_v21, %v222_v22  ;;  %v210_v29 = vld [vmem:[#allocation2 + $0x2d0] sm:$0xff] }
 0x122   :  { %2861 = vmatprep.subr.bf16.mxu0 %v7237_v28  ;;  %v7341_v28 = vcombine.high %v250_v23, %v254_v24  ;;  %v214_v30 = vld [vmem:[#allocation2 + $0x2f0] sm:$0xff] }
 0x123   :  { %v370_v32 = vld [vmem:[#allocation2 + $0x7d0] sm:$0xff] }
 0x124   :  { %v374_v33 = vld [vmem:[#allocation2 + $0x7f0] sm:$0xff] }
 0x125   :  { %2862 = vmatpush1.bf16.msra.mxu0 %v7236_v35  ;;  %v7308_v35 = vcombine.low %v218_v21, %v222_v22  ;;  %v202_v39 = vld [vmem:[#allocation2 + $0x290] sm:$0xff] }
 0x126   :  { %7601 = vmatmul.mubr.msk.bf16.vlgmr.msra.gmra.mxu1 %vm2521_vm0, %v9236_v47  ;;  %2863 = vmatprep.subr.bf16.mxu0 %v7229_v37  ;;  %v7301_v37 = vcombine.high %v210_v29, %v214_v30  ;;  %v206_v40 = vld [vmem:[#allocation2 + $0x2b0] sm:$0xff] }
 0x127   :  { %2895 = vmatpush1.bf16.msra.mxu1 %v7396_v36  ;;  %2926 = vmatprep.mubr.bf16.mxu1 %v9214_v8  ;;  %v7340_v36 = vcombine.low %v250_v23, %v254_v24  ;;  %v362_v2 = vld [vmem:[#allocation2 + $0x790] sm:$0xff] }
 0x128   :  { %2896 = vmatprep.subr.bf16.mxu1 %v7389_v38  ;;  %v7461_v38 = vcombine.high %v370_v32, %v374_v33  ;;  %v366_v41 = vld [vmem:[#allocation2 + $0x7b0] sm:$0xff] }
 0x129   :  { %2864 = vmatpush1.bf16.msra.mxu0 %v7228_v43  ;;  %v7300_v43 = vcombine.low %v210_v29, %v214_v30  ;;  %v194_v48 = vld [vmem:[#allocation2 + $0x250] sm:$0xff] }
 0x12a   :  { %2865 = vmatprep.subr.bf16.mxu0 %v7221_v46  ;;  %v7293_v46 = vcombine.high %v202_v39, %v206_v40  ;;  %v198_v49 = vld [vmem:[#allocation2 + $0x270] sm:$0xff] }
 0x12b   :  { %2897 = vmatpush1.bf16.msra.mxu1 %v7388_v44  ;;  %v7460_v44 = vcombine.low %v370_v32, %v374_v33  ;;  %v354_v50 = vld [vmem:[#allocation2 + $0x750] sm:$0xff] }
 0x12c   :  { %2898 = vmatprep.subr.bf16.mxu1 %v7381_v5  ;;  %v7453_v5 = vcombine.high %v362_v2, %v366_v41  ;;  %v358_v51 = vld [vmem:[#allocation2 + $0x770] sm:$0xff] }
 0x12d   :  { %2866 = vmatpush1.bf16.msra.mxu0 %v7220_v52  ;;  %v7292_v52 = vcombine.low %v202_v39, %v206_v40  ;;  %v7445_v56 = vcombine.high %v354_v50, %v358_v51  ;;  %v186_v4 = vld [vmem:[#allocation2 + $0x210] sm:$0xff] }
 0x12e   :  { %2867 = vmatprep.subr.bf16.mxu0 %v7213_v54  ;;  %v7452_v54 = vcombine.low %v362_v2, %v366_v41  ;;  %v190_v57 = vld [vmem:[#allocation2 + $0x230] sm:$0xff] }
 0x12f   :  { %2899 = vmatpush1.bf16.msra.mxu1 %v7380_v53  ;;  %v521_v53 = vlaneseq  ;;  %v346_v6 = vld [vmem:[#allocation2 + $0x710] sm:$0xff]  ;;  %v7277_v62 = vcombine.high %v186_v4, %v190_v57 }
 0x130   :  { %2900 = vmatprep.subr.bf16.mxu1 %v7373_v55  ;;  %v7285_v55 = vcombine.high %v194_v48, %v198_v49  ;;  %v434_v1 = vld [vmem:[#allocation2 + $0x9d0] sm:$0xff] }
 0x131   :  { %2868 = vmatpush1.bf16.msra.mxu0 %v7212_v58  ;;  %v350_v58 = vld [vmem:[#allocation2 + $0x730] sm:$0xff] }
 0x132   :  { %2869 = vmatprep.subr.bf16.mxu0 %v7333_v60  ;;  %v9256_v60 = vshrl.u32 %v521_v53, 7  ;;  %v7437_v63 = vcombine.high %v346_v6, %v350_v58  ;;  %v438_v3 = vld [vmem:[#allocation2 + $0x9f0] sm:$0xff]  ;;  %v7436_v13 = vcombine.low %v346_v6, %v350_v58 }
 0x133   :  { %2901 = vmatpush1.bf16.msra.mxu1 %v7372_v59  ;;  %v7284_v59 = vcombine.low %v194_v48, %v198_v49  ;;  %v7525_v15 = vcombine.high %v434_v1, %v438_v3  ;;  %v334_v21 = vld [vmem:[#allocation2 + $0x6b0] sm:$0xff]  ;;  %v7524_v23 = vcombine.low %v434_v1, %v438_v3 }
 0x134   :  { %2902 = vmatprep.subr.bf16.mxu1 %v7365_v61  ;;  %v7444_v61 = vcombine.low %v354_v50, %v358_v51  ;;  %v422_v29 = vld [vmem:[#allocation2 + $0x970] sm:$0xff] }
 0x135   :  { %2870 = vmatpush2.bf16.msra.mxu0 %v7332_v9  ;;  %v338_v9 = vld [vmem:[#allocation2 + $0x6d0] sm:$0xff] }
 0x136   :  { %2871 = vmatprep.subr.bf16.mxu0 %v7325_v11  ;;  %v7276_v11 = vcombine.low %v186_v4, %v190_v57  ;;  %v322_v32 = vld [vmem:[#allocation2 + $0x650] sm:$0xff] }
 0x137   :  { %2903 = vmatpush1.bf16.msra.mxu1 %v7364_v10  ;;  %v342_v10 = vld [vmem:[#allocation2 + $0x6f0] sm:$0xff] }
 0x138   :  { %2904 = vmatprep.subr.bf16.mxu1 %v7357_v12  ;;  %v9259_v12 = vsub.s32 0, %v9256_v60  ;;  %v7429_v16 = vcombine.high %v338_v9, %v342_v10  ;;  %v7428_v24 = vcombine.low %v338_v9, %v342_v10  ;;  %v326_v33 = vld [vmem:[#allocation2 + $0x670] sm:$0xff] }
 0x139   :  { %2872 = vmatpush2.bf16.msra.mxu0 %v7324_v17  ;;  %v9264_v17 = vsub.s32 1, %v9256_v60  ;;  %v314_v48 = vld [vmem:[#allocation2 + $0x610] sm:$0xff] }
 0x13a   :  { %2873 = vmatprep.subr.bf16.mxu0 %v7317_v19  ;;  %v430_v19 = vld [vmem:[#allocation2 + $0x9b0] sm:$0xff]  ;;  %v524_v22 = vrot.slane %v9261_v14, %v9259_v12 }
 0x13b   :  { %2905 = vmatpush1.bf16.msra.mxu1 %v7356_v18  ;;  %v426_v18 = vld [vmem:[#allocation2 + $0x990] sm:$0xff] }
 0x13c   :  { %2906 = vmatprep.subr.bf16.mxu1 %v7349_v20  ;;  %v330_v20 = vld [vmem:[#allocation2 + $0x690] sm:$0xff] }
 0x13d   :  { %2874 = vmatpush2.bf16.msra.mxu0 %v7316_v25  ;;  %v7517_v25 = vcombine.high %v426_v18, %v430_v19  ;;  %v7420_v39 = vcombine.low %v330_v20, %v334_v21  ;;  %v318_v49 = vld [vmem:[#allocation2 + $0x630] sm:$0xff] }
 0x13e   :  { %2875 = vmatprep.subr.bf16.mxu0 %v7309_v27  ;;  %v7421_v27 = vcombine.high %v330_v20, %v334_v21  ;;  %v7405_v57 = vcombine.high %v314_v48, %v318_v49  ;;  %v402_v6 = vld [vmem:[#allocation2 + $0x8d0] sm:$0xff]  ;;  %v7404_v1 = vcombine.low %v314_v48, %v318_v49 }
 0x13f   :  { %2907 = vmatpush1.bf16.msra.mxu1 %v7348_v26  ;;  %v528_v26 = vrot.slane %v9261_v14, %v9264_v17  ;;  %v406_v58 = vld [vmem:[#allocation2 + $0x8f0] sm:$0xff] }
 0x140   :  { %2908 = vmatprep.subr.bf16.mxu1 %v7341_v28  ;;  %v418_v28 = vld [vmem:[#allocation2 + $0x950] sm:$0xff]  ;;  %v7493_v3 = vcombine.high %v402_v6, %v406_v58 }
 0x141   :  { %2876 = vmatpush2.bf16.msra.mxu0 %v7308_v35  ;;  %v7509_v40 = vcombine.high %v418_v28, %v422_v29  ;;  %v7508_v53 = vcombine.low %v418_v28, %v422_v29  ;;  %v378_v28 = vld [vmem:[#allocation2 + $0x810] sm:$0xff] }
 0x142   :  { %2877 = vmatprep.subr.bf16.mxu0 %v7301_v37  ;;  %v7516_v37 = vcombine.low %v426_v18, %v430_v19  ;;  %v7492_v19 = vcombine.low %v402_v6, %v406_v58  ;;  %v382_v29 = vld [vmem:[#allocation2 + $0x830] sm:$0xff]  ;;  %v147_v6 = vld [vmem:[#allocation2 + $0xd8] sm:$0xff] }
 0x143   :  { %2909 = vmatpush1.bf16.msra.mxu1 %v7340_v36  ;;  %v490_v48 = vld [vmem:[#allocation2 + $0xb90] sm:$0xff]  ;;  %v151_v58 = vld [vmem:[#allocation2 + $0xf8] sm:$0xff] }
 0x144   :  { %2910 = vmatprep.subr.bf16.mxu1 %v7461_v38  ;;  %v494_v49 = vld [vmem:[#allocation2 + $0xbb0] sm:$0xff] }
 0x145   :  { %2878 = vmatpush2.bf16.msra.mxu0 %v7300_v43 }
 0x146   :  { %2879 = vmatprep.subr.bf16.mxu0 %v7293_v46  ;;  %v410_v46 = vld [vmem:[#allocation2 + $0x910] sm:$0xff] }
 0x147   :  { %2911 = vmatpush2.bf16.msra.mxu1 %v7460_v44  ;;  %v7413_v44 = vcombine.high %v322_v32, %v326_v33 }
 0x148   :  { %2912 = vmatprep.subr.bf16.mxu1 %v7453_v5  ;;  %v414_v5 = vld [vmem:[#allocation2 + $0x930] sm:$0xff] }
 0x149   :  { %2880 = vmatpush2.bf16.msra.mxu0 %v7292_v52 }
 0x14a   :  { %2881 = vmatprep.subr.bf16.mxu0 %v7285_v55  ;;  %v7501_v55 = vcombine.high %v410_v46, %v414_v5 }
 0x14b   :  { %2913 = vmatpush2.bf16.msra.mxu1 %v7452_v54  ;;  %v7412_v54 = vcombine.low %v322_v32, %v326_v33  ;;  %v175_v32 = vld [vmem:[#allocation2 + $0x1b8] sm:$0xff] }
 0x14c   :  { %2914 = vmatprep.subr.bf16.mxu1 %v7445_v56 }
 0x14d   :  { %2882 = vmatpush2.bf16.msra.mxu0 %v7284_v59  ;;  %v506_v59 = vld [vmem:[#allocation2 + $0xc10] sm:$0xff] }
 0x14e   :  { %2883 = vmatprep.subr.bf16.mxu0 %v7277_v62 }
 0x14f   :  { %2915 = vmatpush2.bf16.msra.mxu1 %v7444_v61  ;;  %v510_v61 = vld [vmem:[#allocation2 + $0xc30] sm:$0xff] }
 0x150   :  { %2916 = vmatprep.subr.bf16.mxu1 %v7437_v63  ;;  %v7500_v63 = vcombine.low %v410_v46, %v414_v5  ;;  %v7597_v10 = vcombine.high %v506_v59, %v510_v61  ;;  %v7596_v20 = vcombine.low %v506_v59, %v510_v61  ;;  %v7580_v59 = vcombine.low %v490_v48, %v494_v49 }
 0x151   :  { %2884 = vmatpush2.bf16.msra.mxu0 %v7276_v11  ;;  %v394_v11 = vld [vmem:[#allocation2 + $0x890] sm:$0xff] }
 0x152   :  { %2935 = vmatprep.subr.bf16.mxu0 %v7525_v15  ;;  %v179_v15 = vld [vmem:[#allocation2 + $0x1d8] sm:$0xff] }
 0x153   :  { %2917 = vmatpush2.bf16.msra.mxu1 %v7436_v13  ;;  %v398_v13 = vld [vmem:[#allocation2 + $0x8b0] sm:$0xff] }
 0x154   :  { %2918 = vmatprep.subr.bf16.mxu1 %v7429_v16  ;;  %v2559_v30 = vpop.f32.mrf.mxu0  ;;  %2886 = vmatmul.mubr.bf16.vlgmr.msra.gmra.mxu0 %v9220_v31  ;;  %v183_v16 = vld [vmem:[#allocation2 + $0x1f8] sm:$0xff]  ;;  %v7485_v21 = vcombine.high %v394_v11, %v398_v13 }
 0x155   :  { %v2560_v35 = vadd.f32 %v2559_v30, %v524_v22  ;;  %2936 = vmatpush1.bf16.msra.mxu0 %v7524_v23  ;;  %2967 = vmatprep.mubr.bf16.mxu0 %v9229_v0  ;;  %v7271_v23 = vcombine.high %v179_v15, %v183_v16  ;;  %v171_v30 = vld [vmem:[#allocation2 + $0x198] sm:$0xff] }
 0x156   :  { %v2600_v36 = vpop.f32.mrf.mxu1  ;;  %v2561_v38 = vpop.f32.mrf.mxu0  ;;  %2937 = vmatprep.subr.bf16.mxu0 %v7517_v25  ;;  %v390_v25 = vld [vmem:[#allocation2 + $0x870] sm:$0xff] }
 0x157   :  { %2919 = vmatpush2.bf16.msra.mxu1 %v7428_v24  ;;  %v9272_v2 = vadd.f32 %v2600_v36, %v2560_v35  ;;  %v2562_v41 = vadd.f32 %v2561_v38, %v528_v26  ;;  %v386_v24 = vld [vmem:[#allocation2 + $0x850] sm:$0xff]  ;;  %v7484_v26 = vcombine.low %v394_v11, %v398_v13  ;;  %v7270_v35 = vcombine.low %v179_v15, %v183_v16  ;;  %v143_v11 = vld [vmem:[#allocation2 + $0xb8] sm:$0xff] }
 0x158   :  { %v2602_v43 = vpop.f32.mrf.mxu1  ;;  %2920 = vmatprep.subr.bf16.mxu1 %v7421_v27  ;;  %v2563_v50 = vpop.f32.mrf.mxu0  ;;  %v7477_v27 = vcombine.high %v386_v24, %v390_v25  ;;  %v7476_v33 = vcombine.low %v386_v24, %v390_v25  ;;  %v7469_v36 = vcombine.high %v378_v28, %v382_v29  ;;  %v498_v38 = vld [vmem:[#allocation2 + $0xbd0] sm:$0xff]  ;;  %v7238_v15 = vcombine.low %v147_v6, %v151_v58 }
 0x159   :  { %v9274_v51 = vadd.f32 %v2602_v43, %v2562_v41  ;;  %2938 = vmatpush1.bf16.msra.mxu0 %v7516_v37  ;;  %v7263_v37 = vcombine.high %v171_v30, %v175_v32  ;;  %v167_v41 = vld [vmem:[#allocation2 + $0x178] sm:$0xff]  ;;  %v7468_v43 = vcombine.low %v378_v28, %v382_v29  ;;  %v462_v28 = vld [vmem:[#allocation2 + $0xab0] sm:$0xff] }
 0x15a   :  { %v2604_v52 = vpop.f32.mrf.mxu1  ;;  %2939 = vmatprep.subr.bf16.mxu0 %v7509_v40  ;;  %v2564_v56 = vpop.f32.mrf.mxu0  ;;  %v163_v40 = vld [vmem:[#allocation2 + $0x158] sm:$0xff] }
 0x15b   :  { %2921 = vmatpush2.bf16.msra.mxu1 %v7420_v39  ;;  %v502_v39 = vld [vmem:[#allocation2 + $0xbf0] sm:$0xff]  ;;  %v7255_v5 = vcombine.high %v163_v40, %v167_v41  ;;  %v155_v50 = vld [vmem:[#allocation2 + $0x118] sm:$0xff] }
 0x15c   :  { %v2605_v4 = vpop.f32.mrf.mxu1  ;;  %2922 = vmatprep.subr.bf16.mxu1 %v7413_v44  ;;  %v7262_v44 = vcombine.low %v171_v30, %v175_v32  ;;  %v7589_v46 = vcombine.high %v498_v38, %v502_v39  ;;  %v159_v52 = vld [vmem:[#allocation2 + $0x138] sm:$0xff] }
 0x15d   :  { %2940 = vmatpush1.bf16.msra.mxu0 %v7508_v53  ;;  %v7588_v53 = vcombine.low %v498_v38, %v502_v39  ;;  %v7247_v56 = vcombine.high %v155_v50, %v159_v52  ;;  %v482_v4 = vld [vmem:[#allocation2 + $0xb50] sm:$0xff]  ;;  %v7246_v61 = vcombine.low %v155_v50, %v159_v52  ;;  %v123_v29 = vld [vmem:[#allocation2 + $0x18] sm:$0xff] }
 0x15e   :  { %v9276_v62 = vpop.f32.mrf.mxu1  ;;  %2941 = vmatprep.subr.bf16.mxu0 %v7501_v55  ;;  %v7581_v55 = vcombine.high %v490_v48, %v494_v49  ;;  %v127_v30 = vld [vmem:[#allocation2 + $0x38] sm:$0xff]  ;;  %v454_v38 = vld [vmem:[#allocation2 + $0xa70] sm:$0xff] }
 0x15f   :  { %2923 = vmatpush2.bf16.msra.mxu1 %v7412_v54  ;;  %v7254_v54 = vcombine.low %v163_v40, %v167_v41  ;;  %v243_v39 = vld [vmem:[#allocation2 + $0x3d8] sm:$0xff]  ;;  %v446_v48 = vld [vmem:[#allocation2 + $0xa30] sm:$0xff] }
 0x160   :  { %v9278_v9 = vpop.f32.mrf.mxu1  ;;  %2924 = vmatprep.subr.bf16.mxu1 %v7405_v57  ;;  %v486_v57 = vld [vmem:[#allocation2 + $0xb70] sm:$0xff]  ;;  %v247_v40 = vld [vmem:[#allocation2 + $0x3f8] sm:$0xff] }
 0x161   :  { %2942 = vmatpush1.bf16.msra.mxu0 %v7500_v63  ;;  %v7239_v63 = vcombine.high %v147_v6, %v151_v58  ;;  %v7572_v13 = vcombine.low %v482_v4, %v486_v57  ;;  %v235_v49 = vld [vmem:[#allocation2 + $0x398] sm:$0xff] }
 0x162   :  { %v2686_v18 = vpop.f32.mrf.mxu1  ;;  %2943 = vmatprep.subr.bf16.mxu0 %v7493_v3  ;;  %v478_v3 = vld [vmem:[#allocation2 + $0xb30] sm:$0xff]  ;;  %v239_v50 = vld [vmem:[#allocation2 + $0x3b8] sm:$0xff] }
 0x163   :  { %2925 = vmatpush2.bf16.msra.mxu1 %v7404_v1  ;;  %v474_v1 = vld [vmem:[#allocation2 + $0xb10] sm:$0xff]  ;;  %v231_v6 = vld [vmem:[#allocation2 + $0x378] sm:$0xff] }
 0x164   :  { %v2687_v22 = vpop.f32.mrf.mxu1  ;;  %2990 = vmatprep.subr.bf16.mxu1 %v7597_v10  ;;  %v139_v10 = vld [vmem:[#allocation2 + $0x98] sm:$0xff]  ;;  %v7565_v16 = vcombine.high %v474_v1, %v478_v3 }
 0x165   :  { %2944 = vmatpush1.bf16.msra.mxu0 %v7492_v19  ;;  %v7231_v18 = vcombine.high %v139_v10, %v143_v11  ;;  %v466_v19 = vld [vmem:[#allocation2 + $0xad0] sm:$0xff]  ;;  %v135_v22 = vld [vmem:[#allocation2 + $0x78] sm:$0xff]  ;;  %v7230_v24 = vcombine.low %v139_v10, %v143_v11 }
 0x166   :  { %2927 = vmatmul.mubr.bf16.vlgmr.msra.gmra.mxu1 %v9224_v34  ;;  %2945 = vmatprep.subr.bf16.mxu0 %v7485_v21  ;;  %v131_v21 = vld [vmem:[#allocation2 + $0x58] sm:$0xff] }
 0x167   :  { %2991 = vmatpush1.bf16.msra.mxu1 %v7596_v20  ;;  %3008 = vmatprep.mubr.bf16.mxu1 %v9103_v42  ;;  %v470_v20 = vld [vmem:[#allocation2 + $0xaf0] sm:$0xff]  ;;  %v223_v10 = vld [vmem:[#allocation2 + $0x338] sm:$0xff] }
 0x168   :  { %3017 = vmatprep.subr.bf16.mxu1 %v7271_v23  ;;  %v7564_v23 = vcombine.low %v474_v1, %v478_v3  ;;  %v7557_v25 = vcombine.high %v466_v19, %v470_v20  ;;  %v7556_v32 = vcombine.low %v466_v19, %v470_v20  ;;  %v303_v1 = vld [vmem:[#allocation2 + $0x5b8] sm:$0xff] }
 0x169   :  { %2946 = vmatpush1.bf16.msra.mxu0 %v7484_v26  ;;  %v7223_v26 = vcombine.high %v131_v21, %v135_v22  ;;  %v219_v3 = vld [vmem:[#allocation2 + $0x318] sm:$0xff] }
 0x16a   :  { %2947 = vmatprep.subr.bf16.mxu0 %v7477_v27  ;;  %v458_v27 = vld [vmem:[#allocation2 + $0xa90] sm:$0xff]  ;;  %v295_v19 = vld [vmem:[#allocation2 + $0x578] sm:$0xff] }
 0x16b   :  { %v7548_v41 = vcombine.low %v458_v27, %v462_v28 }
 0x16d   :  { %2948 = vmatpush1.bf16.msra.mxu0 %v7476_v33  ;;  %v7222_v33 = vcombine.low %v131_v21, %v135_v22  ;;  %v211_v21 = vld [vmem:[#allocation2 + $0x2d8] sm:$0xff] }
 0x16e   :  { %7602 = vmatmul.mubr.msk.bf16.vlgmr.msra.gmra.mxu1 %vm2521_vm0, %v9236_v47  ;;  %2949 = vmatprep.subr.bf16.mxu0 %v7469_v36  ;;  %v7215_v36 = vcombine.high %v123_v29, %v127_v30  ;;  %v215_v22 = vld [vmem:[#allocation2 + $0x2f8] sm:$0xff] }
 0x16f   :  { %3018 = vmatpush1.bf16.msra.mxu1 %v7270_v35  ;;  %3049 = vmatprep.mubr.bf16.mxu1 %v9212_v7  ;;  %v7573_v7 = vcombine.high %v482_v4, %v486_v57  ;;  %v7549_v35 = vcombine.high %v458_v27, %v462_v28  ;;  %v311_v4 = vld [vmem:[#allocation2 + $0x5f8] sm:$0xff] }
 0x170   :  { %3019 = vmatprep.subr.bf16.mxu1 %v7263_v37  ;;  %v450_v37 = vld [vmem:[#allocation2 + $0xa50] sm:$0xff]  ;;  %v227_v57 = vld [vmem:[#allocation2 + $0x358] sm:$0xff] }
 0x171   :  { %2950 = vmatpush1.bf16.msra.mxu0 %v7468_v43  ;;  %v7214_v43 = vcombine.low %v123_v29, %v127_v30  ;;  %v7540_v52 = vcombine.low %v450_v37, %v454_v38  ;;  %v7303_v30 = vcombine.high %v211_v21, %v215_v22 }
 0x172   :  { %2951 = vmatprep.subr.bf16.mxu0 %v7589_v46  ;;  %v7335_v46 = vcombine.high %v243_v39, %v247_v40 }
 0x173   :  { %3020 = vmatpush1.bf16.msra.mxu1 %v7262_v44  ;;  %v7541_v44 = vcombine.high %v450_v37, %v454_v38 }
 0x174   :  { %3021 = vmatprep.subr.bf16.mxu1 %v7255_v5  ;;  %v442_v5 = vld [vmem:[#allocation2 + $0xa10] sm:$0xff] }
 0x175   :  { %2952 = vmatpush2.bf16.msra.mxu0 %v7588_v53  ;;  %v7334_v53 = vcombine.low %v243_v39, %v247_v40  ;;  %v7532_v58 = vcombine.low %v442_v5, %v446_v48  ;;  %v7302_v39 = vcombine.low %v211_v21, %v215_v22  ;;  %v431_v21 = vld [vmem:[#allocation2 + $0x9b8] sm:$0xff] }
 0x176   :  { %2953 = vmatprep.subr.bf16.mxu0 %v7581_v55  ;;  %v7327_v55 = vcombine.high %v235_v49, %v239_v50 }
 0x177   :  { %3022 = vmatpush1.bf16.msra.mxu1 %v7254_v54  ;;  %v7533_v54 = vcombine.high %v442_v5, %v446_v48  ;;  %v199_v5 = vld [vmem:[#allocation2 + $0x278] sm:$0xff] }
 0x178   :  { %3023 = vmatprep.subr.bf16.mxu1 %v7247_v56  ;;  %v307_v56 = vld [vmem:[#allocation2 + $0x5d8] sm:$0xff] }
 0x179   :  { %2954 = vmatpush2.bf16.msra.mxu0 %v7580_v59  ;;  %v7326_v59 = vcombine.low %v235_v49, %v239_v50  ;;  %v7398_v11 = vcombine.low %v307_v56, %v311_v4 }
 0x17a   :  { %2955 = vmatprep.subr.bf16.mxu0 %v7573_v7  ;;  %v7319_v7 = vcombine.high %v227_v57, %v231_v6 }
 0x17b   :  { %3024 = vmatpush1.bf16.msra.mxu1 %v7246_v61  ;;  %v7399_v61 = vcombine.high %v307_v56, %v311_v4  ;;  %v187_v56 = vld [vmem:[#allocation2 + $0x218] sm:$0xff] }
 0x17c   :  { %3025 = vmatprep.subr.bf16.mxu1 %v7239_v63  ;;  %v299_v63 = vld [vmem:[#allocation2 + $0x598] sm:$0xff] }
 0x17d   :  { %2956 = vmatpush2.bf16.msra.mxu0 %v7572_v13  ;;  %v7318_v13 = vcombine.low %v227_v57, %v231_v6  ;;  %v191_v4 = vld [vmem:[#allocation2 + $0x238] sm:$0xff] }
 0x17e   :  { %2957 = vmatprep.subr.bf16.mxu0 %v7565_v16  ;;  %v7311_v16 = vcombine.high %v219_v3, %v223_v10 }
 0x17f   :  { %3026 = vmatpush1.bf16.msra.mxu1 %v7238_v15  ;;  %v7391_v15 = vcombine.high %v299_v63, %v303_v1 }
 0x180   :  { %3027 = vmatprep.subr.bf16.mxu1 %v7231_v18  ;;  %v291_v18 = vld [vmem:[#allocation2 + $0x558] sm:$0xff] }
 0x181   :  { %2958 = vmatpush2.bf16.msra.mxu0 %v7564_v23  ;;  %v7383_v27 = vcombine.high %v291_v18, %v295_v19  ;;  %v7382_v38 = vcombine.low %v291_v18, %v295_v19  ;;  %v251_v18 = vld [vmem:[#allocation2 + $0x418] sm:$0xff] }
 0x182   :  { %2959 = vmatprep.subr.bf16.mxu0 %v7557_v25  ;;  %v7310_v25 = vcombine.low %v219_v3, %v223_v10  ;;  %v435_v3 = vld [vmem:[#allocation2 + $0x9d8] sm:$0xff] }
 0x183   :  { %3028 = vmatpush1.bf16.msra.mxu1 %v7230_v24  ;;  %v7390_v24 = vcombine.low %v299_v63, %v303_v1  ;;  %v259_v63 = vld [vmem:[#allocation2 + $0x458] sm:$0xff] }
 0x184   :  { %3029 = vmatprep.subr.bf16.mxu1 %v7223_v26  ;;  %v263_v1 = vld [vmem:[#allocation2 + $0x478] sm:$0xff] }
 0x185   :  { %2960 = vmatpush2.bf16.msra.mxu0 %v7556_v32  ;;  %v283_v32 = vld [vmem:[#allocation2 + $0x518] sm:$0xff]  ;;  %v7350_v22 = vcombine.low %v259_v63, %v263_v1 }
 0x186   :  { %2961 = vmatprep.subr.bf16.mxu0 %v7549_v35  ;;  %v203_v35 = vld [vmem:[#allocation2 + $0x298] sm:$0xff] }
 0x187   :  { %3030 = vmatpush1.bf16.msra.mxu1 %v7222_v33  ;;  %v287_v33 = vld [vmem:[#allocation2 + $0x538] sm:$0xff] }
 0x188   :  { %3031 = vmatprep.subr.bf16.mxu1 %v7215_v36  ;;  %v439_v10 = vld [vmem:[#allocation2 + $0x9f8] sm:$0xff] }
 0x189   :  { %2962 = vmatpush2.bf16.msra.mxu0 %v7548_v41  ;;  %v255_v19 = vld [vmem:[#allocation2 + $0x438] sm:$0xff] }
 0x18a   :  { %2963 = vmatprep.subr.bf16.mxu0 %v7541_v44  ;;  %v279_v44 = vld [vmem:[#allocation2 + $0x4f8] sm:$0xff] }
 0x18b   :  { %3032 = vmatpush1.bf16.msra.mxu1 %v7214_v43  ;;  %v275_v43 = vld [vmem:[#allocation2 + $0x4d8] sm:$0xff] }
 0x18c   :  { %3033 = vmatprep.subr.bf16.mxu1 %v7335_v46  ;;  %v195_v46 = vld [vmem:[#allocation2 + $0x258] sm:$0xff]  ;;  %v7367_v50 = vcombine.high %v275_v43, %v279_v44  ;;  %v7366_v6 = vcombine.low %v275_v43, %v279_v44 }
 0x18d   :  { %2964 = vmatpush2.bf16.msra.mxu0 %v7540_v52  ;;  %v355_v44 = vld [vmem:[#allocation2 + $0x758] sm:$0xff] }
 0x18e   :  { %2965 = vmatprep.subr.bf16.mxu0 %v7533_v54  ;;  %v267_v54 = vld [vmem:[#allocation2 + $0x498] sm:$0xff] }
 0x18f   :  { %3034 = vmatpush2.bf16.msra.mxu1 %v7334_v53  ;;  %v7287_v53 = vcombine.high %v195_v46, %v199_v5 }
 0x190   :  { %3035 = vmatprep.subr.bf16.mxu1 %v7327_v55  ;;  %v271_v55 = vld [vmem:[#allocation2 + $0x4b8] sm:$0xff] }
 0x191   :  { %2966 = vmatpush2.bf16.msra.mxu0 %v7532_v58  ;;  %v7286_v58 = vcombine.low %v195_v46, %v199_v5  ;;  %v359_v46 = vld [vmem:[#allocation2 + $0x778] sm:$0xff] }
 0x192   :  { %3058 = vmatprep.subr.bf16.mxu0 %v7399_v61  ;;  %v403_v5 = vld [vmem:[#allocation2 + $0x8d8] sm:$0xff] }
 0x193   :  { %3036 = vmatpush2.bf16.msra.mxu1 %v7326_v59  ;;  %v7359_v59 = vcombine.high %v267_v54, %v271_v55 }
 0x194   :  { %3037 = vmatprep.subr.bf16.mxu1 %v7319_v7  ;;  %v2641_v20 = vpop.f32.mrf.mxu0  ;;  %2968 = vmatmul.mubr.bf16.vlgmr.msra.gmra.mxu0 %v9243_v45  ;;  %v7279_v7 = vcombine.high %v187_v56, %v191_v4 }
 0x195   :  { %v2642_v23 = vadd.f32 %v2641_v20, %v9272_v2  ;;  %3059 = vmatpush1.bf16.msra.mxu0 %v7398_v11  ;;  %3090 = vmatprep.mubr.bf16.mxu0 %v9214_v8  ;;  %v207_v2 = vld [vmem:[#allocation2 + $0x2b8] sm:$0xff]  ;;  %v7358_v11 = vcombine.low %v267_v54, %v271_v55 }
 0x196   :  { %v2643_v26 = vpop.f32.mrf.mxu0  ;;  %3060 = vmatprep.subr.bf16.mxu0 %v7391_v15  ;;  %v7295_v41 = vcombine.high %v203_v35, %v207_v2  ;;  %v7294_v49 = vcombine.low %v203_v35, %v207_v2  ;;  %v7351_v15 = vcombine.high %v259_v63, %v263_v1  ;;  %v427_v20 = vld [vmem:[#allocation2 + $0x998] sm:$0xff] }
 0x197   :  { %3038 = vmatpush2.bf16.msra.mxu1 %v7318_v13  ;;  %v9289_v28 = vadd.f32 %v9276_v62, %v2642_v23  ;;  %v2644_v29 = vadd.f32 %v2643_v26, %v9274_v51  ;;  %v7375_v62 = vcombine.high %v283_v32, %v287_v33  ;;  %v7278_v13 = vcombine.low %v187_v56, %v191_v4  ;;  %v371_v26 = vld [vmem:[#allocation2 + $0x7d8] sm:$0xff] }
 0x198   :  { %3039 = vmatprep.subr.bf16.mxu1 %v7311_v16  ;;  %v2645_v36 = vpop.f32.mrf.mxu0  ;;  %v7527_v16 = vcombine.high %v435_v3, %v439_v10  ;;  %v7526_v23 = vcombine.low %v435_v3, %v439_v10  ;;  %v347_v54 = vld [vmem:[#allocation2 + $0x718] sm:$0xff] }
 0x199   :  { %v3181_v37 = vmax.f32 %v9289_v28, 0.0  ;;  %v9294_v8 = vadd.f32 %v9278_v9, %v2644_v29  ;;  %3061 = vmatpush1.bf16.msra.mxu0 %v7390_v24  ;;  %v7374_v9 = vcombine.low %v283_v32, %v287_v33  ;;  %v7343_v24 = vcombine.high %v251_v18, %v255_v19  ;;  %v419_v29 = vld [vmem:[#allocation2 + $0x958] sm:$0xff] }
 0x19a   :  { %3062 = vmatprep.subr.bf16.mxu0 %v7383_v27  ;;  %v2646_v40 = vpop.f32.mrf.mxu0  ;;  %v375_v27 = vld [vmem:[#allocation2 + $0x7f8] sm:$0xff]  ;;  %v7342_v32 = vcombine.low %v251_v18, %v255_v19  ;;  %v7518_v33 = vcombine.low %v427_v20, %v431_v21 }
 0x19b   :  { %3040 = vmatpush2.bf16.msra.mxu1 %v7310_v25  ;;  %v3182_v51 = vmax.f32 %v9294_v8, 0.0  ;;  %v7519_v25 = vcombine.high %v427_v20, %v431_v21  ;;  %v7463_v35 = vcombine.high %v371_v26, %v375_v27  ;;  %v363_v36 = vld [vmem:[#allocation2 + $0x798] sm:$0xff]  ;;  %v7462_v40 = vcombine.low %v371_v26, %v375_v27 }
 0x19c   :  { %3041 = vmatprep.subr.bf16.mxu1 %v7303_v30  ;;  %v423_v30 = vld [vmem:[#allocation2 + $0x978] sm:$0xff] }
 0x19d   :  { %3063 = vmatpush1.bf16.msra.mxu0 %v7382_v38  ;;  %v7511_v2 = vcombine.high %v419_v29, %v423_v30  ;;  %v367_v38 = vld [vmem:[#allocation2 + $0x7b8] sm:$0xff] }
 0x19e   :  { %v9297_v48 = vpop.f32.mrf.mxu1  ;;  %3064 = vmatprep.subr.bf16.mxu0 %v7375_v62  ;;  %v415_v62 = vld [vmem:[#allocation2 + $0x938] sm:$0xff] }
 0x19f   :  { %3042 = vmatpush2.bf16.msra.mxu1 %v7302_v39  ;;  %v411_v39 = vld [vmem:[#allocation2 + $0x918] sm:$0xff] }
 0x1a0   :  { %v9299_v52 = vpop.f32.mrf.mxu1  ;;  %3043 = vmatprep.subr.bf16.mxu1 %v7295_v41  ;;  %v7510_v41 = vcombine.low %v419_v29, %v423_v30  ;;  %v7503_v43 = vcombine.high %v411_v39, %v415_v62  ;;  %v351_v55 = vld [vmem:[#allocation2 + $0x738] sm:$0xff] }
 0x1a1   :  { %3065 = vmatpush1.bf16.msra.mxu0 %v7374_v9  ;;  %v407_v9 = vld [vmem:[#allocation2 + $0x8f8] sm:$0xff]  ;;  %v7438_v3 = vcombine.low %v347_v54, %v351_v55 }
 0x1a2   :  { %v2727_v57 = vpop.f32.mrf.mxu1  ;;  %3066 = vmatprep.subr.bf16.mxu0 %v7367_v50  ;;  %v7502_v50 = vcombine.low %v411_v39, %v415_v62  ;;  %v395_v56 = vld [vmem:[#allocation2 + $0x898] sm:$0xff] }
 0x1a3   :  { %3044 = vmatpush2.bf16.msra.mxu1 %v7294_v49  ;;  %v7454_v49 = vcombine.low %v363_v36, %v367_v38  ;;  %v399_v4 = vld [vmem:[#allocation2 + $0x8b8] sm:$0xff]  ;;  %v7446_v57 = vcombine.low %v355_v44, %v359_v46 }
 0x1a4   :  { %v2728_v61 = vpop.f32.mrf.mxu1  ;;  %3045 = vmatprep.subr.bf16.mxu1 %v7287_v53  ;;  %v7495_v53 = vcombine.high %v403_v5, %v407_v9  ;;  %v387_v63 = vld [vmem:[#allocation2 + $0x858] sm:$0xff]  ;;  %v7486_v10 = vcombine.low %v395_v56, %v399_v4 }
 0x1a5   :  { %3067 = vmatpush1.bf16.msra.mxu0 %v7366_v6  ;;  %v7494_v6 = vcombine.low %v403_v5, %v407_v9  ;;  %v339_v61 = vld [vmem:[#allocation2 + $0x6d8] sm:$0xff] }
 0x1a6   :  { %3068 = vmatprep.subr.bf16.mxu0 %v7359_v59  ;;  %v7487_v59 = vcombine.high %v395_v56, %v399_v4  ;;  %v391_v1 = vld [vmem:[#allocation2 + $0x878] sm:$0xff] }
 0x1a7   :  { %3046 = vmatpush2.bf16.msra.mxu1 %v7286_v58  ;;  %v7439_v58 = vcombine.high %v347_v54, %v351_v55  ;;  %v379_v18 = vld [vmem:[#allocation2 + $0x818] sm:$0xff]  ;;  %v7478_v21 = vcombine.low %v387_v63, %v391_v1 }
 0x1a8   :  { %3047 = vmatprep.subr.bf16.mxu1 %v7279_v7  ;;  %v343_v7 = vld [vmem:[#allocation2 + $0x6f8] sm:$0xff] }
 0x1a9   :  { %3069 = vmatpush1.bf16.msra.mxu0 %v7358_v11  ;;  %v7431_v11 = vcombine.high %v339_v61, %v343_v7  ;;  %v383_v19 = vld [vmem:[#allocation2 + $0x838] sm:$0xff]  ;;  %v7430_v20 = vcombine.low %v339_v61, %v343_v7 }
 0x1aa   :  { %3070 = vmatprep.subr.bf16.mxu0 %v7351_v15  ;;  %v331_v15 = vld [vmem:[#allocation2 + $0x698] sm:$0xff]  ;;  %v7470_v30 = vcombine.low %v379_v18, %v383_v19 }
 0x1ab   :  { %3048 = vmatpush2.bf16.msra.mxu1 %v7278_v13  ;;  %v7479_v13 = vcombine.high %v387_v63, %v391_v1  ;;  %v499_v26 = vld [vmem:[#allocation2 + $0xbd8] sm:$0xff] }
 0x1ac   :  { %3099 = vmatprep.subr.bf16.mxu1 %v7527_v16  ;;  %v335_v16 = vld [vmem:[#allocation2 + $0x6b8] sm:$0xff] }
 0x1ad   :  { %3071 = vmatpush1.bf16.msra.mxu0 %v7350_v22  ;;  %v7423_v22 = vcombine.high %v331_v15, %v335_v16  ;;  %v503_v27 = vld [vmem:[#allocation2 + $0xbf8] sm:$0xff]  ;;  %v7422_v29 = vcombine.low %v331_v15, %v335_v16 }
 0x1ae   :  { %3050 = vmatmul.mubr.bf16.vlgmr.msra.gmra.mxu1 %v9220_v31  ;;  %3072 = vmatprep.subr.bf16.mxu0 %v7343_v24  ;;  %v7455_v31 = vcombine.high %v363_v36, %v367_v38  ;;  %v323_v24 = vld [vmem:[#allocation2 + $0x658] sm:$0xff]  ;;  %v7590_v62 = vcombine.low %v499_v26, %v503_v27 }
 0x1af   :  { %3100 = vmatpush1.bf16.msra.mxu1 %v7526_v23  ;;  %3131 = vmatprep.mubr.bf16.mxu1 %v9229_v0  ;;  %v7447_v0 = vcombine.high %v355_v44, %v359_v46  ;;  %v7471_v23 = vcombine.high %v379_v18, %v383_v19  ;;  %v491_v36 = vld [vmem:[#allocation2 + $0xb98] sm:$0xff]  ;;  %v9307_v46 = vsub.s32 3, %v9256_v60 }
 0x1b0   :  { %3101 = vmatprep.subr.bf16.mxu1 %v7519_v25  ;;  %v327_v25 = vld [vmem:[#allocation2 + $0x678] sm:$0xff] }
 0x1b1   :  { %3073 = vmatpush1.bf16.msra.mxu0 %v7342_v32  ;;  %v7415_v32 = vcombine.high %v323_v24, %v327_v25  ;;  %v495_v38 = vld [vmem:[#allocation2 + $0xbb8] sm:$0xff]  ;;  %v7414_v39 = vcombine.low %v323_v24, %v327_v25  ;;  %v536_v54 = vrot.slane %v9261_v14, %v9307_v46 }
 0x1b2   :  { %3074 = vmatprep.subr.bf16.mxu0 %v7463_v35  ;;  %v315_v35 = vld [vmem:[#allocation2 + $0x618] sm:$0xff]  ;;  %v7582_v9 = vcombine.low %v491_v36, %v495_v38 }
 0x1b3   :  { %3102 = vmatpush1.bf16.msra.mxu1 %v7518_v33  ;;  %v7591_v33 = vcombine.high %v499_v26, %v503_v27  ;;  %v487_v44 = vld [vmem:[#allocation2 + $0xb78] sm:$0xff] }
 0x1b4   :  { %3103 = vmatprep.subr.bf16.mxu1 %v7511_v2  ;;  %v319_v2 = vld [vmem:[#allocation2 + $0x638] sm:$0xff] }
 0x1b5   :  { %3075 = vmatpush2.bf16.msra.mxu0 %v7462_v40  ;;  %v7407_v40 = vcombine.high %v315_v35, %v319_v2  ;;  %v7406_v5 = vcombine.low %v315_v35, %v319_v2  ;;  %v455_v18 = vld [vmem:[#allocation2 + $0xa78] sm:$0xff] }
 0x1b6   :  { %3076 = vmatprep.subr.bf16.mxu0 %v7455_v31  ;;  %v7583_v31 = vcombine.high %v491_v36, %v495_v38  ;;  %v443_v24 = vld [vmem:[#allocation2 + $0xa18] sm:$0xff] }
 0x1b7   :  { %3104 = vmatpush1.bf16.msra.mxu1 %v7510_v41  ;;  %v9304_v41 = vsub.s32 2, %v9256_v60  ;;  %v447_v25 = vld [vmem:[#allocation2 + $0xa38] sm:$0xff] }
 0x1b8   :  { %3105 = vmatprep.subr.bf16.mxu1 %v7503_v43  ;;  %v483_v43 = vld [vmem:[#allocation2 + $0xb58] sm:$0xff]  ;;  %v7534_v36 = vcombine.low %v443_v24, %v447_v25 }
 0x1b9   :  { %3077 = vmatpush2.bf16.msra.mxu0 %v7454_v49  ;;  %v532_v49 = vrot.slane %v9261_v14, %v9304_v41  ;;  %v7574_v55 = vcombine.low %v483_v43, %v487_v44 }
 0x1ba   :  { %3078 = vmatprep.subr.bf16.mxu0 %v7447_v0  ;;  %v475_v0 = vld [vmem:[#allocation2 + $0xb18] sm:$0xff] }
 0x1bb   :  { %3106 = vmatpush1.bf16.msra.mxu1 %v7502_v50  ;;  %v7575_v50 = vcombine.high %v483_v43, %v487_v44  ;;  %v2724_v56 = vadd.f32 %v9297_v48, %v532_v49 }
 0x1bc   :  { %3107 = vmatprep.subr.bf16.mxu1 %v7495_v53  ;;  %v479_v53 = vld [vmem:[#allocation2 + $0xb38] sm:$0xff] }
 0x1bd   :  { %3079 = vmatpush2.bf16.msra.mxu0 %v7446_v57  ;;  %v7567_v4 = vcombine.high %v475_v0, %v479_v53  ;;  %v7566_v7 = vcombine.low %v475_v0, %v479_v53  ;;  %v539_v0 = vsub.s32 4, %v9256_v60 }
 0x1be   :  { %3080 = vmatprep.subr.bf16.mxu0 %v7439_v58  ;;  %v471_v58 = vld [vmem:[#allocation2 + $0xaf8] sm:$0xff] }
 0x1bf   :  { %3108 = vmatpush1.bf16.msra.mxu1 %v7494_v6  ;;  %v467_v6 = vld [vmem:[#allocation2 + $0xad8] sm:$0xff] }
 0x1c0   :  { %3109 = vmatprep.subr.bf16.mxu1 %v7487_v59  ;;  %v2726_v59 = vadd.f32 %v9299_v52, %v536_v54  ;;  %v7558_v48 = vcombine.low %v467_v6, %v471_v58  ;;  %v543_v54 = vsub.s32 5, %v9256_v60 }
 0x1c1   :  { %3081 = vmatpush2.bf16.msra.mxu0 %v7438_v3  ;;  %v7559_v3 = vcombine.high %v467_v6, %v471_v58 }
 0x1c2   :  { %3082 = vmatprep.subr.bf16.mxu0 %v7431_v11  ;;  %v463_v11 = vld [vmem:[#allocation2 + $0xab8] sm:$0xff] }
 0x1c3   :  { %3110 = vmatpush1.bf16.msra.mxu1 %v7486_v10  ;;  %v459_v10 = vld [vmem:[#allocation2 + $0xa98] sm:$0xff] }
 0x1c4   :  { %3111 = vmatprep.subr.bf16.mxu1 %v7479_v13  ;;  %v7551_v16 = vcombine.high %v459_v10, %v463_v11 }
 0x1c5   :  { %3083 = vmatpush2.bf16.msra.mxu0 %v7430_v20  ;;  %v7550_v20 = vcombine.low %v459_v10, %v463_v11 }
 0x1c6   :  { %3084 = vmatprep.subr.bf16.mxu0 %v7423_v22 }
 0x1c7   :  { %3112 = vmatpush1.bf16.msra.mxu1 %v7478_v21 }
 0x1c8   :  { %3113 = vmatprep.subr.bf16.mxu1 %v7471_v23 }
 0x1c9   :  { %3085 = vmatpush2.bf16.msra.mxu0 %v7422_v29 }
 0x1ca   :  { %3086 = vmatprep.subr.bf16.mxu0 %v7415_v32  ;;  %v507_v32 = vld [vmem:[#allocation2 + $0xc18] sm:$0xff] }
 0x1cb   :  { %3114 = vmatpush1.bf16.msra.mxu1 %v7470_v30  ;;  %v7535_v30 = vcombine.high %v443_v24, %v447_v25 }
 0x1cc   :  { %3115 = vmatprep.subr.bf16.mxu1 %v7591_v33  ;;  %v511_v33 = vld [vmem:[#allocation2 + $0xc38] sm:$0xff] }
 0x1cd   :  { %3087 = vmatpush2.bf16.msra.mxu0 %v7414_v39  ;;  %v7599_v39 = vcombine.high %v507_v32, %v511_v33  ;;  %v7598_v44 = vcombine.low %v507_v32, %v511_v33 }
 0x1ce   :  { %3088 = vmatprep.subr.bf16.mxu0 %v7407_v40 }
 0x1cf   :  { %3116 = vmatpush2.bf16.msra.mxu1 %v7590_v62 }
 0x1d0   :  { %3117 = vmatprep.subr.bf16.mxu1 %v7583_v31 }
 0x1d1   :  { %3089 = vmatpush2.bf16.msra.mxu0 %v7406_v5 }
 0x1d3   :  { %3118 = vmatpush2.bf16.msra.mxu1 %v7582_v9 }
 0x1d4   :  { %3119 = vmatprep.subr.bf16.mxu1 %v7575_v50  ;;  %v2764_v57 = vpop.f32.mrf.mxu0  ;;  %3091 = vmatmul.mubr.bf16.vlgmr.msra.gmra.mxu0 %v9224_v34  ;;  %v451_v34 = vld [vmem:[#allocation2 + $0xa58] sm:$0xff] }
 0x1d5   :  { %v2765_v61 = vadd.f32 %v2764_v57, %v2724_v56  ;;  %v7543_v22 = vcombine.high %v451_v34, %v455_v18  ;;  %v7542_v27 = vcombine.low %v451_v34, %v455_v18 }
 0x1d6   :  { %v2766_v63 = vpop.f32.mrf.mxu0 }
 0x1d7   :  { %3120 = vmatpush2.bf16.msra.mxu1 %v7574_v55  ;;  %v2767_v1 = vadd.f32 %v2766_v63, %v2726_v59  ;;  %v540_v55 = vrot.slane %v9261_v14, %v539_v0 }
 0x1d8   :  { %3121 = vmatprep.subr.bf16.mxu1 %v7567_v4  ;;  %v2768_v13 = vpop.f32.mrf.mxu0 }
 0x1da   :  { %v2769_v15 = vpop.f32.mrf.mxu0 }
 0x1db   :  { %3122 = vmatpush2.bf16.msra.mxu1 %v7566_v7 }
 0x1dc   :  { %3123 = vmatprep.subr.bf16.mxu1 %v7559_v3 }
 0x1de   :  { %v2805_v19 = vpop.f32.mrf.mxu1 }
 0x1df   :  { %3124 = vmatpush2.bf16.msra.mxu1 %v7558_v48  ;;  %v2806_v52 = vadd.f32 %v2805_v19, %v2765_v61 }
 0x1e0   :  { %v2807_v21 = vpop.f32.mrf.mxu1  ;;  %3125 = vmatprep.subr.bf16.mxu1 %v7551_v16 }
 0x1e1   :  { %v2808_v23 = vadd.f32 %v2807_v21, %v2767_v1 }
 0x1e2   :  { %v2809_v26 = vpop.f32.mrf.mxu1 }
 0x1e3   :  { %3126 = vmatpush2.bf16.msra.mxu1 %v7550_v20  ;;  %v547_v26 = vsub.s32 6, %v9256_v60 }
 0x1e4   :  { %v2810_v29 = vpop.f32.mrf.mxu1  ;;  %3127 = vmatprep.subr.bf16.mxu1 %v7543_v22 }
 0x1e5   :  { %v8183_v29 = vld [vmem:[#allocation11] sm:$0xff] }
 0x1e6   :  { %v2846_v35 = vpop.f32.mrf.mxu1 }
 0x1e7   :  { %3128 = vmatpush2.bf16.msra.mxu1 %v7542_v27  ;;  %v9316_v2 = vadd.f32 %v2846_v35, %v2806_v52  ;;  %v551_v27 = vsub.s32 7, %v9256_v60 }
 0x1e8   :  { %v2848_v38 = vpop.f32.mrf.mxu1  ;;  %3129 = vmatprep.subr.bf16.mxu1 %v7535_v30  ;;  %v548_v30 = vrot.slane %v8183_v29, %v547_v26 }
 0x1e9   :  { %v3183_v62 = vmax.f32 %v9316_v2, 0.0  ;;  %v9319_v40 = vadd.f32 %v2848_v38, %v2808_v23  ;;  %v552_v33 = vrot.slane %v8183_v29, %v551_v27 }
 0x1ea   :  { %v2850_v31 = vpop.f32.mrf.mxu1 }
 0x1eb   :  { %v3184_v43 = vmax.f32 %v9319_v40, 0.0  ;;  %3130 = vmatpush2.bf16.msra.mxu1 %v7534_v36 }
 0x1ec   :  { %v2851_v5 = vpop.f32.mrf.mxu1  ;;  %3154 = vmatprep.subr.bf16.mxu1 %v7599_v39 }
 0x1ee   :  { %3132 = vmatmul.mubr.bf16.vlgmr.msra.gmra.mxu1 %v9243_v45  ;;  %v544_v45 = vrot.slane %v9261_v14, %v543_v54 }
 0x1ef   :  { %3155 = vmatpush1.bf16.msra.mxu1 %v7598_v44  ;;  %3172 = vmatprep.mubr.bf16.mxu1 %v9103_v42 }
 0x1f6   :  { %7603 = vmatmul.mubr.msk.bf16.vlgmr.msra.gmra.mxu1 %vm2521_vm0, %v9236_v47 }
 0x214   :  { %v2887_v9 = vpop.f32.mrf.mxu0 }
 0x215   :  { %v2888_v42 = vadd.f32 %v2887_v9, %v540_v55 }
 0x216   :  { %v2889_v49 = vpop.f32.mrf.mxu0 }
 0x217   :  { %v2890_v56 = vadd.f32 %v2889_v49, %v544_v45 }
 0x218   :  { %v2891_v50 = vpop.f32.mrf.mxu0 }
 0x21a   :  { %v2892_v53 = vpop.f32.mrf.mxu0 }
 0x226   :  { %v2928_v4 = vpop.f32.mrf.mxu1 }
 0x227   :  { %v2929_v47 = vadd.f32 %v2928_v4, %v2888_v42 }
 0x228   :  { %v2930_v57 = vpop.f32.mrf.mxu1 }
 0x229   :  { %v2931_v6 = vadd.f32 %v2930_v57, %v2890_v56 }
 0x22a   :  { %v2932_v58 = vpop.f32.mrf.mxu1 }
 0x22c   :  { %v2933_v59 = vpop.f32.mrf.mxu1 }
 0x22e   :  { %v3010_v61 = vpop.f32.mrf.mxu1 }
 0x230   :  { %v3012_v7 = vpop.f32.mrf.mxu1 }
 0x232   :  { %v3014_v63 = vpop.f32.mrf.mxu1 }
 0x234   :  { %v3015_v1 = vpop.f32.mrf.mxu1 }
 0x254   :  { %v2969_v3 = vpop.f32.mrf.mxu0 }
 0x255   :  { %v2970_v10 = vadd.f32 %v2969_v3, %v2929_v47 }
 0x256   :  { %v2971_v11 = vpop.f32.mrf.mxu0 }
 0x257   :  { %v9334_v13 = vadd.f32 %v3010_v61, %v2970_v10  ;;  %v2972_v48 = vadd.f32 %v2971_v11, %v2931_v6 }
 0x258   :  { %v2973_v15 = vpop.f32.mrf.mxu0 }
 0x259   :  { %v3185_v14 = vmax.f32 %v9334_v13, 0.0  ;;  %v9337_v16 = vadd.f32 %v3012_v7, %v2972_v48 }
 0x25a   :  { %v2974_v34 = vpop.f32.mrf.mxu0 }
 0x25b   :  { %v3186_v18 = vmax.f32 %v9337_v16, 0.0 }
 0x26e   :  { %v3051_v19 = vpop.f32.mrf.mxu1 }
 0x26f   :  { %v3052_v36 = vadd.f32 %v3051_v19, %v548_v30 }
 0x270   :  { %v3053_v52 = vpop.f32.mrf.mxu1 }
 0x271   :  { %v3054_v39 = vadd.f32 %v3053_v52, %v552_v33 }
 0x272   :  { %v3055_v20 = vpop.f32.mrf.mxu1 }
 0x274   :  { %v3056_v21 = vpop.f32.mrf.mxu1 }
 0x294   :  { %v3092_v22 = vpop.f32.mrf.mxu0 }
 0x295   :  { %v3093_v31 = vadd.f32 %v3092_v22, %v3052_v36 }
 0x296   :  { %v3094_v23 = vpop.f32.mrf.mxu0 }
 0x297   :  { %v3095_v5 = vadd.f32 %v3094_v23, %v3054_v39 }
 0x298   :  { %v3096_v24 = vpop.f32.mrf.mxu0 }
 0x29a   :  { %v3097_v25 = vpop.f32.mrf.mxu0 }
 0x2ae   :  { %v3133_v32 = vpop.f32.mrf.mxu1 }
 0x2af   :  { %v3134_v9 = vadd.f32 %v3133_v32, %v3093_v31 }
 0x2b0   :  { %v3135_v35 = vpop.f32.mrf.mxu1 }
 0x2b1   :  { %v3136_v50 = vadd.f32 %v3135_v35, %v3095_v5 }
 0x2b2   :  { %v3137_v38 = vpop.f32.mrf.mxu1 }
 0x2b4   :  { %v3138_v44 = vpop.f32.mrf.mxu1 }
 0x2b6   :  { %v3174_v49 = vpop.f32.mrf.mxu1 }
 0x2b7   :  { %v9344_v53 = vadd.f32 %v3174_v49, %v3134_v9 }
 0x2b8   :  { %v3176_v55 = vpop.f32.mrf.mxu1 }
 0x2b9   :  { %v3187_v45 = vmax.f32 %v9344_v53, 0.0  ;;  %v9347_v42 = vadd.f32 %v3176_v55, %v3136_v50 }
 0x2ba   :  { %v3178_v56 = vpop.f32.mrf.mxu1 }
 0x2bb   :  { %v3188_v4 = vmax.f32 %v9347_v42, 0.0 }
 0x2bc   :  { %v3179_v47 = vpop.f32.mrf.mxu1 }
 0x2bd   :  { %9084 = dma.done.wait [#allocation7 + $0x1], 8192 }
 0x2be   :  { %9085 = vsyncadd [#allocation7 + $0x1], 4294959104  ;;  %v3258_v57 = vpack.c.bf16 %v3182_v51, %v3182_v51  ;;  %v3260_v6 = vpack.c.bf16 %v3184_v43, %v3184_v43  ;;  %v8184_v58 = vld [vmem:[#allocation3 + $0x74] ss:$8 sps:$4 sm:$0xff]   ;;  %v8188_v61 = vld [vmem:[#allocation3 + $0x70] ss:$8 sps:$4 sm:$0xff]  }
 0x2bf   :  { %v8186_v59 = vld [vmem:[#allocation3 + $0x174] ss:$8 sps:$4 sm:$0xff]   ;;  %3593 = vmatprep.subr.bf16.mxu0 %v8184_v58  ;;  %v8189_v7 = vld [vmem:[#allocation3 + $0x170] ss:$8 sps:$4 sm:$0xff]   ;;  %v8190_v63 = vld [vmem:[#allocation3 + $0x64] ss:$8 sps:$4 sm:$0xff]  }
 0x2c0   :  { %3625 = vmatprep.mubr.bf16.mxu0 %v3258_v57  ;;  %3666 = vmatprep.mubr.bf16.mxu1 %v3260_v6  ;;  %v8192_v1 = vld [vmem:[#allocation3 + $0x164] ss:$8 sps:$4 sm:$0xff]   ;;  %v8194_v3 = vld [vmem:[#allocation3 + $0x60] ss:$8 sps:$4 sm:$0xff]   ;;  %v8196_v51 = vld [vmem:[#allocation3 + $0x54] ss:$8 sps:$4 sm:$0xff]  }
 0x2c1   :  { %3634 = vmatprep.subr.bf16.mxu1 %v8186_v59  ;;  %3594 = vmatpush1.bf16.msra.mxu0 %v8188_v61  ;;  %v8195_v8 = vld [vmem:[#allocation3 + $0x160] ss:$8 sps:$4 sm:$0xff]   ;;  %v8198_v40 = vld [vmem:[#allocation3 + $0x154] ss:$8 sps:$4 sm:$0xff]   ;;  %v8200_v10 = vld [vmem:[#allocation3 + $0x50] ss:$8 sps:$4 sm:$0xff]  }
 0x2c2   :  { %3635 = vmatpush1.bf16.msra.mxu1 %v8189_v7  ;;  %3595 = vmatprep.subr.bf16.mxu0 %v8190_v63  ;;  %v8201_v43 = vld [vmem:[#allocation3 + $0x150] ss:$8 sps:$4 sm:$0xff]   ;;  %v8202_v11 = vld [vmem:[#allocation3 + $0x44] ss:$8 sps:$4 sm:$0xff]   ;;  %v8206_v15 = vld [vmem:[#allocation3 + $0x40] ss:$8 sps:$4 sm:$0xff]  }
 0x2c3   :  { %3636 = vmatprep.subr.bf16.mxu1 %v8192_v1  ;;  %v8204_v48 = vld [vmem:[#allocation3 + $0x144] ss:$8 sps:$4 sm:$0xff]   ;;  %v8207_v34 = vld [vmem:[#allocation3 + $0x140] ss:$8 sps:$4 sm:$0xff]   ;;  %v8208_v19 = vld [vmem:[#allocation3 + $0x34] ss:$8 sps:$4 sm:$0xff]  }
 0x2c4   :  { %v8210_v52 = vld [vmem:[#allocation3 + $0x134] ss:$8 sps:$4 sm:$0xff]   ;;  %v8212_v20 = vld [vmem:[#allocation3 + $0x30] ss:$8 sps:$4 sm:$0xff]   ;;  %v8214_v22 = vld [vmem:[#allocation3 + $0x24] ss:$8 sps:$4 sm:$0xff]  }
 0x2c5   :  { %3596 = vmatpush1.bf16.msra.mxu0 %v8194_v3  ;;  %v8213_v21 = vld [vmem:[#allocation3 + $0x130] ss:$8 sps:$4 sm:$0xff]   ;;  %v8216_v23 = vld [vmem:[#allocation3 + $0x124] ss:$8 sps:$4 sm:$0xff]   ;;  %v8218_v24 = vld [vmem:[#allocation3 + $0x20] ss:$8 sps:$4 sm:$0xff]  }
 0x2c6   :  { %3637 = vmatpush1.bf16.msra.mxu1 %v8195_v8  ;;  %3597 = vmatprep.subr.bf16.mxu0 %v8196_v51  ;;  %v8219_v25 = vld [vmem:[#allocation3 + $0x120] ss:$8 sps:$4 sm:$0xff]   ;;  %v8220_v27 = vld [vmem:[#allocation3 + $0x14] ss:$8 sps:$4 sm:$0xff]   ;;  %v8224_v30 = vld [vmem:[#allocation3 + $0x10] ss:$8 sps:$4 sm:$0xff]  }
 0x2c7   :  { %3638 = vmatprep.subr.bf16.mxu1 %v8198_v40  ;;  %v8222_v29 = vld [vmem:[#allocation3 + $0x114] ss:$8 sps:$4 sm:$0xff]   ;;  %v8225_v32 = vld [vmem:[#allocation3 + $0x110] ss:$8 sps:$4 sm:$0xff]   ;;  %v8226_v33 = vld [vmem:[#allocation3 + $0x4] ss:$8 sps:$4 sm:$0xff]  }
 0x2c8   :  { %v8228_v35 = vld [vmem:[#allocation3 + $0x104] ss:$8 sps:$4 sm:$0xff]   ;;  %v8230_v36 = vld [vmem:[#allocation3] ss:$8 sps:$4 sm:$0xff]   ;;  %v8232_v39 = vld [vmem:[#allocation3 + $0xf4] ss:$8 sps:$4 sm:$0xff]  }
 0x2c9   :  { %3598 = vmatpush1.bf16.msra.mxu0 %v8200_v10  ;;  %v8231_v38 = vld [vmem:[#allocation3 + $0x100] ss:$8 sps:$4 sm:$0xff]   ;;  %v8234_v31 = vld [vmem:[#allocation3 + $0x1f4] ss:$8 sps:$4 sm:$0xff]   ;;  %v8236_v44 = vld [vmem:[#allocation3 + $0xf0] ss:$8 sps:$4 sm:$0xff]  }
 0x2ca   :  { %3639 = vmatpush1.bf16.msra.mxu1 %v8201_v43  ;;  %3599 = vmatprep.subr.bf16.mxu0 %v8202_v11  ;;  %v8237_v5 = vld [vmem:[#allocation3 + $0x1f0] ss:$8 sps:$4 sm:$0xff]   ;;  %v8238_v9 = vld [vmem:[#allocation3 + $0xe4] ss:$8 sps:$4 sm:$0xff]   ;;  %v8242_v50 = vld [vmem:[#allocation3 + $0xe0] ss:$8 sps:$4 sm:$0xff]  }
 0x2cb   :  { %3640 = vmatprep.subr.bf16.mxu1 %v8204_v48  ;;  %v8240_v49 = vld [vmem:[#allocation3 + $0x1e4] ss:$8 sps:$4 sm:$0xff]   ;;  %v8243_v55 = vld [vmem:[#allocation3 + $0x1e0] ss:$8 sps:$4 sm:$0xff]   ;;  %v8244_v56 = vld [vmem:[#allocation3 + $0xd4] ss:$8 sps:$4 sm:$0xff]  }
 0x2cc   :  { %v8246_v47 = vld [vmem:[#allocation3 + $0x1d4] ss:$8 sps:$4 sm:$0xff]   ;;  %v8248_v57 = vld [vmem:[#allocation3 + $0xd0] ss:$8 sps:$4 sm:$0xff]   ;;  %v8250_v58 = vld [vmem:[#allocation3 + $0xc4] ss:$8 sps:$4 sm:$0xff]  }
 0x2cd   :  { %3600 = vmatpush1.bf16.msra.mxu0 %v8206_v15  ;;  %v8249_v6 = vld [vmem:[#allocation3 + $0x1d0] ss:$8 sps:$4 sm:$0xff]   ;;  %v8252_v59 = vld [vmem:[#allocation3 + $0x1c4] ss:$8 sps:$4 sm:$0xff]   ;;  %v8254_v61 = vld [vmem:[#allocation3 + $0xc0] ss:$8 sps:$4 sm:$0xff]  }
 0x2ce   :  { %3641 = vmatpush1.bf16.msra.mxu1 %v8207_v34  ;;  %3601 = vmatprep.subr.bf16.mxu0 %v8208_v19  ;;  %v8255_v7 = vld [vmem:[#allocation3 + $0x1c0] ss:$8 sps:$4 sm:$0xff]   ;;  %v8256_v63 = vld [vmem:[#allocation3 + $0xb4] ss:$8 sps:$4 sm:$0xff]   ;;  %v8260_v3 = vld [vmem:[#allocation3 + $0xb0] ss:$8 sps:$4 sm:$0xff]  }
 0x2cf   :  { %3642 = vmatprep.subr.bf16.mxu1 %v8210_v52  ;;  %v8258_v1 = vld [vmem:[#allocation3 + $0x1b4] ss:$8 sps:$4 sm:$0xff]   ;;  %v8261_v8 = vld [vmem:[#allocation3 + $0x1b0] ss:$8 sps:$4 sm:$0xff]   ;;  %v8262_v51 = vld [vmem:[#allocation3 + $0xa4] ss:$8 sps:$4 sm:$0xff]  }
 0x2d0   :  { %v8264_v40 = vld [vmem:[#allocation3 + $0x1a4] ss:$8 sps:$4 sm:$0xff]   ;;  %v8266_v10 = vld [vmem:[#allocation3 + $0xa0] ss:$8 sps:$4 sm:$0xff]   ;;  %v8268_v11 = vld [vmem:[#allocation3 + $0x94] ss:$8 sps:$4 sm:$0xff]  }
 0x2d1   :  { %3602 = vmatpush1.bf16.msra.mxu0 %v8212_v20  ;;  %v8267_v43 = vld [vmem:[#allocation3 + $0x1a0] ss:$8 sps:$4 sm:$0xff]   ;;  %v8270_v48 = vld [vmem:[#allocation3 + $0x194] ss:$8 sps:$4 sm:$0xff]   ;;  %v8272_v15 = vld [vmem:[#allocation3 + $0x90] ss:$8 sps:$4 sm:$0xff]  }
 0x2d2   :  { %3643 = vmatpush1.bf16.msra.mxu1 %v8213_v21  ;;  %3603 = vmatprep.subr.bf16.mxu0 %v8214_v22  ;;  %v8273_v34 = vld [vmem:[#allocation3 + $0x190] ss:$8 sps:$4 sm:$0xff]   ;;  %v8274_v19 = vld [vmem:[#allocation3 + $0x84] ss:$8 sps:$4 sm:$0xff]   ;;  %v8278_v20 = vld [vmem:[#allocation3 + $0x80] ss:$8 sps:$4 sm:$0xff]  }
 0x2d3   :  { %3644 = vmatprep.subr.bf16.mxu1 %v8216_v23  ;;  %v8276_v52 = vld [vmem:[#allocation3 + $0x184] ss:$8 sps:$4 sm:$0xff]   ;;  %v8279_v21 = vld [vmem:[#allocation3 + $0x180] ss:$8 sps:$4 sm:$0xff]   ;;  %v8282_v22 = vld [vmem:[#allocation8 + $0x11c] ss:$20 sps:$4 sm:$0xff]   ;;  %v3257_v23 = vpack.c.bf16 %v3181_v37, %v3181_v37 }
 0x2d4   :  { %v8291_v28 = vld [vmem:[#allocation8 + $0xa4] ss:$20 sps:$4 sm:$0xff]   ;;  %v8289_v37 = vld [vmem:[#allocation8 + $0xa0] ss:$20 sps:$4 sm:$0xff]   ;;  %v8294_v2 = vld [vmem:[#allocation8 + $0x7c] ss:$20 sps:$4 sm:$0xff]  }
 0x2d5   :  { %3604 = vmatpush1.bf16.msra.mxu0 %v8218_v24  ;;  %v3259_v24 = vpack.c.bf16 %v3183_v62, %v3183_v62  ;;  %v8292_v62 = vld [vmem:[#allocation8 + $0x78] ss:$20 sps:$4 sm:$0xff]  }
 0x2d6   :  { %3645 = vmatpush1.bf16.msra.mxu1 %v8219_v25  ;;  %3605 = vmatprep.subr.bf16.mxu0 %v8220_v27  ;;  %v8280_v25 = vld [vmem:[#allocation8 + $0x118] ss:$20 sps:$4 sm:$0xff]   ;;  %v8285_v27 = vld [vmem:[#allocation8 + $0xf4] ss:$20 sps:$4 sm:$0xff]  }
 0x2d7   :  { %3646 = vmatprep.subr.bf16.mxu1 %v8222_v29  ;;  %v8283_v29 = vld [vmem:[#allocation8 + $0xf0] ss:$20 sps:$4 sm:$0xff]  }
 0x2d9   :  { %3606 = vmatpush1.bf16.msra.mxu0 %v8224_v30  ;;  %v8288_v30 = vld [vmem:[#allocation8 + $0xcc] ss:$20 sps:$4 sm:$0xff]  }
 0x2da   :  { %3647 = vmatpush1.bf16.msra.mxu1 %v8225_v32  ;;  %3607 = vmatprep.subr.bf16.mxu0 %v8226_v33  ;;  %v8286_v32 = vld [vmem:[#allocation8 + $0xc8] ss:$20 sps:$4 sm:$0xff]  }
 0x2db   :  { %3648 = vmatprep.subr.bf16.mxu1 %v8228_v35  ;;  %v8297_v33 = vld [vmem:[#allocation8 + $0x54] ss:$20 sps:$4 sm:$0xff]   ;;  %v8295_v35 = vld [vmem:[#allocation8 + $0x50] ss:$20 sps:$4 sm:$0xff]  }
 0x2dd   :  { %3608 = vmatpush1.bf16.msra.mxu0 %v8230_v36  ;;  %v8300_v36 = vld [vmem:[#allocation8 + $0x2c] ss:$20 sps:$4 sm:$0xff]  }
 0x2de   :  { %3649 = vmatpush1.bf16.msra.mxu1 %v8231_v38  ;;  %3609 = vmatprep.subr.bf16.mxu0 %v8232_v39  ;;  %v8298_v38 = vld [vmem:[#allocation8 + $0x28] ss:$20 sps:$4 sm:$0xff]   ;;  %v8303_v39 = vld [vmem:[#allocation8 + $0x4] ss:$20 sps:$4 sm:$0xff]  }
 0x2df   :  { %3650 = vmatprep.subr.bf16.mxu1 %v8234_v31  ;;  %v8301_v31 = vld [vmem:[#allocation8] ss:$20 sps:$4 sm:$0xff]  }
 0x2e1   :  { %3610 = vmatpush2.bf16.msra.mxu0 %v8236_v44  ;;  %v8306_v44 = vld [vmem:[#allocation8 + $0x25c] ss:$20 sps:$4 sm:$0xff]  }
 0x2e2   :  { %3651 = vmatpush2.bf16.msra.mxu1 %v8237_v5  ;;  %3611 = vmatprep.subr.bf16.mxu0 %v8238_v9  ;;  %v8304_v5 = vld [vmem:[#allocation8 + $0x258] ss:$20 sps:$4 sm:$0xff]   ;;  %v8309_v9 = vld [vmem:[#allocation8 + $0x234] ss:$20 sps:$4 sm:$0xff]  }
 0x2e3   :  { %3652 = vmatprep.subr.bf16.mxu1 %v8240_v49  ;;  %v8307_v49 = vld [vmem:[#allocation8 + $0x230] ss:$20 sps:$4 sm:$0xff]  }
 0x2e5   :  { %3612 = vmatpush2.bf16.msra.mxu0 %v8242_v50  ;;  %v8312_v50 = vld [vmem:[#allocation8 + $0x20c] ss:$20 sps:$4 sm:$0xff]  }
 0x2e6   :  { %3653 = vmatpush2.bf16.msra.mxu1 %v8243_v55  ;;  %3613 = vmatprep.subr.bf16.mxu0 %v8244_v56  ;;  %v8310_v55 = vld [vmem:[#allocation8 + $0x208] ss:$20 sps:$4 sm:$0xff]   ;;  %v8315_v56 = vld [vmem:[#allocation8 + $0x1e4] ss:$20 sps:$4 sm:$0xff]  }
 0x2e7   :  { %3654 = vmatprep.subr.bf16.mxu1 %v8246_v47  ;;  %v8313_v47 = vld [vmem:[#allocation8 + $0x1e0] ss:$20 sps:$4 sm:$0xff]  }
 0x2e9   :  { %3614 = vmatpush2.bf16.msra.mxu0 %v8248_v57  ;;  %v8318_v57 = vld [vmem:[#allocation8 + $0x1bc] ss:$20 sps:$4 sm:$0xff]  }
 0x2ea   :  { %3655 = vmatpush2.bf16.msra.mxu1 %v8249_v6  ;;  %3615 = vmatprep.subr.bf16.mxu0 %v8250_v58  ;;  %v8316_v6 = vld [vmem:[#allocation8 + $0x1b8] ss:$20 sps:$4 sm:$0xff]   ;;  %v8321_v58 = vld [vmem:[#allocation8 + $0x194] ss:$20 sps:$4 sm:$0xff]  }
 0x2eb   :  { %3656 = vmatprep.subr.bf16.mxu1 %v8252_v59  ;;  %v8319_v59 = vld [vmem:[#allocation8 + $0x190] ss:$20 sps:$4 sm:$0xff]  }
 0x2ed   :  { %3616 = vmatpush2.bf16.msra.mxu0 %v8254_v61  ;;  %v8324_v61 = vld [vmem:[#allocation8 + $0x16c] ss:$20 sps:$4 sm:$0xff]  }
 0x2ee   :  { %3657 = vmatpush2.bf16.msra.mxu1 %v8255_v7  ;;  %3617 = vmatprep.subr.bf16.mxu0 %v8256_v63  ;;  %v8322_v7 = vld [vmem:[#allocation8 + $0x168] ss:$20 sps:$4 sm:$0xff]   ;;  %v8327_v63 = vld [vmem:[#allocation8 + $0x144] ss:$20 sps:$4 sm:$0xff]  }
 0x2ef   :  { %3658 = vmatprep.subr.bf16.mxu1 %v8258_v1  ;;  %v8325_v1 = vld [vmem:[#allocation8 + $0x140] ss:$20 sps:$4 sm:$0xff]  }
 0x2f1   :  { %3618 = vmatpush2.bf16.msra.mxu0 %v8260_v3  ;;  %v3261_v3 = vld [vmem:[#allocation11 + $0x8] sm:$0x3] }
 0x2f2   :  { %3659 = vmatpush2.bf16.msra.mxu1 %v8261_v8  ;;  %3619 = vmatprep.subr.bf16.mxu0 %v8262_v51  ;;  %v3266_v8 = vrot.slane %v3261_v3, %v9259_v12  ;;  %v3270_v51 = vrot.slane %v3261_v3, %v9264_v17 }
 0x2f3   :  { %3660 = vmatprep.subr.bf16.mxu1 %v8264_v40 }
 0x2f5   :  { %3620 = vmatpush2.bf16.msra.mxu0 %v8266_v10 }
 0x2f6   :  { %3661 = vmatpush2.bf16.msra.mxu1 %v8267_v43  ;;  %3621 = vmatprep.subr.bf16.mxu0 %v8268_v11 }
 0x2f7   :  { %3662 = vmatprep.subr.bf16.mxu1 %v8270_v48 }
 0x2f9   :  { %3622 = vmatpush2.bf16.msra.mxu0 %v8272_v15 }
 0x2fa   :  { %3663 = vmatpush2.bf16.msra.mxu1 %v8273_v34  ;;  %3623 = vmatprep.subr.bf16.mxu0 %v8274_v19 }
 0x2fb   :  { %3664 = vmatprep.subr.bf16.mxu1 %v8276_v52 }
 0x2fd   :  { %3624 = vmatpush2.bf16.msra.mxu0 %v8278_v20 }
 0x2fe   :  { %3665 = vmatpush2.bf16.msra.mxu1 %v8279_v21  ;;  %3883 = vmatprep.subr.bf16.mxu0 %v8282_v22 }
 0x300   :  { %3626 = vmatmul.mubr.bf16.vlgmr.msra.gmra.mxu0 %v3257_v23 }
 0x301   :  { %3667 = vmatmul.mubr.bf16.vlgmr.msra.gmra.mxu1 %v3259_v24  ;;  %3884 = vmatpush1.bf16.msra.mxu0 %v8280_v25 }
 0x302   :  { %3885 = vmatprep.subr.bf16.mxu0 %v8285_v27 }
 0x305   :  { %3886 = vmatpush1.bf16.msra.mxu0 %v8283_v29  ;;  %v3711_v29 = vld [vmem:[#allocation11 + $0xc] sm:$0x3] }
 0x306   :  { %3887 = vmatprep.subr.bf16.mxu0 %v8288_v30  ;;  %v3716_v30 = vrot.slane %v3711_v29, %v9259_v12 }
 0x309   :  { %3888 = vmatpush1.bf16.msra.mxu0 %v8286_v32  ;;  %v3720_v32 = vrot.slane %v3711_v29, %v9264_v17 }
 0x30a   :  { %3889 = vmatprep.subr.bf16.mxu0 %v8291_v28 }
 0x30d   :  { %3890 = vmatpush1.bf16.msra.mxu0 %v8289_v37 }
 0x30e   :  { %3891 = vmatprep.subr.bf16.mxu0 %v8294_v2 }
 0x311   :  { %3892 = vmatpush1.bf16.msra.mxu0 %v8292_v62 }
 0x312   :  { %3893 = vmatprep.subr.bf16.mxu0 %v8297_v33 }
 0x315   :  { %3894 = vmatpush1.bf16.msra.mxu0 %v8295_v35 }
 0x316   :  { %3895 = vmatprep.subr.bf16.mxu0 %v8300_v36 }
 0x319   :  { %3896 = vmatpush1.bf16.msra.mxu0 %v8298_v38 }
 0x31a   :  { %3897 = vmatprep.subr.bf16.mxu0 %v8303_v39 }
 0x31d   :  { %3898 = vmatpush1.bf16.msra.mxu0 %v8301_v31 }
 0x31e   :  { %3899 = vmatprep.subr.bf16.mxu0 %v8306_v44 }
 0x321   :  { %3900 = vmatpush2.bf16.msra.mxu0 %v8304_v5 }
 0x322   :  { %3901 = vmatprep.subr.bf16.mxu0 %v8309_v9 }
 0x325   :  { %3902 = vmatpush2.bf16.msra.mxu0 %v8307_v49 }
 0x326   :  { %3903 = vmatprep.subr.bf16.mxu0 %v8312_v50 }
 0x329   :  { %3904 = vmatpush2.bf16.msra.mxu0 %v8310_v55 }
 0x32a   :  { %3905 = vmatprep.subr.bf16.mxu0 %v8315_v56 }
 0x32d   :  { %3906 = vmatpush2.bf16.msra.mxu0 %v8313_v47 }
 0x32e   :  { %3907 = vmatprep.subr.bf16.mxu0 %v8318_v57 }
 0x331   :  { %3908 = vmatpush2.bf16.msra.mxu0 %v8316_v6 }
 0x332   :  { %3909 = vmatprep.subr.bf16.mxu0 %v8321_v58 }
 0x335   :  { %3910 = vmatpush2.bf16.msra.mxu0 %v8319_v59 }
 0x336   :  { %3911 = vmatprep.subr.bf16.mxu0 %v8324_v61 }
 0x339   :  { %3912 = vmatpush2.bf16.msra.mxu0 %v8322_v7 }
 0x33a   :  { %3913 = vmatprep.subr.bf16.mxu0 %v8327_v63 }
 0x33d   :  { %3914 = vmatpush2.bf16.msra.mxu0 %v8325_v1 }
 0x3c0   :  { %v3627_v40 = vpop.f32.mrf.mxu0 }
 0x3c1   :  { %v3668_v10 = vpop.f32.mrf.mxu1  ;;  %v3628_v43 = vadd.f32 %v3627_v40, %v3266_v8 }
 0x3c2   :  { %v3629_v11 = vpop.f32.mrf.mxu0 }
 0x3c3   :  { %v3670_v48 = vpop.f32.mrf.mxu1  ;;  %v3669_v15 = vadd.f32 %v3668_v10, %v3628_v43  ;;  %v3630_v34 = vadd.f32 %v3629_v11, %v3270_v51 }
 0x3c4   :  { %v3631_v19 = vpop.f32.mrf.mxu0 }
 0x3c5   :  { %v3672_v52 = vpop.f32.mrf.mxu1  ;;  %v3671_v20 = vadd.f32 %v3670_v48, %v3630_v34  ;;  %v3675_v21 = vmax.f32 %v3669_v15, 0.0 }
 0x3c6   :  { %v3632_v22 = vpop.f32.mrf.mxu0 }
 0x3c7   :  { %v3673_v23 = vpop.f32.mrf.mxu1  ;;  %v3676_v24 = vmax.f32 %v3671_v20, 0.0  ;;  %v3709_v27 = vpack.c.bf16 %v3675_v21, %v3675_v21 }
 0x3c9   :  { %v3710_v25 = vpack.c.bf16 %v3676_v24, %v3676_v24 }
 0x3cb   :  { %3915 = vmatprep.mubr.bf16.mxu0 %v3710_v25 }
 0x3cc   :  { %3916 = vmatmul.mubr.bf16.vlgmr.msra.gmra.mxu0 %v3709_v27 }
 0x48c   :  { %v3917_v28 = vpop.f32.mrf.mxu0 }
 0x48d   :  { %v9366_v37 = vadd.f32 %v3917_v28, %v3716_v30 }
 0x48e   :  { %v3919_v2 = vpop.f32.mrf.mxu0 }
 0x48f   :  { %v9368_v62 = vadd.f32 %v3919_v2, %v3720_v32 }
 0x490   :  { %v3921_v33 = vpop.f32.mrf.mxu0 }
 0x492   :  { %v3922_v35 = vpop.f32.mrf.mxu0 }
 0x493   :  { %9086 = dma.done.wait [#allocation7 + $0x2], 8192 }
 0x494   :  { %9087 = vsyncadd [#allocation7 + $0x2], 4294959104  ;;  %v3991_v36 = vpack.c.bf16 %v3186_v18, %v3186_v18  ;;  %v3993_v38 = vpack.c.bf16 %v3188_v4, %v3188_v4  ;;  %v8328_v39 = vld [vmem:[#allocation4 + $0x74] ss:$8 sps:$4 sm:$0xff]   ;;  %v8332_v44 = vld [vmem:[#allocation4 + $0x70] ss:$8 sps:$4 sm:$0xff]  }
 0x495   :  { %v8330_v31 = vld [vmem:[#allocation4 + $0x174] ss:$8 sps:$4 sm:$0xff]   ;;  %4326 = vmatprep.subr.bf16.mxu1 %v8328_v39  ;;  %v8333_v5 = vld [vmem:[#allocation4 + $0x170] ss:$8 sps:$4 sm:$0xff]   ;;  %v8334_v9 = vld [vmem:[#allocation4 + $0x64] ss:$8 sps:$4 sm:$0xff]  }
 0x496   :  { %4358 = vmatprep.mubr.bf16.mxu1 %v3991_v36  ;;  %4399 = vmatprep.mubr.bf16.mxu0 %v3993_v38  ;;  %v8336_v49 = vld [vmem:[#allocation4 + $0x164] ss:$8 sps:$4 sm:$0xff]   ;;  %v8338_v50 = vld [vmem:[#allocation4 + $0x60] ss:$8 sps:$4 sm:$0xff]   ;;  %v8340_v18 = vld [vmem:[#allocation4 + $0x54] ss:$8 sps:$4 sm:$0xff]  }
 0x497   :  { %4367 = vmatprep.subr.bf16.mxu0 %v8330_v31  ;;  %4327 = vmatpush1.bf16.msra.mxu1 %v8332_v44  ;;  %v8339_v16 = vld [vmem:[#allocation4 + $0x160] ss:$8 sps:$4 sm:$0xff]   ;;  %v8342_v42 = vld [vmem:[#allocation4 + $0x154] ss:$8 sps:$4 sm:$0xff]   ;;  %v8344_v55 = vld [vmem:[#allocation4 + $0x50] ss:$8 sps:$4 sm:$0xff]  }
 0x498   :  { %4368 = vmatpush1.bf16.msra.mxu0 %v8333_v5  ;;  %4328 = vmatprep.subr.bf16.mxu1 %v8334_v9  ;;  %v8345_v4 = vld [vmem:[#allocation4 + $0x150] ss:$8 sps:$4 sm:$0xff]   ;;  %v8346_v56 = vld [vmem:[#allocation4 + $0x44] ss:$8 sps:$4 sm:$0xff]   ;;  %v8350_v57 = vld [vmem:[#allocation4 + $0x40] ss:$8 sps:$4 sm:$0xff]  }
 0x499   :  { %4369 = vmatprep.subr.bf16.mxu0 %v8336_v49  ;;  %v8348_v47 = vld [vmem:[#allocation4 + $0x144] ss:$8 sps:$4 sm:$0xff]   ;;  %v8351_v6 = vld [vmem:[#allocation4 + $0x140] ss:$8 sps:$4 sm:$0xff]   ;;  %v8352_v58 = vld [vmem:[#allocation4 + $0x34] ss:$8 sps:$4 sm:$0xff]  }
 0x49a   :  { %v8354_v59 = vld [vmem:[#allocation4 + $0x134] ss:$8 sps:$4 sm:$0xff]   ;;  %v8356_v61 = vld [vmem:[#allocation4 + $0x30] ss:$8 sps:$4 sm:$0xff]   ;;  %v8358_v63 = vld [vmem:[#allocation4 + $0x24] ss:$8 sps:$4 sm:$0xff]  }
 0x49b   :  { %4329 = vmatpush1.bf16.msra.mxu1 %v8338_v50  ;;  %v8357_v7 = vld [vmem:[#allocation4 + $0x130] ss:$8 sps:$4 sm:$0xff]   ;;  %v8360_v1 = vld [vmem:[#allocation4 + $0x124] ss:$8 sps:$4 sm:$0xff]   ;;  %v8362_v3 = vld [vmem:[#allocation4 + $0x20] ss:$8 sps:$4 sm:$0xff]  }
 0x49c   :  { %4370 = vmatpush1.bf16.msra.mxu0 %v8339_v16  ;;  %4330 = vmatprep.subr.bf16.mxu1 %v8340_v18  ;;  %v8363_v8 = vld [vmem:[#allocation4 + $0x120] ss:$8 sps:$4 sm:$0xff]   ;;  %v8364_v51 = vld [vmem:[#allocation4 + $0x14] ss:$8 sps:$4 sm:$0xff]   ;;  %v8368_v10 = vld [vmem:[#allocation4 + $0x10] ss:$8 sps:$4 sm:$0xff]  }
 0x49d   :  { %4371 = vmatprep.subr.bf16.mxu0 %v8342_v42  ;;  %v8366_v40 = vld [vmem:[#allocation4 + $0x114] ss:$8 sps:$4 sm:$0xff]   ;;  %v8369_v43 = vld [vmem:[#allocation4 + $0x110] ss:$8 sps:$4 sm:$0xff]   ;;  %v8370_v11 = vld [vmem:[#allocation4 + $0x4] ss:$8 sps:$4 sm:$0xff]  }
 0x49e   :  { %v8372_v48 = vld [vmem:[#allocation4 + $0x104] ss:$8 sps:$4 sm:$0xff]   ;;  %v8374_v15 = vld [vmem:[#allocation4] ss:$8 sps:$4 sm:$0xff]   ;;  %v8376_v19 = vld [vmem:[#allocation4 + $0xf4] ss:$8 sps:$4 sm:$0xff]  }
 0x49f   :  { %4331 = vmatpush1.bf16.msra.mxu1 %v8344_v55  ;;  %v8375_v34 = vld [vmem:[#allocation4 + $0x100] ss:$8 sps:$4 sm:$0xff]   ;;  %v8378_v52 = vld [vmem:[#allocation4 + $0x1f4] ss:$8 sps:$4 sm:$0xff]   ;;  %v8380_v20 = vld [vmem:[#allocation4 + $0xf0] ss:$8 sps:$4 sm:$0xff]  }
 0x4a0   :  { %4372 = vmatpush1.bf16.msra.mxu0 %v8345_v4  ;;  %4332 = vmatprep.subr.bf16.mxu1 %v8346_v56  ;;  %v8381_v21 = vld [vmem:[#allocation4 + $0x1f0] ss:$8 sps:$4 sm:$0xff]   ;;  %v8382_v22 = vld [vmem:[#allocation4 + $0xe4] ss:$8 sps:$4 sm:$0xff]   ;;  %v8386_v24 = vld [vmem:[#allocation4 + $0xe0] ss:$8 sps:$4 sm:$0xff]  }
 0x4a1   :  { %4373 = vmatprep.subr.bf16.mxu0 %v8348_v47  ;;  %v8384_v23 = vld [vmem:[#allocation4 + $0x1e4] ss:$8 sps:$4 sm:$0xff]   ;;  %v8387_v25 = vld [vmem:[#allocation4 + $0x1e0] ss:$8 sps:$4 sm:$0xff]   ;;  %v8388_v27 = vld [vmem:[#allocation4 + $0xd4] ss:$8 sps:$4 sm:$0xff]  }
 0x4a2   :  { %v8390_v29 = vld [vmem:[#allocation4 + $0x1d4] ss:$8 sps:$4 sm:$0xff]   ;;  %v8392_v30 = vld [vmem:[#allocation4 + $0xd0] ss:$8 sps:$4 sm:$0xff]   ;;  %v8394_v28 = vld [vmem:[#allocation4 + $0xc4] ss:$8 sps:$4 sm:$0xff]  }
 0x4a3   :  { %4333 = vmatpush1.bf16.msra.mxu1 %v8350_v57  ;;  %v8393_v32 = vld [vmem:[#allocation4 + $0x1d0] ss:$8 sps:$4 sm:$0xff]   ;;  %v8396_v2 = vld [vmem:[#allocation4 + $0x1c4] ss:$8 sps:$4 sm:$0xff]   ;;  %v8398_v33 = vld [vmem:[#allocation4 + $0xc0] ss:$8 sps:$4 sm:$0xff]  }
 0x4a4   :  { %4374 = vmatpush1.bf16.msra.mxu0 %v8351_v6  ;;  %4334 = vmatprep.subr.bf16.mxu1 %v8352_v58  ;;  %v8399_v35 = vld [vmem:[#allocation4 + $0x1c0] ss:$8 sps:$4 sm:$0xff]   ;;  %v8400_v36 = vld [vmem:[#allocation4 + $0xb4] ss:$8 sps:$4 sm:$0xff]   ;;  %v8404_v39 = vld [vmem:[#allocation4 + $0xb0] ss:$8 sps:$4 sm:$0xff]   ;;  %v3990_v58 = vpack.c.bf16 %v3185_v14, %v3185_v14 }
 0x4a5   :  { %4375 = vmatprep.subr.bf16.mxu0 %v8354_v59  ;;  %v8402_v38 = vld [vmem:[#allocation4 + $0x1b4] ss:$8 sps:$4 sm:$0xff]   ;;  %v8405_v31 = vld [vmem:[#allocation4 + $0x1b0] ss:$8 sps:$4 sm:$0xff]   ;;  %v8406_v44 = vld [vmem:[#allocation4 + $0xa4] ss:$8 sps:$4 sm:$0xff]   ;;  %v3992_v59 = vpack.c.bf16 %v3187_v45, %v3187_v45 }
 0x4a6   :  { %v8408_v5 = vld [vmem:[#allocation4 + $0x1a4] ss:$8 sps:$4 sm:$0xff]   ;;  %v8410_v9 = vld [vmem:[#allocation4 + $0xa0] ss:$8 sps:$4 sm:$0xff]   ;;  %v8412_v50 = vld [vmem:[#allocation4 + $0x94] ss:$8 sps:$4 sm:$0xff]  }
 0x4a7   :  { %4335 = vmatpush1.bf16.msra.mxu1 %v8356_v61  ;;  %v8411_v49 = vld [vmem:[#allocation4 + $0x1a0] ss:$8 sps:$4 sm:$0xff]   ;;  %v8414_v16 = vld [vmem:[#allocation4 + $0x194] ss:$8 sps:$4 sm:$0xff]   ;;  %v8416_v18 = vld [vmem:[#allocation4 + $0x90] ss:$8 sps:$4 sm:$0xff]  }
 0x4a8   :  { %4376 = vmatpush1.bf16.msra.mxu0 %v8357_v7  ;;  %4336 = vmatprep.subr.bf16.mxu1 %v8358_v63  ;;  %v8417_v42 = vld [vmem:[#allocation4 + $0x190] ss:$8 sps:$4 sm:$0xff]   ;;  %v8418_v55 = vld [vmem:[#allocation4 + $0x84] ss:$8 sps:$4 sm:$0xff]   ;;  %v8422_v56 = vld [vmem:[#allocation4 + $0x80] ss:$8 sps:$4 sm:$0xff]  }
 0x4a9   :  { %4377 = vmatprep.subr.bf16.mxu0 %v8360_v1  ;;  %v8420_v4 = vld [vmem:[#allocation4 + $0x184] ss:$8 sps:$4 sm:$0xff]   ;;  %v8423_v47 = vld [vmem:[#allocation4 + $0x180] ss:$8 sps:$4 sm:$0xff]  }
 0x4aa   :  { %v8424_v57 = vld [vmem:[#allocation8 + $0x260] ss:$20 sps:$4 sm:$0xff]   ;;  %v8426_v61 = vld [vmem:[#allocation8 + $0x238] ss:$20 sps:$4 sm:$0xff]   ;;  %v8428_v63 = vld [vmem:[#allocation8 + $0x210] ss:$20 sps:$4 sm:$0xff]  }
 0x4ab   :  { %4337 = vmatpush1.bf16.msra.mxu1 %v8362_v3  ;;  %v8425_v6 = vld [vmem:[#allocation8 + $0x120] ss:$20 sps:$4 sm:$0xff]   ;;  %v8427_v7 = vld [vmem:[#allocation8 + $0xf8] ss:$20 sps:$4 sm:$0xff]   ;;  %v8429_v1 = vld [vmem:[#allocation8 + $0xd0] ss:$20 sps:$4 sm:$0xff]  }
 0x4ac   :  { %4378 = vmatpush1.bf16.msra.mxu0 %v8363_v8  ;;  %4338 = vmatprep.subr.bf16.mxu1 %v8364_v51  ;;  %v8430_v13 = vld [vmem:[#allocation8 + $0x1e8] ss:$20 sps:$4 sm:$0xff]   ;;  %v8432_v53 = vld [vmem:[#allocation8 + $0x1c0] ss:$20 sps:$4 sm:$0xff]   ;;  %v8434_v3 = vld [vmem:[#allocation8 + $0x198] ss:$20 sps:$4 sm:$0xff]  }
 0x4ad   :  { %4379 = vmatprep.subr.bf16.mxu0 %v8366_v40  ;;  %v8431_v14 = vld [vmem:[#allocation8 + $0xa8] ss:$20 sps:$4 sm:$0xff]   ;;  %v8433_v45 = vld [vmem:[#allocation8 + $0x80] ss:$20 sps:$4 sm:$0xff]   ;;  %v8435_v8 = vld [vmem:[#allocation8 + $0x58] ss:$20 sps:$4 sm:$0xff]  }
 0x4ae   :  { %v8436_v51 = vld [vmem:[#allocation8 + $0x170] ss:$20 sps:$4 sm:$0xff]  }
 0x4af   :  { %4339 = vmatpush1.bf16.msra.mxu1 %v8368_v10  ;;  %v8437_v40 = vld [vmem:[#allocation8 + $0x30] ss:$20 sps:$4 sm:$0xff]   ;;  %v8438_v10 = vld [vmem:[#allocation8 + $0x148] ss:$20 sps:$4 sm:$0xff]  }
 0x4b0   :  { %4380 = vmatpush1.bf16.msra.mxu0 %v8369_v43  ;;  %4340 = vmatprep.subr.bf16.mxu1 %v8370_v11  ;;  %v8439_v43 = vld [vmem:[#allocation8 + $0x8] ss:$20 sps:$4 sm:$0xff]  }
 0x4b1   :  { %4381 = vmatprep.subr.bf16.mxu0 %v8372_v48  ;;  %v8442_v11 = vld [vmem:[#allocation8 + $0x128] ss:$20 sps:$4 sm:$0xff]  }
 0x4b2   :  { %v3994_v48 = vld [vmem:[#allocation11 + $0xa] sm:$0x3] }
 0x4b3   :  { %4341 = vmatpush1.bf16.msra.mxu1 %v8374_v15  ;;  %v3999_v15 = vrot.slane %v3994_v48, %v9259_v12 }
 0x4b4   :  { %4382 = vmatpush1.bf16.msra.mxu0 %v8375_v34  ;;  %4342 = vmatprep.subr.bf16.mxu1 %v8376_v19  ;;  %v4003_v34 = vrot.slane %v3994_v48, %v9264_v17 }
 0x4b5   :  { %4383 = vmatprep.subr.bf16.mxu0 %v8378_v52 }
 0x4b7   :  { %4343 = vmatpush2.bf16.msra.mxu1 %v8380_v20 }
 0x4b8   :  { %4384 = vmatpush2.bf16.msra.mxu0 %v8381_v21  ;;  %4344 = vmatprep.subr.bf16.mxu1 %v8382_v22 }
 0x4b9   :  { %4385 = vmatprep.subr.bf16.mxu0 %v8384_v23 }
 0x4bb   :  { %4345 = vmatpush2.bf16.msra.mxu1 %v8386_v24 }
 0x4bc   :  { %4386 = vmatpush2.bf16.msra.mxu0 %v8387_v25  ;;  %4346 = vmatprep.subr.bf16.mxu1 %v8388_v27 }
 0x4bd   :  { %4387 = vmatprep.subr.bf16.mxu0 %v8390_v29 }
 0x4bf   :  { %4347 = vmatpush2.bf16.msra.mxu1 %v8392_v30 }
 0x4c0   :  { %4388 = vmatpush2.bf16.msra.mxu0 %v8393_v32  ;;  %4348 = vmatprep.subr.bf16.mxu1 %v8394_v28 }
 0x4c1   :  { %4389 = vmatprep.subr.bf16.mxu0 %v8396_v2 }
 0x4c3   :  { %4349 = vmatpush2.bf16.msra.mxu1 %v8398_v33 }
 0x4c4   :  { %4390 = vmatpush2.bf16.msra.mxu0 %v8399_v35  ;;  %4350 = vmatprep.subr.bf16.mxu1 %v8400_v36  ;;  %v8440_v35 = vld [vmem:[#allocation8 + $0x124] ss:$20 sps:$4 sm:$0xff]  }
 0x4c5   :  { %4391 = vmatprep.subr.bf16.mxu0 %v8402_v38  ;;  %v8445_v38 = vld [vmem:[#allocation8 + $0x100] ss:$20 sps:$4 sm:$0xff]  }
 0x4c7   :  { %4351 = vmatpush2.bf16.msra.mxu1 %v8404_v39  ;;  %v8443_v39 = vld [vmem:[#allocation8 + $0xfc] ss:$20 sps:$4 sm:$0xff]  }
 0x4c8   :  { %4392 = vmatpush2.bf16.msra.mxu0 %v8405_v31  ;;  %4352 = vmatprep.subr.bf16.mxu1 %v8406_v44  ;;  %v8448_v31 = vld [vmem:[#allocation8 + $0xd8] ss:$20 sps:$4 sm:$0xff]   ;;  %v8446_v44 = vld [vmem:[#allocation8 + $0xd4] ss:$20 sps:$4 sm:$0xff]  }
 0x4c9   :  { %4393 = vmatprep.subr.bf16.mxu0 %v8408_v5  ;;  %v8451_v5 = vld [vmem:[#allocation8 + $0xb0] ss:$20 sps:$4 sm:$0xff]  }
 0x4cb   :  { %4353 = vmatpush2.bf16.msra.mxu1 %v8410_v9  ;;  %v8449_v9 = vld [vmem:[#allocation8 + $0xac] ss:$20 sps:$4 sm:$0xff]  }
 0x4cc   :  { %4394 = vmatpush2.bf16.msra.mxu0 %v8411_v49  ;;  %4354 = vmatprep.subr.bf16.mxu1 %v8412_v50  ;;  %v8454_v49 = vld [vmem:[#allocation8 + $0x88] ss:$20 sps:$4 sm:$0xff]   ;;  %v8452_v50 = vld [vmem:[#allocation8 + $0x84] ss:$20 sps:$4 sm:$0xff]  }
 0x4cd   :  { %4395 = vmatprep.subr.bf16.mxu0 %v8414_v16  ;;  %v8457_v16 = vld [vmem:[#allocation8 + $0x60] ss:$20 sps:$4 sm:$0xff]  }
 0x4cf   :  { %4355 = vmatpush2.bf16.msra.mxu1 %v8416_v18  ;;  %v8455_v18 = vld [vmem:[#allocation8 + $0x5c] ss:$20 sps:$4 sm:$0xff]  }
 0x4d0   :  { %4396 = vmatpush2.bf16.msra.mxu0 %v8417_v42  ;;  %4356 = vmatprep.subr.bf16.mxu1 %v8418_v55  ;;  %v8460_v42 = vld [vmem:[#allocation8 + $0x38] ss:$20 sps:$4 sm:$0xff]   ;;  %v8458_v55 = vld [vmem:[#allocation8 + $0x34] ss:$20 sps:$4 sm:$0xff]  }
 0x4d1   :  { %4397 = vmatprep.subr.bf16.mxu0 %v8420_v4  ;;  %v8463_v4 = vld [vmem:[#allocation8 + $0x10] ss:$20 sps:$4 sm:$0xff]  }
 0x4d3   :  { %4357 = vmatpush2.bf16.msra.mxu1 %v8422_v56  ;;  %v8461_v56 = vld [vmem:[#allocation8 + $0xc] ss:$20 sps:$4 sm:$0xff]  }
 0x4d4   :  { %4398 = vmatpush2.bf16.msra.mxu0 %v8423_v47  ;;  %8106 = vmatprep.subr.bf16.mxu1 %v8424_v57  ;;  %v8466_v47 = vld [vmem:[#allocation8 + $0x268] ss:$20 sps:$4 sm:$0xff]   ;;  %v8464_v57 = vld [vmem:[#allocation8 + $0x264] ss:$20 sps:$4 sm:$0xff]  }
 0x4d6   :  { %4359 = vmatmul.mubr.bf16.vlgmr.msra.gmra.mxu1 %v3990_v58  ;;  %v8467_v58 = vld [vmem:[#allocation8 + $0x23c] ss:$20 sps:$4 sm:$0xff]  }
 0x4d7   :  { %4400 = vmatmul.mubr.bf16.vlgmr.msra.gmra.mxu0 %v3992_v59  ;;  %8107 = vmatpush3.bf16.msra.mxu1 %v8425_v6  ;;  %v8469_v6 = vld [vmem:[#allocation8 + $0x240] ss:$20 sps:$4 sm:$0xff]   ;;  %v8472_v59 = vld [vmem:[#allocation8 + $0x218] ss:$20 sps:$4 sm:$0xff]  }
 0x4d8   :  { %8108 = vmatprep.subr.bf16.mxu1 %v8426_v61  ;;  %v8470_v61 = vld [vmem:[#allocation8 + $0x214] ss:$20 sps:$4 sm:$0xff]  }
 0x4db   :  { %8109 = vmatpush3.bf16.msra.mxu1 %v8427_v7  ;;  %v8475_v7 = vld [vmem:[#allocation8 + $0x1f0] ss:$20 sps:$4 sm:$0xff]  }
 0x4dc   :  { %8110 = vmatprep.subr.bf16.mxu1 %v8428_v63  ;;  %v8473_v63 = vld [vmem:[#allocation8 + $0x1ec] ss:$20 sps:$4 sm:$0xff]  }
 0x4df   :  { %8111 = vmatpush3.bf16.msra.mxu1 %v8429_v1  ;;  %v8478_v1 = vld [vmem:[#allocation8 + $0x1c8] ss:$20 sps:$4 sm:$0xff]  }
 0x4e0   :  { %8112 = vmatprep.subr.bf16.mxu1 %v8430_v13  ;;  %v8476_v13 = vld [vmem:[#allocation8 + $0x1c4] ss:$20 sps:$4 sm:$0xff]  }
 0x4e3   :  { %8113 = vmatpush3.bf16.msra.mxu1 %v8431_v14  ;;  %v8481_v14 = vld [vmem:[#allocation8 + $0x1a0] ss:$20 sps:$4 sm:$0xff]  }
 0x4e4   :  { %8114 = vmatprep.subr.bf16.mxu1 %v8432_v53  ;;  %v8479_v53 = vld [vmem:[#allocation8 + $0x19c] ss:$20 sps:$4 sm:$0xff]  }
 0x4e7   :  { %8115 = vmatpush3.bf16.msra.mxu1 %v8433_v45  ;;  %v8484_v45 = vld [vmem:[#allocation8 + $0x178] ss:$20 sps:$4 sm:$0xff]  }
 0x4e8   :  { %8116 = vmatprep.subr.bf16.mxu1 %v8434_v3  ;;  %v8482_v3 = vld [vmem:[#allocation8 + $0x174] ss:$20 sps:$4 sm:$0xff]  }
 0x4eb   :  { %8117 = vmatpush3.bf16.msra.mxu1 %v8435_v8  ;;  %v8487_v8 = vld [vmem:[#allocation8 + $0x150] ss:$20 sps:$4 sm:$0xff]  }
 0x4ec   :  { %8118 = vmatprep.subr.bf16.mxu1 %v8436_v51  ;;  %v8485_v51 = vld [vmem:[#allocation8 + $0x14c] ss:$20 sps:$4 sm:$0xff]  }
 0x4ef   :  { %8119 = vmatpush3.bf16.msra.mxu1 %v8437_v40 }
 0x4f0   :  { %8120 = vmatprep.subr.bf16.mxu1 %v8438_v10  ;;  %v7764_v10 = vld [vmem:[#allocation11 + $0xe] ss:$0 sm:$0xff] }
 0x4f3   :  { %8121 = vmatpush3.bf16.msra.mxu1 %v8439_v43 }
 0x4f4   :  { %4793 = vmatprep.subr.bf16.mxu1 %v8442_v11 }
 0x596   :  { %v4360_v19 = vpop.f32.mrf.mxu1 }
 0x597   :  { %v4401_v52 = vpop.f32.mrf.mxu0  ;;  %v4361_v20 = vadd.f32 %v4360_v19, %v3999_v15  ;;  %v4619_v19 = vpack.c.bf16 %v9366_v37, %v9366_v37 }
 0x598   :  { %v4362_v21 = vpop.f32.mrf.mxu1 }
 0x599   :  { %v4403_v22 = vpop.f32.mrf.mxu0  ;;  %v4402_v23 = vadd.f32 %v4401_v52, %v4361_v20  ;;  %v4363_v24 = vadd.f32 %v4362_v21, %v4003_v34  ;;  %v4621_v20 = vld [vmem:[#allocation11 + $0xf] sm:$0x3] }
 0x59a   :  { %v4364_v25 = vpop.f32.mrf.mxu1  ;;  %v4626_v21 = vrot.slane %v4621_v20, %v9259_v12 }
 0x59b   :  { %v4405_v27 = vpop.f32.mrf.mxu0  ;;  %v4404_v29 = vadd.f32 %v4403_v22, %v4363_v24  ;;  %v4408_v30 = vmax.f32 %v4402_v23, 0.0  ;;  %v4630_v22 = vrot.slane %v4621_v20, %v9264_v17 }
 0x59c   :  { %v4365_v32 = vpop.f32.mrf.mxu1 }
 0x59d   :  { %v4406_v28 = vpop.f32.mrf.mxu0  ;;  %v4409_v2 = vmax.f32 %v4404_v29, 0.0  ;;  %v4442_v36 = vpack.c.bf16 %v4408_v30, %v4408_v30 }
 0x59f   :  { %v4443_v33 = vpack.c.bf16 %v4409_v2, %v4409_v2 }
 0x5a1   :  { %4579 = vmatprep.mubr.bf16.mxu1 %v4443_v33 }
 0x5a2   :  { %4580 = vmatmul.mubr.bf16.vlgmr.msra.gmra.mxu1 %v4442_v36 }
 0x5a3   :  { %4794 = vmatpush1.bf16.msra.mxu1 %v8440_v35 }
 0x5a4   :  { %4795 = vmatprep.subr.bf16.mxu1 %v8445_v38 }
 0x5a7   :  { %4796 = vmatpush1.bf16.msra.mxu1 %v8443_v39 }
 0x5a8   :  { %4797 = vmatprep.subr.bf16.mxu1 %v8448_v31 }
 0x5ab   :  { %4798 = vmatpush1.bf16.msra.mxu1 %v8446_v44 }
 0x5ac   :  { %4799 = vmatprep.subr.bf16.mxu1 %v8451_v5 }
 0x5af   :  { %4800 = vmatpush1.bf16.msra.mxu1 %v8449_v9 }
 0x5b0   :  { %4801 = vmatprep.subr.bf16.mxu1 %v8454_v49 }
 0x5b3   :  { %4802 = vmatpush1.bf16.msra.mxu1 %v8452_v50 }
 0x5b4   :  { %4803 = vmatprep.subr.bf16.mxu1 %v8457_v16 }
 0x5b7   :  { %4804 = vmatpush1.bf16.msra.mxu1 %v8455_v18 }
 0x5b8   :  { %4805 = vmatprep.subr.bf16.mxu1 %v8460_v42 }
 0x5bb   :  { %4806 = vmatpush1.bf16.msra.mxu1 %v8458_v55 }
 0x5bc   :  { %4807 = vmatprep.subr.bf16.mxu1 %v8463_v4 }
 0x5bf   :  { %4808 = vmatpush1.bf16.msra.mxu1 %v8461_v56 }
 0x5c0   :  { %4809 = vmatprep.subr.bf16.mxu1 %v8466_v47 }
 0x5c3   :  { %4810 = vmatpush2.bf16.msra.mxu1 %v8464_v57 }
 0x5c4   :  { %4811 = vmatprep.subr.bf16.mxu1 %v8469_v6 }
 0x5c7   :  { %4812 = vmatpush2.bf16.msra.mxu1 %v8467_v58 }
 0x5c8   :  { %4813 = vmatprep.subr.bf16.mxu1 %v8472_v59 }
 0x5cb   :  { %4814 = vmatpush2.bf16.msra.mxu1 %v8470_v61 }
 0x5cc   :  { %4815 = vmatprep.subr.bf16.mxu1 %v8475_v7 }
 0x5cf   :  { %4816 = vmatpush2.bf16.msra.mxu1 %v8473_v63 }
 0x5d0   :  { %4817 = vmatprep.subr.bf16.mxu1 %v8478_v1 }
 0x5d3   :  { %4818 = vmatpush2.bf16.msra.mxu1 %v8476_v13 }
 0x5d4   :  { %4819 = vmatprep.subr.bf16.mxu1 %v8481_v14 }
 0x5d7   :  { %4820 = vmatpush2.bf16.msra.mxu1 %v8479_v53 }
 0x5d8   :  { %4821 = vmatprep.subr.bf16.mxu1 %v8484_v45 }
 0x5db   :  { %4822 = vmatpush2.bf16.msra.mxu1 %v8482_v3 }
 0x5dc   :  { %4823 = vmatprep.subr.bf16.mxu1 %v8487_v8 }
 0x5df   :  { %4824 = vmatpush2.bf16.msra.mxu1 %v8485_v51 }
 0x662   :  { %v8122_v40 = vpop.f32.mrf.mxu1 }
 0x664   :  { %v8123_v43 = vpop.f32.mrf.mxu1 }
 0x665   :  { %v8124_v11 = vadd.f32 %v8123_v43, %v8122_v40 }
 0x666   :  { %v8125_v48 = vpop.f32.mrf.mxu1 }
 0x667   :  { %v4582_v15 = vadd.f32 %v8124_v11, %v7764_v10 }
 0x668   :  { %v8126_v34 = vpop.f32.mrf.mxu1 }
 0x669   :  { %v4620_v52 = vpack.c.bf16 %v4582_v15, %v4582_v15 }
 0x66b   :  { %4825 = vmatprep.mubr.bf16.mxu1 %v4620_v52 }
 0x66c   :  { %4826 = vmatmul.mubr.bf16.vlgmr.msra.gmra.mxu1 %v4619_v19 }
 0x72c   :  { %v4827_v23 = vpop.f32.mrf.mxu1 }
 0x72d   :  { %v9388_v24 = vadd.f32 %v4827_v23, %v4626_v21 }
 0x72e   :  { %v4829_v25 = vpop.f32.mrf.mxu1 }
 0x72f   :  { %v4834_v27 = vmax.f32 %v9388_v24, 0.0  ;;  %v4830_v29 = vadd.f32 %v4829_v25, %v4630_v22 }
 0x730   :  { %v4831_v30 = vpop.f32.mrf.mxu1 }
 0x731   :  { %v4835_v32 = vmax.f32 %v4830_v29, 0.0 }
 0x732   :  { %v4832_v28 = vpop.f32.mrf.mxu1 }
 0x733   :  { %9088 = dma.done.wait [#allocation7 + $0x3], 8192 }
 0x734   :  { %9089 = vsyncadd [#allocation7 + $0x3], 4294959104  ;;  %v4905_v2 = vpack.c.bf16 %v4835_v32, %v4835_v32  ;;  %v8488_v33 = vld [vmem:[#allocation5 + $0xe4] ss:$16 sps:$4 sm:$0xff]   ;;  %v8490_v35 = vld [vmem:[#allocation5 + $0xec] ss:$16 sps:$4 sm:$0xff]  }
 0x735   :  { %5248 = vmatprep.subr.bf16.mxu0 %v8488_v33  ;;  %v8492_v36 = vld [vmem:[#allocation5 + $0xe0] ss:$16 sps:$4 sm:$0xff]   ;;  %v8493_v38 = vld [vmem:[#allocation5 + $0xe8] ss:$16 sps:$4 sm:$0xff]   ;;  %5289 = vmatprep.subr.bf16.mxu1 %v8490_v35  ;;  %v8494_v39 = vld [vmem:[#allocation5 + $0xc4] ss:$16 sps:$4 sm:$0xff]  }
 0x736   :  { %5280 = vmatprep.mubr.bf16.mxu0 %v4905_v2  ;;  %5321 = vmatprep.mubr.bf16.mxu1 %v4905_v2  ;;  %v8496_v31 = vld [vmem:[#allocation5 + $0xcc] ss:$16 sps:$4 sm:$0xff]   ;;  %v8498_v44 = vld [vmem:[#allocation5 + $0xc0] ss:$16 sps:$4 sm:$0xff]   ;;  %v8499_v5 = vld [vmem:[#allocation5 + $0xc8] ss:$16 sps:$4 sm:$0xff]  }
 0x737   :  { %5249 = vmatpush1.bf16.msra.mxu0 %v8492_v36  ;;  %5290 = vmatpush1.bf16.msra.mxu1 %v8493_v38  ;;  %v8500_v9 = vld [vmem:[#allocation5 + $0xa4] ss:$16 sps:$4 sm:$0xff]   ;;  %v8502_v49 = vld [vmem:[#allocation5 + $0xac] ss:$16 sps:$4 sm:$0xff]   ;;  %v8504_v50 = vld [vmem:[#allocation5 + $0xa0] ss:$16 sps:$4 sm:$0xff]  }
 0x738   :  { %5250 = vmatprep.subr.bf16.mxu0 %v8494_v39  ;;  %5291 = vmatprep.subr.bf16.mxu1 %v8496_v31  ;;  %v8505_v16 = vld [vmem:[#allocation5 + $0xa8] ss:$16 sps:$4 sm:$0xff]   ;;  %v8506_v18 = vld [vmem:[#allocation5 + $0x84] ss:$16 sps:$4 sm:$0xff]   ;;  %v8508_v42 = vld [vmem:[#allocation5 + $0x8c] ss:$16 sps:$4 sm:$0xff]  }
 0x739   :  { %v8510_v55 = vld [vmem:[#allocation5 + $0x80] ss:$16 sps:$4 sm:$0xff]   ;;  %v8511_v4 = vld [vmem:[#allocation5 + $0x88] ss:$16 sps:$4 sm:$0xff]   ;;  %v8512_v56 = vld [vmem:[#allocation5 + $0x64] ss:$16 sps:$4 sm:$0xff]  }
 0x73a   :  { %v8514_v47 = vld [vmem:[#allocation5 + $0x6c] ss:$16 sps:$4 sm:$0xff]   ;;  %v8516_v57 = vld [vmem:[#allocation5 + $0x60] ss:$16 sps:$4 sm:$0xff]   ;;  %v8517_v6 = vld [vmem:[#allocation5 + $0x68] ss:$16 sps:$4 sm:$0xff]  }
 0x73b   :  { %5251 = vmatpush1.bf16.msra.mxu0 %v8498_v44  ;;  %5292 = vmatpush1.bf16.msra.mxu1 %v8499_v5  ;;  %v8518_v58 = vld [vmem:[#allocation5 + $0x44] ss:$16 sps:$4 sm:$0xff]   ;;  %v8520_v59 = vld [vmem:[#allocation5 + $0x4c] ss:$16 sps:$4 sm:$0xff]   ;;  %v8522_v61 = vld [vmem:[#allocation5 + $0x40] ss:$16 sps:$4 sm:$0xff]  }
 0x73c   :  { %5252 = vmatprep.subr.bf16.mxu0 %v8500_v9  ;;  %5293 = vmatprep.subr.bf16.mxu1 %v8502_v49  ;;  %v8523_v7 = vld [vmem:[#allocation5 + $0x48] ss:$16 sps:$4 sm:$0xff]   ;;  %v8524_v63 = vld [vmem:[#allocation5 + $0x24] ss:$16 sps:$4 sm:$0xff]   ;;  %v8526_v1 = vld [vmem:[#allocation5 + $0x2c] ss:$16 sps:$4 sm:$0xff]  }
 0x73d   :  { %v8528_v13 = vld [vmem:[#allocation5 + $0x20] ss:$16 sps:$4 sm:$0xff]   ;;  %v8529_v14 = vld [vmem:[#allocation5 + $0x28] ss:$16 sps:$4 sm:$0xff]   ;;  %v8530_v53 = vld [vmem:[#allocation5 + $0x4] ss:$16 sps:$4 sm:$0xff]  }
 0x73e   :  { %v8532_v45 = vld [vmem:[#allocation5 + $0xc] ss:$16 sps:$4 sm:$0xff]   ;;  %v8534_v3 = vld [vmem:[#allocation5] ss:$16 sps:$4 sm:$0xff]   ;;  %v8535_v8 = vld [vmem:[#allocation5 + $0x8] ss:$16 sps:$4 sm:$0xff]  }
 0x73f   :  { %5253 = vmatpush1.bf16.msra.mxu0 %v8504_v50  ;;  %5294 = vmatpush1.bf16.msra.mxu1 %v8505_v16  ;;  %v8536_v51 = vld [vmem:[#allocation5 + $0x1e4] ss:$16 sps:$4 sm:$0xff]   ;;  %v8538_v40 = vld [vmem:[#allocation5 + $0x1ec] ss:$16 sps:$4 sm:$0xff]   ;;  %v8540_v10 = vld [vmem:[#allocation5 + $0x1e0] ss:$16 sps:$4 sm:$0xff]  }
 0x740   :  { %5254 = vmatprep.subr.bf16.mxu0 %v8506_v18  ;;  %5295 = vmatprep.subr.bf16.mxu1 %v8508_v42  ;;  %v8541_v43 = vld [vmem:[#allocation5 + $0x1e8] ss:$16 sps:$4 sm:$0xff]   ;;  %v8542_v11 = vld [vmem:[#allocation5 + $0x1c4] ss:$16 sps:$4 sm:$0xff]   ;;  %v8544_v48 = vld [vmem:[#allocation5 + $0x1cc] ss:$16 sps:$4 sm:$0xff]   ;;  %v4904_v18 = vpack.c.bf16 %v4834_v27, %v4834_v27 }
 0x741   :  { %v8546_v15 = vld [vmem:[#allocation5 + $0x1c0] ss:$16 sps:$4 sm:$0xff]   ;;  %v8547_v34 = vld [vmem:[#allocation5 + $0x1c8] ss:$16 sps:$4 sm:$0xff]   ;;  %v8548_v19 = vld [vmem:[#allocation5 + $0x1a4] ss:$16 sps:$4 sm:$0xff]  }
 0x742   :  { %v8550_v52 = vld [vmem:[#allocation5 + $0x1ac] ss:$16 sps:$4 sm:$0xff]   ;;  %v8552_v20 = vld [vmem:[#allocation5 + $0x1a0] ss:$16 sps:$4 sm:$0xff]   ;;  %v8553_v21 = vld [vmem:[#allocation5 + $0x1a8] ss:$16 sps:$4 sm:$0xff]  }
 0x743   :  { %5255 = vmatpush1.bf16.msra.mxu0 %v8510_v55  ;;  %5296 = vmatpush1.bf16.msra.mxu1 %v8511_v4  ;;  %v8554_v22 = vld [vmem:[#allocation5 + $0x184] ss:$16 sps:$4 sm:$0xff]   ;;  %v8556_v23 = vld [vmem:[#allocation5 + $0x18c] ss:$16 sps:$4 sm:$0xff]   ;;  %v8558_v25 = vld [vmem:[#allocation5 + $0x180] ss:$16 sps:$4 sm:$0xff]  }
 0x744   :  { %5256 = vmatprep.subr.bf16.mxu0 %v8512_v56  ;;  %5297 = vmatprep.subr.bf16.mxu1 %v8514_v47  ;;  %v8559_v29 = vld [vmem:[#allocation5 + $0x188] ss:$16 sps:$4 sm:$0xff]   ;;  %v8560_v30 = vld [vmem:[#allocation5 + $0x164] ss:$16 sps:$4 sm:$0xff]   ;;  %v8562_v32 = vld [vmem:[#allocation5 + $0x16c] ss:$16 sps:$4 sm:$0xff]  }
 0x745   :  { %v8564_v28 = vld [vmem:[#allocation5 + $0x160] ss:$16 sps:$4 sm:$0xff]   ;;  %v8565_v2 = vld [vmem:[#allocation5 + $0x168] ss:$16 sps:$4 sm:$0xff]   ;;  %v8566_v33 = vld [vmem:[#allocation5 + $0x144] ss:$16 sps:$4 sm:$0xff]  }
 0x746   :  { %v8568_v35 = vld [vmem:[#allocation5 + $0x14c] ss:$16 sps:$4 sm:$0xff]   ;;  %v8570_v36 = vld [vmem:[#allocation5 + $0x140] ss:$16 sps:$4 sm:$0xff]   ;;  %v8571_v38 = vld [vmem:[#allocation5 + $0x148] ss:$16 sps:$4 sm:$0xff]  }
 0x747   :  { %5257 = vmatpush1.bf16.msra.mxu0 %v8516_v57  ;;  %5298 = vmatpush1.bf16.msra.mxu1 %v8517_v6  ;;  %v8572_v39 = vld [vmem:[#allocation5 + $0x124] ss:$16 sps:$4 sm:$0xff]   ;;  %v8574_v31 = vld [vmem:[#allocation5 + $0x12c] ss:$16 sps:$4 sm:$0xff]   ;;  %v8576_v44 = vld [vmem:[#allocation5 + $0x120] ss:$16 sps:$4 sm:$0xff]  }
 0x748   :  { %5258 = vmatprep.subr.bf16.mxu0 %v8518_v58  ;;  %5299 = vmatprep.subr.bf16.mxu1 %v8520_v59  ;;  %v8577_v5 = vld [vmem:[#allocation5 + $0x128] ss:$16 sps:$4 sm:$0xff]   ;;  %v8578_v9 = vld [vmem:[#allocation5 + $0x104] ss:$16 sps:$4 sm:$0xff]   ;;  %v8580_v49 = vld [vmem:[#allocation5 + $0x10c] ss:$16 sps:$4 sm:$0xff]  }
 0x749   :  { %v8582_v50 = vld [vmem:[#allocation5 + $0x100] ss:$16 sps:$4 sm:$0xff]   ;;  %v8583_v16 = vld [vmem:[#allocation5 + $0x108] ss:$16 sps:$4 sm:$0xff]  }
 0x74a   :  { %v4906_v42 = vld [vmem:[#allocation11 + $0x11] sm:$0xf] }
 0x74b   :  { %5259 = vmatpush1.bf16.msra.mxu0 %v8522_v61  ;;  %5300 = vmatpush1.bf16.msra.mxu1 %v8523_v7  ;;  %v4911_v55 = vrot.slane %v4906_v42, %v9259_v12  ;;  %v4919_v4 = vrot.slane %v4906_v42, %v9304_v41  ;;  %v4915_v56 = vrot.slane %v4906_v42, %v9264_v17 }
 0x74c   :  { %5260 = vmatprep.subr.bf16.mxu0 %v8524_v63  ;;  %5301 = vmatprep.subr.bf16.mxu1 %v8526_v1  ;;  %v4923_v47 = vrot.slane %v4906_v42, %v9307_v46 }
 0x74f   :  { %5261 = vmatpush1.bf16.msra.mxu0 %v8528_v13  ;;  %5302 = vmatpush1.bf16.msra.mxu1 %v8529_v14 }
 0x750   :  { %5262 = vmatprep.subr.bf16.mxu0 %v8530_v53  ;;  %5303 = vmatprep.subr.bf16.mxu1 %v8532_v45 }
 0x753   :  { %5263 = vmatpush1.bf16.msra.mxu0 %v8534_v3  ;;  %5304 = vmatpush1.bf16.msra.mxu1 %v8535_v8 }
 0x754   :  { %5264 = vmatprep.subr.bf16.mxu0 %v8536_v51  ;;  %5305 = vmatprep.subr.bf16.mxu1 %v8538_v40 }
 0x757   :  { %5265 = vmatpush2.bf16.msra.mxu0 %v8540_v10  ;;  %5306 = vmatpush2.bf16.msra.mxu1 %v8541_v43 }
 0x758   :  { %5266 = vmatprep.subr.bf16.mxu0 %v8542_v11  ;;  %5307 = vmatprep.subr.bf16.mxu1 %v8544_v48 }
 0x75b   :  { %5267 = vmatpush2.bf16.msra.mxu0 %v8546_v15  ;;  %5308 = vmatpush2.bf16.msra.mxu1 %v8547_v34 }
 0x75c   :  { %5268 = vmatprep.subr.bf16.mxu0 %v8548_v19  ;;  %5309 = vmatprep.subr.bf16.mxu1 %v8550_v52 }
 0x75f   :  { %5269 = vmatpush2.bf16.msra.mxu0 %v8552_v20  ;;  %5310 = vmatpush2.bf16.msra.mxu1 %v8553_v21 }
 0x760   :  { %5270 = vmatprep.subr.bf16.mxu0 %v8554_v22  ;;  %5311 = vmatprep.subr.bf16.mxu1 %v8556_v23 }
 0x763   :  { %5271 = vmatpush2.bf16.msra.mxu0 %v8558_v25  ;;  %5312 = vmatpush2.bf16.msra.mxu1 %v8559_v29 }
 0x764   :  { %5272 = vmatprep.subr.bf16.mxu0 %v8560_v30  ;;  %5313 = vmatprep.subr.bf16.mxu1 %v8562_v32 }
 0x767   :  { %5273 = vmatpush2.bf16.msra.mxu0 %v8564_v28  ;;  %5314 = vmatpush2.bf16.msra.mxu1 %v8565_v2 }
 0x768   :  { %5274 = vmatprep.subr.bf16.mxu0 %v8566_v33  ;;  %5315 = vmatprep.subr.bf16.mxu1 %v8568_v35 }
 0x76b   :  { %5275 = vmatpush2.bf16.msra.mxu0 %v8570_v36  ;;  %5316 = vmatpush2.bf16.msra.mxu1 %v8571_v38 }
 0x76c   :  { %5276 = vmatprep.subr.bf16.mxu0 %v8572_v39  ;;  %5317 = vmatprep.subr.bf16.mxu1 %v8574_v31 }
 0x76f   :  { %5277 = vmatpush2.bf16.msra.mxu0 %v8576_v44  ;;  %5318 = vmatpush2.bf16.msra.mxu1 %v8577_v5 }
 0x770   :  { %5278 = vmatprep.subr.bf16.mxu0 %v8578_v9  ;;  %5319 = vmatprep.subr.bf16.mxu1 %v8580_v49 }
 0x773   :  { %5279 = vmatpush2.bf16.msra.mxu0 %v8582_v50  ;;  %5320 = vmatpush2.bf16.msra.mxu1 %v8583_v16 }
 0x776   :  { %5281 = vmatmul.mubr.bf16.vlgmr.msra.gmra.mxu0 %v4904_v18  ;;  %5322 = vmatmul.mubr.bf16.vlgmr.msra.gmra.mxu1 %v4904_v18 }
 0x836   :  { %v5282_v57 = vpop.f32.mrf.mxu0  ;;  %v5323_v6 = vpop.f32.mrf.mxu1 }
 0x837   :  { %v9398_v58 = vadd.f32 %v5282_v57, %v4911_v55  ;;  %v9400_v24 = vadd.f32 %v5323_v6, %v4919_v4 }
 0x838   :  { %v5284_v27 = vpop.f32.mrf.mxu0  ;;  %v5325_v59 = vpop.f32.mrf.mxu1 }
 0x839   :  { %v5330_v61 = vmax.f32 %v9398_v58, 0.0  ;;  %v5332_v7 = vmax.f32 %v9400_v24, 0.0  ;;  %v5285_v63 = vadd.f32 %v5284_v27, %v4915_v56  ;;  %v5326_v1 = vadd.f32 %v5325_v59, %v4923_v47 }
 0x83a   :  { %v5286_v13 = vpop.f32.mrf.mxu0  ;;  %v5327_v14 = vpop.f32.mrf.mxu1 }
 0x83b   :  { %v5331_v53 = vmax.f32 %v5285_v63, 0.0  ;;  %v5333_v45 = vmax.f32 %v5326_v1, 0.0 }
 0x83c   :  { %v5287_v3 = vpop.f32.mrf.mxu0  ;;  %v5328_v8 = vpop.f32.mrf.mxu1 }
 0x83d   :  { %9090 = dma.done.wait [#allocation7 + $0x4], 28672 }
 0x83e   :  { %9091 = vsyncadd [#allocation7 + $0x4], 4294938624  ;;  %v9404_v51 = vpack.c.bf16 %v5331_v53, %v5331_v53  ;;  %v9406_v40 = vpack.c.bf16 %v5333_v45, %v5333_v45  ;;  %7147 = vst [vmem:[%s9495_s8] sm:$0xff] %v9366_v37  ;;  %v8584_v10 = vld [vmem:[#allocation6 + $0x18c] ss:$28 sps:$4 sm:$0xff]   ;;  %v8590_v15 = vld [vmem:[#allocation6 + $0x154] ss:$28 sps:$4 sm:$0xff]  }
 0x83f   :  { %7148 = vst [vmem:[%s9495_s8 + $0x8] sm:$0xff] %v9368_v62  ;;  %7149 = vst [vmem:[#allocation13] sm:$0xff] %v9366_v37  ;;  %v8586_v43 = vld [vmem:[#allocation6 + $0x188] ss:$28 sps:$4 sm:$0xff]   ;;  %6786 = vmatprep.subr.bf16.mxu0 %v8584_v10  ;;  %v8592_v34 = vld [vmem:[#allocation6 + $0x150] ss:$28 sps:$4 sm:$0xff]  }
 0x840   :  { %6818 = vmatprep.mubr.bf16.mxu0 %v9404_v51  ;;  %6859 = vmatprep.mubr.bf16.mxu1 %v9406_v40  ;;  %v8587_v11 = vld [vmem:[#allocation6 + $0x50c] ss:$28 sps:$4 sm:$0xff]   ;;  %v8593_v19 = vld [vmem:[#allocation6 + $0x4d4] ss:$28 sps:$4 sm:$0xff]   ;;  %v8596_v62 = vld [vmem:[#allocation6 + $0x11c] ss:$28 sps:$4 sm:$0xff]  }
 0x841   :  { %v8589_v48 = vld [vmem:[#allocation6 + $0x508] ss:$28 sps:$4 sm:$0xff]   ;;  %6787 = vmatpush1.bf16.msra.mxu0 %v8586_v43  ;;  %6827 = vmatprep.subr.bf16.mxu1 %v8587_v11  ;;  %v8595_v52 = vld [vmem:[#allocation6 + $0x4d0] ss:$28 sps:$4 sm:$0xff]   ;;  %v8598_v37 = vld [vmem:[#allocation6 + $0x118] ss:$28 sps:$4 sm:$0xff]  }
 0x842   :  { %6828 = vmatpush1.bf16.msra.mxu1 %v8589_v48  ;;  %6788 = vmatprep.subr.bf16.mxu0 %v8590_v15  ;;  %v8599_v20 = vld [vmem:[#allocation6 + $0x49c] ss:$28 sps:$4 sm:$0xff]   ;;  %v8602_v21 = vld [vmem:[#allocation6 + $0xe4] ss:$28 sps:$4 sm:$0xff]   ;;  %v8608_v29 = vld [vmem:[#allocation6 + $0xac] ss:$28 sps:$4 sm:$0xff]  }
 0x843   :  { %6829 = vmatprep.subr.bf16.mxu1 %v8593_v19  ;;  %v8601_v22 = vld [vmem:[#allocation6 + $0x498] ss:$28 sps:$4 sm:$0xff]   ;;  %v8605_v23 = vld [vmem:[#allocation6 + $0x464] ss:$28 sps:$4 sm:$0xff]   ;;  %v8611_v32 = vld [vmem:[#allocation6 + $0x42c] ss:$28 sps:$4 sm:$0xff]  }
 0x844   :  { %v8604_v25 = vld [vmem:[#allocation6 + $0xe0] ss:$28 sps:$4 sm:$0xff]   ;;  %v8610_v28 = vld [vmem:[#allocation6 + $0xa8] ss:$28 sps:$4 sm:$0xff]   ;;  %v8614_v2 = vld [vmem:[#allocation6 + $0x74] ss:$28 sps:$4 sm:$0xff]  }
 0x845   :  { %6789 = vmatpush1.bf16.msra.mxu0 %v8592_v34  ;;  %v8607_v30 = vld [vmem:[#allocation6 + $0x460] ss:$28 sps:$4 sm:$0xff]   ;;  %v8613_v33 = vld [vmem:[#allocation6 + $0x428] ss:$28 sps:$4 sm:$0xff]   ;;  %v8617_v35 = vld [vmem:[#allocation6 + $0x3f4] ss:$28 sps:$4 sm:$0xff]  }
 0x846   :  { %6790 = vmatprep.subr.bf16.mxu0 %v8596_v62  ;;  %6830 = vmatpush1.bf16.msra.mxu1 %v8595_v52  ;;  %v8616_v36 = vld [vmem:[#allocation6 + $0x70] ss:$28 sps:$4 sm:$0xff]   ;;  %v8620_v38 = vld [vmem:[#allocation6 + $0x3c] ss:$28 sps:$4 sm:$0xff]   ;;  %v8626_v5 = vld [vmem:[#allocation6 + $0x4] ss:$28 sps:$4 sm:$0xff]  }
 0x847   :  { %6831 = vmatprep.subr.bf16.mxu1 %v8599_v20  ;;  %v8619_v39 = vld [vmem:[#allocation6 + $0x3f0] ss:$28 sps:$4 sm:$0xff]   ;;  %v8623_v31 = vld [vmem:[#allocation6 + $0x3bc] ss:$28 sps:$4 sm:$0xff]   ;;  %v8629_v49 = vld [vmem:[#allocation6 + $0x384] ss:$28 sps:$4 sm:$0xff]  }
 0x848   :  { %v8622_v44 = vld [vmem:[#allocation6 + $0x38] ss:$28 sps:$4 sm:$0xff]   ;;  %v8628_v50 = vld [vmem:[#allocation6] ss:$28 sps:$4 sm:$0xff]   ;;  %v8632_v16 = vld [vmem:[#allocation6 + $0x34c] ss:$28 sps:$4 sm:$0xff]  }
 0x849   :  { %6791 = vmatpush1.bf16.msra.mxu0 %v8598_v37  ;;  %v8625_v9 = vld [vmem:[#allocation6 + $0x3b8] ss:$28 sps:$4 sm:$0xff]   ;;  %v8631_v18 = vld [vmem:[#allocation6 + $0x380] ss:$28 sps:$4 sm:$0xff]   ;;  %v8635_v42 = vld [vmem:[#allocation6 + $0x6cc] ss:$28 sps:$4 sm:$0xff]  }
 0x84a   :  { %6792 = vmatprep.subr.bf16.mxu0 %v8602_v21  ;;  %6832 = vmatpush1.bf16.msra.mxu1 %v8601_v22  ;;  %v8634_v55 = vld [vmem:[#allocation6 + $0x348] ss:$28 sps:$4 sm:$0xff]   ;;  %v8638_v4 = vld [vmem:[#allocation6 + $0x314] ss:$28 sps:$4 sm:$0xff]   ;;  %v8644_v6 = vld [vmem:[#allocation6 + $0x2dc] ss:$28 sps:$4 sm:$0xff]  }
 0x84b   :  { %6833 = vmatprep.subr.bf16.mxu1 %v8605_v23  ;;  %v8637_v56 = vld [vmem:[#allocation6 + $0x6c8] ss:$28 sps:$4 sm:$0xff]   ;;  %v8641_v47 = vld [vmem:[#allocation6 + $0x694] ss:$28 sps:$4 sm:$0xff]   ;;  %v8647_v59 = vld [vmem:[#allocation6 + $0x65c] ss:$28 sps:$4 sm:$0xff]  }
 0x84c   :  { %v8640_v57 = vld [vmem:[#allocation6 + $0x310] ss:$28 sps:$4 sm:$0xff]   ;;  %v8646_v63 = vld [vmem:[#allocation6 + $0x2d8] ss:$28 sps:$4 sm:$0xff]   ;;  %v8650_v1 = vld [vmem:[#allocation6 + $0x2a4] ss:$28 sps:$4 sm:$0xff]  }
 0x84d   :  { %6793 = vmatpush1.bf16.msra.mxu0 %v8604_v25  ;;  %v8643_v27 = vld [vmem:[#allocation6 + $0x690] ss:$28 sps:$4 sm:$0xff]   ;;  %v8649_v13 = vld [vmem:[#allocation6 + $0x658] ss:$28 sps:$4 sm:$0xff]   ;;  %v8653_v14 = vld [vmem:[#allocation6 + $0x624] ss:$28 sps:$4 sm:$0xff]  }
 0x84e   :  { %6794 = vmatprep.subr.bf16.mxu0 %v8608_v29  ;;  %6834 = vmatpush1.bf16.msra.mxu1 %v8607_v30  ;;  %v8652_v53 = vld [vmem:[#allocation6 + $0x2a0] ss:$28 sps:$4 sm:$0xff]   ;;  %v8656_v45 = vld [vmem:[#allocation6 + $0x26c] ss:$28 sps:$4 sm:$0xff]   ;;  %v8662_v43 = vld [vmem:[#allocation6 + $0x234] ss:$28 sps:$4 sm:$0xff]   ;;  %v9422_v29 = vpack.c.bf16 %v5330_v61, %v5330_v61 }
 0x84f   :  { %6835 = vmatprep.subr.bf16.mxu1 %v8611_v32  ;;  %v8655_v3 = vld [vmem:[#allocation6 + $0x620] ss:$28 sps:$4 sm:$0xff]   ;;  %v8659_v8 = vld [vmem:[#allocation6 + $0x5ec] ss:$28 sps:$4 sm:$0xff]   ;;  %v8665_v48 = vld [vmem:[#allocation6 + $0x5b4] ss:$28 sps:$4 sm:$0xff]  }
 0x850   :  { %v8658_v10 = vld [vmem:[#allocation6 + $0x268] ss:$28 sps:$4 sm:$0xff]   ;;  %v8664_v15 = vld [vmem:[#allocation6 + $0x230] ss:$28 sps:$4 sm:$0xff]   ;;  %v8668_v34 = vld [vmem:[#allocation6 + $0x1fc] ss:$28 sps:$4 sm:$0xff]  }
 0x851   :  { %6795 = vmatpush1.bf16.msra.mxu0 %v8610_v28  ;;  %v8661_v11 = vld [vmem:[#allocation6 + $0x5e8] ss:$28 sps:$4 sm:$0xff]   ;;  %v8667_v19 = vld [vmem:[#allocation6 + $0x5b0] ss:$28 sps:$4 sm:$0xff]   ;;  %v8671_v52 = vld [vmem:[#allocation6 + $0x57c] ss:$28 sps:$4 sm:$0xff]   ;;  %v9427_v28 = vpack.c.bf16 %v5332_v7, %v5332_v7 }
 0x852   :  { %6796 = vmatprep.subr.bf16.mxu0 %v8614_v2  ;;  %6836 = vmatpush1.bf16.msra.mxu1 %v8613_v33  ;;  %v8670_v62 = vld [vmem:[#allocation6 + $0x1f8] ss:$28 sps:$4 sm:$0xff]   ;;  %v8674_v37 = vld [vmem:[#allocation6 + $0x1c4] ss:$28 sps:$4 sm:$0xff]   ;;  %v8680_v32 = vld [vmem:[#allocation6 + $0x190] ss:$28 sps:$4 sm:$0xff]  }
 0x853   :  { %6837 = vmatprep.subr.bf16.mxu1 %v8617_v35  ;;  %v8673_v20 = vld [vmem:[#allocation6 + $0x578] ss:$28 sps:$4 sm:$0xff]   ;;  %v8677_v21 = vld [vmem:[#allocation6 + $0x544] ss:$28 sps:$4 sm:$0xff]   ;;  %v8683_v33 = vld [vmem:[#allocation6 + $0x510] ss:$28 sps:$4 sm:$0xff]  }
 0x854   :  { %v8676_v22 = vld [vmem:[#allocation6 + $0x1c0] ss:$28 sps:$4 sm:$0xff]   ;;  %v8682_v23 = vld [vmem:[#allocation6 + $0x194] ss:$28 sps:$4 sm:$0xff]   ;;  %s9104_s2 = smov [#allocation13]  }
 0x855   :  { %6797 = vmatpush1.bf16.msra.mxu0 %v8616_v36  ;;  %v8679_v25 = vld [vmem:[#allocation6 + $0x540] ss:$28 sps:$4 sm:$0xff]   ;;  %v8685_v30 = vld [vmem:[#allocation6 + $0x514] ss:$28 sps:$4 sm:$0xff]   ;;  %s7158_s22 = sshll.u32 %s9104_s2, 4  ;;  %s7159_s22 = int_to_ptr.vmem [resolvable:$true] %s7158_s22 }
 0x856   :  { %6798 = vmatprep.subr.bf16.mxu0 %v8620_v38  ;;  %6838 = vmatpush1.bf16.msra.mxu1 %v8619_v39  ;;  %v8688_v2 = vld [vmem:[#allocation6 + $0x15c] ss:$28 sps:$4 sm:$0xff]   ;;  %v8694_v61 = vld [vmem:[#allocation6 + $0x124] ss:$28 sps:$4 sm:$0xff]   ;;  %v8700_v38 = vld [vmem:[#allocation6 + $0xec] ss:$28 sps:$4 sm:$0xff]   ;;  %p9063_p8 = scmp.lt.s32.totalorder %s7159_s22, %s7159_s22 }
 0x857   :  { %6839 = vmatprep.subr.bf16.mxu1 %v8623_v31  ;;  %v8691_v35 = vld [vmem:[#allocation6 + $0x4dc] ss:$28 sps:$4 sm:$0xff]   ;;  %v8697_v7 = vld [vmem:[#allocation6 + $0x4a4] ss:$28 sps:$4 sm:$0xff]   ;;  %v8703_v31 = vld [vmem:[#allocation6 + $0x46c] ss:$28 sps:$4 sm:$0xff]  }
 0x858   :  { %v8686_v58 = vld [vmem:[#allocation6 + $0x158] ss:$28 sps:$4 sm:$0xff]   ;;  %v8692_v36 = vld [vmem:[#allocation6 + $0x120] ss:$28 sps:$4 sm:$0xff]   ;;  %s9058_s25 = scalar_lea.vmem %s7159_s22, 128 }
 0x859   :  { %6799 = vmatpush1.bf16.msra.mxu0 %v8622_v44  ;;  %v8689_v24 = vld [vmem:[#allocation6 + $0x4d8] ss:$28 sps:$4 sm:$0xff]   ;;  %v8695_v39 = vld [vmem:[#allocation6 + $0x4a0] ss:$28 sps:$4 sm:$0xff]   ;;  %v8698_v44 = vld [vmem:[#allocation6 + $0xe8] ss:$28 sps:$4 sm:$0xff]   ;;  %p9059_p7 = scmp.ne.s32.totalorder %s7159_s22, %s9058_s25  ;;  %p9064_p9 = scmp.lt.s32.totalorder %s9058_s25, %s9058_s25 }
 0x85a   :  { %6800 = vmatprep.subr.bf16.mxu0 %v8626_v5  ;;  %6840 = vmatpush1.bf16.msra.mxu1 %v8625_v9  ;;  %v8706_v5 = vld [vmem:[#allocation6 + $0xb4] ss:$28 sps:$4 sm:$0xff]   ;;  %v8701_v9 = vld [vmem:[#allocation6 + $0x468] ss:$28 sps:$4 sm:$0xff]  }
 0x85b   :  { %6841 = vmatprep.subr.bf16.mxu1 %v8629_v49  ;;  %v8709_v49 = vld [vmem:[#allocation6 + $0x434] ss:$28 sps:$4 sm:$0xff]   ;;  %p9065_p10 = por %p9064_p9, %p9063_p8 }
 0x85d   :  { %6801 = vmatpush1.bf16.msra.mxu0 %v8628_v50  ;;  %v8704_v50 = vld [vmem:[#allocation6 + $0xb0] ss:$28 sps:$4 sm:$0xff]   ;;  %p9066_p11 = pnand %p9065_p10, %p9059_p7 }
 0x85e   :  { %6802 = vmatprep.subr.bf16.mxu0 %v8632_v16  ;;  %6842 = vmatpush1.bf16.msra.mxu1 %v8631_v18  ;;  %v8712_v16 = vld [vmem:[#allocation6 + $0x7c] ss:$28 sps:$4 sm:$0xff]   ;;  %v8707_v18 = vld [vmem:[#allocation6 + $0x430] ss:$28 sps:$4 sm:$0xff]  }
 0x85f   :  { %6843 = vmatprep.subr.bf16.mxu1 %v8635_v42  ;;  %v8715_v42 = vld [vmem:[#allocation6 + $0x3fc] ss:$28 sps:$4 sm:$0xff]  }
 0x861   :  { %6803 = vmatpush2.bf16.msra.mxu0 %v8634_v55  ;;  %v8710_v55 = vld [vmem:[#allocation6 + $0x78] ss:$28 sps:$4 sm:$0xff]  }
 0x862   :  { %6804 = vmatprep.subr.bf16.mxu0 %v8638_v4  ;;  %6844 = vmatpush2.bf16.msra.mxu1 %v8637_v56  ;;  %v8718_v4 = vld [vmem:[#allocation6 + $0x44] ss:$28 sps:$4 sm:$0xff]   ;;  %v8713_v56 = vld [vmem:[#allocation6 + $0x3f8] ss:$28 sps:$4 sm:$0xff]  }
 0x863   :  { %6845 = vmatprep.subr.bf16.mxu1 %v8641_v47  ;;  %v8721_v47 = vld [vmem:[#allocation6 + $0x3c4] ss:$28 sps:$4 sm:$0xff]  }
 0x865   :  { %6805 = vmatpush2.bf16.msra.mxu0 %v8640_v57  ;;  %v8716_v57 = vld [vmem:[#allocation6 + $0x40] ss:$28 sps:$4 sm:$0xff]  }
 0x866   :  { %6806 = vmatprep.subr.bf16.mxu0 %v8644_v6  ;;  %6846 = vmatpush2.bf16.msra.mxu1 %v8643_v27  ;;  %v8724_v6 = vld [vmem:[#allocation6 + $0xc] ss:$28 sps:$4 sm:$0xff]   ;;  %v8719_v27 = vld [vmem:[#allocation6 + $0x3c0] ss:$28 sps:$4 sm:$0xff]  }
 0x867   :  { %6847 = vmatprep.subr.bf16.mxu1 %v8647_v59  ;;  %v8727_v59 = vld [vmem:[#allocation6 + $0x38c] ss:$28 sps:$4 sm:$0xff]  }
 0x869   :  { %6807 = vmatpush2.bf16.msra.mxu0 %v8646_v63  ;;  %v8722_v63 = vld [vmem:[#allocation6 + $0x8] ss:$28 sps:$4 sm:$0xff]  }
 0x86a   :  { %6808 = vmatprep.subr.bf16.mxu0 %v8650_v1  ;;  %6848 = vmatpush2.bf16.msra.mxu1 %v8649_v13  ;;  %v8730_v1 = vld [vmem:[#allocation6 + $0x354] ss:$28 sps:$4 sm:$0xff]   ;;  %v8725_v13 = vld [vmem:[#allocation6 + $0x388] ss:$28 sps:$4 sm:$0xff]  }
 0x86b   :  { %6849 = vmatprep.subr.bf16.mxu1 %v8653_v14  ;;  %v8733_v14 = vld [vmem:[#allocation6 + $0x6d4] ss:$28 sps:$4 sm:$0xff]  }
 0x86d   :  { %6809 = vmatpush2.bf16.msra.mxu0 %v8652_v53  ;;  %v8728_v53 = vld [vmem:[#allocation6 + $0x350] ss:$28 sps:$4 sm:$0xff]  }
 0x86e   :  { %6810 = vmatprep.subr.bf16.mxu0 %v8656_v45  ;;  %6850 = vmatpush2.bf16.msra.mxu1 %v8655_v3  ;;  %v8736_v45 = vld [vmem:[#allocation6 + $0x31c] ss:$28 sps:$4 sm:$0xff]   ;;  %v8731_v3 = vld [vmem:[#allocation6 + $0x6d0] ss:$28 sps:$4 sm:$0xff]  }
 0x86f   :  { %6851 = vmatprep.subr.bf16.mxu1 %v8659_v8  ;;  %v8739_v8 = vld [vmem:[#allocation6 + $0x69c] ss:$28 sps:$4 sm:$0xff]  }
 0x871   :  { %6811 = vmatpush2.bf16.msra.mxu0 %v8658_v10  ;;  %v8734_v10 = vld [vmem:[#allocation6 + $0x318] ss:$28 sps:$4 sm:$0xff]  }
 0x872   :  { %6812 = vmatprep.subr.bf16.mxu0 %v8662_v43  ;;  %6852 = vmatpush2.bf16.msra.mxu1 %v8661_v11  ;;  %v8742_v43 = vld [vmem:[#allocation6 + $0x2e4] ss:$28 sps:$4 sm:$0xff]   ;;  %v8737_v11 = vld [vmem:[#allocation6 + $0x698] ss:$28 sps:$4 sm:$0xff]  }
 0x873   :  { %6853 = vmatprep.subr.bf16.mxu1 %v8665_v48  ;;  %v8745_v48 = vld [vmem:[#allocation6 + $0x664] ss:$28 sps:$4 sm:$0xff]  }
 0x875   :  { %6813 = vmatpush2.bf16.msra.mxu0 %v8664_v15  ;;  %v8740_v15 = vld [vmem:[#allocation6 + $0x2e0] ss:$28 sps:$4 sm:$0xff]  }
 0x876   :  { %6814 = vmatprep.subr.bf16.mxu0 %v8668_v34  ;;  %6854 = vmatpush2.bf16.msra.mxu1 %v8667_v19  ;;  %v8748_v34 = vld [vmem:[#allocation6 + $0x2ac] ss:$28 sps:$4 sm:$0xff]   ;;  %v8743_v19 = vld [vmem:[#allocation6 + $0x660] ss:$28 sps:$4 sm:$0xff]  }
 0x877   :  { %6855 = vmatprep.subr.bf16.mxu1 %v8671_v52  ;;  %v8751_v52 = vld [vmem:[#allocation6 + $0x62c] ss:$28 sps:$4 sm:$0xff]  }
 0x879   :  { %6815 = vmatpush2.bf16.msra.mxu0 %v8670_v62  ;;  %v8746_v62 = vld [vmem:[#allocation6 + $0x2a8] ss:$28 sps:$4 sm:$0xff]  }
 0x87a   :  { %6816 = vmatprep.subr.bf16.mxu0 %v8674_v37  ;;  %6856 = vmatpush2.bf16.msra.mxu1 %v8673_v20  ;;  %v8754_v37 = vld [vmem:[#allocation6 + $0x274] ss:$28 sps:$4 sm:$0xff]   ;;  %v8749_v20 = vld [vmem:[#allocation6 + $0x628] ss:$28 sps:$4 sm:$0xff]  }
 0x87b   :  { %6857 = vmatprep.subr.bf16.mxu1 %v8677_v21  ;;  %v8757_v21 = vld [vmem:[#allocation6 + $0x5f4] ss:$28 sps:$4 sm:$0xff]  }
 0x87d   :  { %6817 = vmatpush2.bf16.msra.mxu0 %v8676_v22  ;;  %v8752_v22 = vld [vmem:[#allocation6 + $0x270] ss:$28 sps:$4 sm:$0xff]  }
 0x87e   :  { %6868 = vmatprep.subr.bf16.mxu0 %v8682_v23  ;;  %6858 = vmatpush2.bf16.msra.mxu1 %v8679_v25  ;;  %v8760_v23 = vld [vmem:[#allocation6 + $0x23c] ss:$28 sps:$4 sm:$0xff]   ;;  %v8755_v25 = vld [vmem:[#allocation6 + $0x5f0] ss:$28 sps:$4 sm:$0xff]  }
 0x87f   :  { %6909 = vmatprep.subr.bf16.mxu1 %v8685_v30  ;;  %v8763_v30 = vld [vmem:[#allocation6 + $0x5bc] ss:$28 sps:$4 sm:$0xff]  }
 0x880   :  { %6819 = vmatmul.mubr.bf16.vlgmr.msra.gmra.mxu0 %v9422_v29 }
 0x881   :  { %6869 = vmatpush1.bf16.msra.mxu0 %v8680_v32  ;;  %6900 = vmatprep.mubr.bf16.mxu0 %v9404_v51  ;;  %v8758_v32 = vld [vmem:[#allocation6 + $0x238] ss:$28 sps:$4 sm:$0xff]  }
 0x882   :  { %6860 = vmatmul.mubr.bf16.vlgmr.msra.gmra.mxu1 %v9427_v28  ;;  %6870 = vmatprep.subr.bf16.mxu0 %v8688_v2  ;;  %v8766_v2 = vld [vmem:[#allocation6 + $0x204] ss:$28 sps:$4 sm:$0xff]  }
 0x883   :  { %6910 = vmatpush1.bf16.msra.mxu1 %v8683_v33  ;;  %6941 = vmatprep.mubr.bf16.mxu1 %v9406_v40  ;;  %v8761_v33 = vld [vmem:[#allocation6 + $0x5b8] ss:$28 sps:$4 sm:$0xff]  }
 0x884   :  { %6911 = vmatprep.subr.bf16.mxu1 %v8691_v35  ;;  %v8769_v35 = vld [vmem:[#allocation6 + $0x584] ss:$28 sps:$4 sm:$0xff]  }
 0x885   :  { %6871 = vmatpush1.bf16.msra.mxu0 %v8686_v58  ;;  %v8764_v58 = vld [vmem:[#allocation6 + $0x200] ss:$28 sps:$4 sm:$0xff]  }
 0x886   :  { %6872 = vmatprep.subr.bf16.mxu0 %v8694_v61  ;;  %v8772_v61 = vld [vmem:[#allocation6 + $0x1cc] ss:$28 sps:$4 sm:$0xff]  }
 0x887   :  { %6912 = vmatpush1.bf16.msra.mxu1 %v8689_v24  ;;  %v8767_v24 = vld [vmem:[#allocation6 + $0x580] ss:$28 sps:$4 sm:$0xff]  }
 0x888   :  { %6913 = vmatprep.subr.bf16.mxu1 %v8697_v7  ;;  %v8775_v7 = vld [vmem:[#allocation6 + $0x54c] ss:$28 sps:$4 sm:$0xff]  }
 0x889   :  { %6873 = vmatpush1.bf16.msra.mxu0 %v8692_v36  ;;  %v8770_v36 = vld [vmem:[#allocation6 + $0x1c8] ss:$28 sps:$4 sm:$0xff]  }
 0x88a   :  { %6874 = vmatprep.subr.bf16.mxu0 %v8700_v38  ;;  %v8778_v38 = vld [vmem:[#allocation6 + $0x19c] ss:$28 sps:$4 sm:$0xff]  }
 0x88b   :  { %6914 = vmatpush1.bf16.msra.mxu1 %v8695_v39  ;;  %v8773_v39 = vld [vmem:[#allocation6 + $0x548] ss:$28 sps:$4 sm:$0xff]  }
 0x88c   :  { %6915 = vmatprep.subr.bf16.mxu1 %v8703_v31  ;;  %v8781_v31 = vld [vmem:[#allocation6 + $0x51c] ss:$28 sps:$4 sm:$0xff]  }
 0x88d   :  { %6875 = vmatpush1.bf16.msra.mxu0 %v8698_v44  ;;  %v8776_v44 = vld [vmem:[#allocation6 + $0x198] ss:$28 sps:$4 sm:$0xff]  }
 0x88e   :  { %6876 = vmatprep.subr.bf16.mxu0 %v8706_v5  ;;  %v8784_v5 = vld [vmem:[#allocation6 + $0x164] ss:$28 sps:$4 sm:$0xff]  }
 0x88f   :  { %6916 = vmatpush1.bf16.msra.mxu1 %v8701_v9  ;;  %v8779_v9 = vld [vmem:[#allocation6 + $0x518] ss:$28 sps:$4 sm:$0xff]  }
 0x890   :  { %6917 = vmatprep.subr.bf16.mxu1 %v8709_v49  ;;  %v8787_v49 = vld [vmem:[#allocation6 + $0x4e4] ss:$28 sps:$4 sm:$0xff]  }
 0x891   :  { %6877 = vmatpush1.bf16.msra.mxu0 %v8704_v50  ;;  %v8782_v50 = vld [vmem:[#allocation6 + $0x160] ss:$28 sps:$4 sm:$0xff]  }
 0x892   :  { %6878 = vmatprep.subr.bf16.mxu0 %v8712_v16  ;;  %v8790_v16 = vld [vmem:[#allocation6 + $0x12c] ss:$28 sps:$4 sm:$0xff]  }
 0x893   :  { %6918 = vmatpush1.bf16.msra.mxu1 %v8707_v18  ;;  %v8785_v18 = vld [vmem:[#allocation6 + $0x4e0] ss:$28 sps:$4 sm:$0xff]  }
 0x894   :  { %6919 = vmatprep.subr.bf16.mxu1 %v8715_v42  ;;  %v8793_v42 = vld [vmem:[#allocation6 + $0x4ac] ss:$28 sps:$4 sm:$0xff]  }
 0x895   :  { %6879 = vmatpush1.bf16.msra.mxu0 %v8710_v55  ;;  %v8788_v55 = vld [vmem:[#allocation6 + $0x128] ss:$28 sps:$4 sm:$0xff]  }
 0x896   :  { %6880 = vmatprep.subr.bf16.mxu0 %v8718_v4  ;;  %v8796_v4 = vld [vmem:[#allocation6 + $0xf4] ss:$28 sps:$4 sm:$0xff]  }
 0x897   :  { %6920 = vmatpush1.bf16.msra.mxu1 %v8713_v56  ;;  %v8791_v56 = vld [vmem:[#allocation6 + $0x4a8] ss:$28 sps:$4 sm:$0xff]  }
 0x898   :  { %6921 = vmatprep.subr.bf16.mxu1 %v8721_v47  ;;  %v8799_v47 = vld [vmem:[#allocation6 + $0x474] ss:$28 sps:$4 sm:$0xff]  }
 0x899   :  { %6881 = vmatpush1.bf16.msra.mxu0 %v8716_v57  ;;  %v8794_v57 = vld [vmem:[#allocation6 + $0xf0] ss:$28 sps:$4 sm:$0xff]  }
 0x89a   :  { %6882 = vmatprep.subr.bf16.mxu0 %v8724_v6  ;;  %v8802_v6 = vld [vmem:[#allocation6 + $0xbc] ss:$28 sps:$4 sm:$0xff]  }
 0x89b   :  { %6922 = vmatpush1.bf16.msra.mxu1 %v8719_v27  ;;  %v8797_v27 = vld [vmem:[#allocation6 + $0x470] ss:$28 sps:$4 sm:$0xff]  }
 0x89c   :  { %6923 = vmatprep.subr.bf16.mxu1 %v8727_v59  ;;  %v8805_v59 = vld [vmem:[#allocation6 + $0x43c] ss:$28 sps:$4 sm:$0xff]  }
 0x89d   :  { %6883 = vmatpush1.bf16.msra.mxu0 %v8722_v63  ;;  %v8800_v63 = vld [vmem:[#allocation6 + $0xb8] ss:$28 sps:$4 sm:$0xff]  }
 0x89e   :  { %6884 = vmatprep.subr.bf16.mxu0 %v8730_v1  ;;  %v8808_v1 = vld [vmem:[#allocation6 + $0x84] ss:$28 sps:$4 sm:$0xff]  }
 0x89f   :  { %6924 = vmatpush1.bf16.msra.mxu1 %v8725_v13  ;;  %v8803_v13 = vld [vmem:[#allocation6 + $0x438] ss:$28 sps:$4 sm:$0xff]  }
 0x8a0   :  { %6925 = vmatprep.subr.bf16.mxu1 %v8733_v14  ;;  %v8811_v14 = vld [vmem:[#allocation6 + $0x404] ss:$28 sps:$4 sm:$0xff]  }
 0x8a1   :  { %6885 = vmatpush2.bf16.msra.mxu0 %v8728_v53  ;;  %v8806_v53 = vld [vmem:[#allocation6 + $0x80] ss:$28 sps:$4 sm:$0xff]  }
 0x8a2   :  { %6886 = vmatprep.subr.bf16.mxu0 %v8736_v45  ;;  %v8814_v45 = vld [vmem:[#allocation6 + $0x4c] ss:$28 sps:$4 sm:$0xff]  }
 0x8a3   :  { %6926 = vmatpush2.bf16.msra.mxu1 %v8731_v3  ;;  %v8809_v3 = vld [vmem:[#allocation6 + $0x400] ss:$28 sps:$4 sm:$0xff]  }
 0x8a4   :  { %6927 = vmatprep.subr.bf16.mxu1 %v8739_v8  ;;  %v8817_v8 = vld [vmem:[#allocation6 + $0x3cc] ss:$28 sps:$4 sm:$0xff]  }
 0x8a5   :  { %6887 = vmatpush2.bf16.msra.mxu0 %v8734_v10  ;;  %v8812_v10 = vld [vmem:[#allocation6 + $0x48] ss:$28 sps:$4 sm:$0xff]  }
 0x8a6   :  { %6888 = vmatprep.subr.bf16.mxu0 %v8742_v43  ;;  %v8820_v43 = vld [vmem:[#allocation6 + $0x14] ss:$28 sps:$4 sm:$0xff]  }
 0x8a7   :  { %6928 = vmatpush2.bf16.msra.mxu1 %v8737_v11  ;;  %v8815_v11 = vld [vmem:[#allocation6 + $0x3c8] ss:$28 sps:$4 sm:$0xff]  }
 0x8a8   :  { %6929 = vmatprep.subr.bf16.mxu1 %v8745_v48  ;;  %v8823_v48 = vld [vmem:[#allocation6 + $0x394] ss:$28 sps:$4 sm:$0xff]  }
 0x8a9   :  { %6889 = vmatpush2.bf16.msra.mxu0 %v8740_v15  ;;  %v8818_v15 = vld [vmem:[#allocation6 + $0x10] ss:$28 sps:$4 sm:$0xff]  }
 0x8aa   :  { %6890 = vmatprep.subr.bf16.mxu0 %v8748_v34  ;;  %v8826_v34 = vld [vmem:[#allocation6 + $0x35c] ss:$28 sps:$4 sm:$0xff]  }
 0x8ab   :  { %6930 = vmatpush2.bf16.msra.mxu1 %v8743_v19  ;;  %v8821_v19 = vld [vmem:[#allocation6 + $0x390] ss:$28 sps:$4 sm:$0xff]  }
 0x8ac   :  { %6931 = vmatprep.subr.bf16.mxu1 %v8751_v52  ;;  %v8829_v52 = vld [vmem:[#allocation6 + $0x6dc] ss:$28 sps:$4 sm:$0xff]  }
 0x8ad   :  { %6891 = vmatpush2.bf16.msra.mxu0 %v8746_v62  ;;  %v8824_v62 = vld [vmem:[#allocation6 + $0x358] ss:$28 sps:$4 sm:$0xff]  }
 0x8ae   :  { %6892 = vmatprep.subr.bf16.mxu0 %v8754_v37  ;;  %v8832_v37 = vld [vmem:[#allocation6 + $0x324] ss:$28 sps:$4 sm:$0xff]  }
 0x8af   :  { %6932 = vmatpush2.bf16.msra.mxu1 %v8749_v20  ;;  %v8827_v20 = vld [vmem:[#allocation6 + $0x6d8] ss:$28 sps:$4 sm:$0xff]  }
 0x8b0   :  { %6933 = vmatprep.subr.bf16.mxu1 %v8757_v21  ;;  %v8835_v21 = vld [vmem:[#allocation6 + $0x6a4] ss:$28 sps:$4 sm:$0xff]  }
 0x8b1   :  { %6893 = vmatpush2.bf16.msra.mxu0 %v8752_v22  ;;  %v8830_v22 = vld [vmem:[#allocation6 + $0x320] ss:$28 sps:$4 sm:$0xff]  }
 0x8b2   :  { %6894 = vmatprep.subr.bf16.mxu0 %v8760_v23  ;;  %v8838_v23 = vld [vmem:[#allocation6 + $0x2ec] ss:$28 sps:$4 sm:$0xff]  }
 0x8b3   :  { %6934 = vmatpush2.bf16.msra.mxu1 %v8755_v25  ;;  %v8833_v25 = vld [vmem:[#allocation6 + $0x6a0] ss:$28 sps:$4 sm:$0xff]  }
 0x8b4   :  { %6935 = vmatprep.subr.bf16.mxu1 %v8763_v30  ;;  %v8841_v30 = vld [vmem:[#allocation6 + $0x66c] ss:$28 sps:$4 sm:$0xff]  }
 0x8b5   :  { %6895 = vmatpush2.bf16.msra.mxu0 %v8758_v32  ;;  %v8836_v32 = vld [vmem:[#allocation6 + $0x2e8] ss:$28 sps:$4 sm:$0xff]  }
 0x8b6   :  { %6896 = vmatprep.subr.bf16.mxu0 %v8766_v2  ;;  %v8844_v2 = vld [vmem:[#allocation6 + $0x2b4] ss:$28 sps:$4 sm:$0xff]  }
 0x8b7   :  { %6936 = vmatpush2.bf16.msra.mxu1 %v8761_v33  ;;  %v8839_v33 = vld [vmem:[#allocation6 + $0x668] ss:$28 sps:$4 sm:$0xff]  }
 0x8b8   :  { %6937 = vmatprep.subr.bf16.mxu1 %v8769_v35  ;;  %v8847_v35 = vld [vmem:[#allocation6 + $0x634] ss:$28 sps:$4 sm:$0xff]  }
 0x8b9   :  { %6897 = vmatpush2.bf16.msra.mxu0 %v8764_v58  ;;  %v8842_v58 = vld [vmem:[#allocation6 + $0x2b0] ss:$28 sps:$4 sm:$0xff]  }
 0x8ba   :  { %6898 = vmatprep.subr.bf16.mxu0 %v8772_v61  ;;  %v8850_v61 = vld [vmem:[#allocation6 + $0x27c] ss:$28 sps:$4 sm:$0xff]  }
 0x8bb   :  { %6938 = vmatpush2.bf16.msra.mxu1 %v8767_v24  ;;  %v8845_v24 = vld [vmem:[#allocation6 + $0x630] ss:$28 sps:$4 sm:$0xff]  }
 0x8bc   :  { %6939 = vmatprep.subr.bf16.mxu1 %v8775_v7  ;;  %v8853_v7 = vld [vmem:[#allocation6 + $0x5fc] ss:$28 sps:$4 sm:$0xff]  }
 0x8bd   :  { %6899 = vmatpush2.bf16.msra.mxu0 %v8770_v36  ;;  %v8848_v36 = vld [vmem:[#allocation6 + $0x278] ss:$28 sps:$4 sm:$0xff]  }
 0x8be   :  { %6950 = vmatprep.subr.bf16.mxu0 %v8778_v38  ;;  %v8856_v38 = vld [vmem:[#allocation6 + $0x244] ss:$28 sps:$4 sm:$0xff]  }
 0x8bf   :  { %6940 = vmatpush2.bf16.msra.mxu1 %v8773_v39  ;;  %v8851_v39 = vld [vmem:[#allocation6 + $0x5f8] ss:$28 sps:$4 sm:$0xff]  }
 0x8c0   :  { %6901 = vmatmul.mubr.bf16.vlgmr.msra.gmra.mxu0 %v9422_v29  ;;  %6991 = vmatprep.subr.bf16.mxu1 %v8781_v31  ;;  %v8859_v31 = vld [vmem:[#allocation6 + $0x5c4] ss:$28 sps:$4 sm:$0xff]  }
 0x8c1   :  { %6951 = vmatpush1.bf16.msra.mxu0 %v8776_v44  ;;  %6982 = vmatprep.mubr.bf16.mxu0 %v9404_v51  ;;  %v8854_v44 = vld [vmem:[#allocation6 + $0x240] ss:$28 sps:$4 sm:$0xff]  }
 0x8c2   :  { %6942 = vmatmul.mubr.bf16.vlgmr.msra.gmra.mxu1 %v9427_v28  ;;  %6952 = vmatprep.subr.bf16.mxu0 %v8784_v5  ;;  %v8862_v5 = vld [vmem:[#allocation6 + $0x20c] ss:$28 sps:$4 sm:$0xff]  }
 0x8c3   :  { %6992 = vmatpush1.bf16.msra.mxu1 %v8779_v9  ;;  %7023 = vmatprep.mubr.bf16.mxu1 %v9406_v40  ;;  %v8857_v9 = vld [vmem:[#allocation6 + $0x5c0] ss:$28 sps:$4 sm:$0xff]  }
 0x8c4   :  { %6993 = vmatprep.subr.bf16.mxu1 %v8787_v49  ;;  %v8865_v49 = vld [vmem:[#allocation6 + $0x58c] ss:$28 sps:$4 sm:$0xff]  }
 0x8c5   :  { %6953 = vmatpush1.bf16.msra.mxu0 %v8782_v50  ;;  %v8860_v50 = vld [vmem:[#allocation6 + $0x208] ss:$28 sps:$4 sm:$0xff]  }
 0x8c6   :  { %6954 = vmatprep.subr.bf16.mxu0 %v8790_v16  ;;  %v8868_v16 = vld [vmem:[#allocation6 + $0x1d4] ss:$28 sps:$4 sm:$0xff]  }
 0x8c7   :  { %6994 = vmatpush1.bf16.msra.mxu1 %v8785_v18  ;;  %v8863_v18 = vld [vmem:[#allocation6 + $0x588] ss:$28 sps:$4 sm:$0xff]  }
 0x8c8   :  { %6995 = vmatprep.subr.bf16.mxu1 %v8793_v42  ;;  %v8871_v42 = vld [vmem:[#allocation6 + $0x554] ss:$28 sps:$4 sm:$0xff]  }
 0x8c9   :  { %6955 = vmatpush1.bf16.msra.mxu0 %v8788_v55  ;;  %v8866_v55 = vld [vmem:[#allocation6 + $0x1d0] ss:$28 sps:$4 sm:$0xff]  }
 0x8ca   :  { %6956 = vmatprep.subr.bf16.mxu0 %v8796_v4  ;;  %v8872_v4 = vld [vmem:[#allocation6 + $0x360] ss:$28 sps:$4 sm:$0xff]  }
 0x8cb   :  { %6996 = vmatpush1.bf16.msra.mxu1 %v8791_v56  ;;  %v8869_v56 = vld [vmem:[#allocation6 + $0x550] ss:$28 sps:$4 sm:$0xff]  }
 0x8cc   :  { %6997 = vmatprep.subr.bf16.mxu1 %v8799_v47  ;;  %v8873_v47 = vld [vmem:[#allocation6 + $0x1a0] ss:$28 sps:$4 sm:$0xff]  }
 0x8cd   :  { %6957 = vmatpush1.bf16.msra.mxu0 %v8794_v57  ;;  %v8874_v57 = vld [vmem:[#allocation6 + $0x328] ss:$28 sps:$4 sm:$0xff]  }
 0x8ce   :  { %6958 = vmatprep.subr.bf16.mxu0 %v8802_v6  ;;  %v8875_v6 = vld [vmem:[#allocation6 + $0x168] ss:$28 sps:$4 sm:$0xff]  }
 0x8cf   :  { %6998 = vmatpush1.bf16.msra.mxu1 %v8797_v27  ;;  %v8876_v27 = vld [vmem:[#allocation6 + $0x2f0] ss:$28 sps:$4 sm:$0xff]  }
 0x8d0   :  { %6999 = vmatprep.subr.bf16.mxu1 %v8805_v59  ;;  %v8877_v59 = vld [vmem:[#allocation6 + $0x130] ss:$28 sps:$4 sm:$0xff]  }
 0x8d1   :  { %6959 = vmatpush1.bf16.msra.mxu0 %v8800_v63  ;;  %v8878_v63 = vld [vmem:[#allocation6 + $0x2b8] ss:$28 sps:$4 sm:$0xff]  }
 0x8d2   :  { %6960 = vmatprep.subr.bf16.mxu0 %v8808_v1  ;;  %v8879_v1 = vld [vmem:[#allocation6 + $0xf8] ss:$28 sps:$4 sm:$0xff]  }
 0x8d3   :  { %7000 = vmatpush1.bf16.msra.mxu1 %v8803_v13  ;;  %v8880_v13 = vld [vmem:[#allocation6 + $0x280] ss:$28 sps:$4 sm:$0xff]  }
 0x8d4   :  { %7001 = vmatprep.subr.bf16.mxu1 %v8811_v14  ;;  %v8881_v14 = vld [vmem:[#allocation6 + $0xc0] ss:$28 sps:$4 sm:$0xff]  }
 0x8d5   :  { %6961 = vmatpush1.bf16.msra.mxu0 %v8806_v53  ;;  %v8882_v53 = vld [vmem:[#allocation6 + $0x248] ss:$28 sps:$4 sm:$0xff]  }
 0x8d6   :  { %6962 = vmatprep.subr.bf16.mxu0 %v8814_v45  ;;  %v8883_v45 = vld [vmem:[#allocation6 + $0x88] ss:$28 sps:$4 sm:$0xff]  }
 0x8d7   :  { %7002 = vmatpush1.bf16.msra.mxu1 %v8809_v3  ;;  %v8885_v3 = vld [vmem:[#allocation6 + $0x50] ss:$28 sps:$4 sm:$0xff]  }
 0x8d8   :  { %7003 = vmatprep.subr.bf16.mxu1 %v8817_v8  ;;  %v8886_v8 = vld [vmem:[#allocation6 + $0x1d8] ss:$28 sps:$4 sm:$0xff]  }
 0x8d9   :  { %6963 = vmatpush1.bf16.msra.mxu0 %v8812_v10  ;;  %v8887_v10 = vld [vmem:[#allocation6 + $0x18] ss:$28 sps:$4 sm:$0xff]  }
 0x8da   :  { %6964 = vmatprep.subr.bf16.mxu0 %v8820_v43  ;;  %v8888_v43 = vld [vmem:[#allocation6 + $0x6e0] ss:$28 sps:$4 sm:$0xff]  }
 0x8db   :  { %7004 = vmatpush1.bf16.msra.mxu1 %v8815_v11  ;;  %v8889_v11 = vld [vmem:[#allocation6 + $0x520] ss:$28 sps:$4 sm:$0xff]  }
 0x8dc   :  { %7005 = vmatprep.subr.bf16.mxu1 %v8823_v48  ;;  %v8890_v48 = vld [vmem:[#allocation6 + $0x6a8] ss:$28 sps:$4 sm:$0xff]  }
 0x8dd   :  { %6965 = vmatpush1.bf16.msra.mxu0 %v8818_v15  ;;  %v8891_v15 = vld [vmem:[#allocation6 + $0x4e8] ss:$28 sps:$4 sm:$0xff]  }
 0x8de   :  { %6966 = vmatprep.subr.bf16.mxu0 %v8826_v34  ;;  %v8892_v34 = vld [vmem:[#allocation6 + $0x670] ss:$28 sps:$4 sm:$0xff]  }
 0x8df   :  { %7006 = vmatpush1.bf16.msra.mxu1 %v8821_v19  ;;  %v8893_v19 = vld [vmem:[#allocation6 + $0x4b0] ss:$28 sps:$4 sm:$0xff]  }
 0x8e0   :  { %7007 = vmatprep.subr.bf16.mxu1 %v8829_v52  ;;  %v8894_v52 = vld [vmem:[#allocation6 + $0x638] ss:$28 sps:$4 sm:$0xff]  }
 0x8e1   :  { %6967 = vmatpush2.bf16.msra.mxu0 %v8824_v62  ;;  %v8895_v62 = vld [vmem:[#allocation6 + $0x478] ss:$28 sps:$4 sm:$0xff]  }
 0x8e2   :  { %6968 = vmatprep.subr.bf16.mxu0 %v8832_v37  ;;  %v8896_v37 = vld [vmem:[#allocation6 + $0x600] ss:$28 sps:$4 sm:$0xff]  }
 0x8e3   :  { %7008 = vmatpush2.bf16.msra.mxu1 %v8827_v20  ;;  %v8897_v20 = vld [vmem:[#allocation6 + $0x440] ss:$28 sps:$4 sm:$0xff]  }
 0x8e4   :  { %7009 = vmatprep.subr.bf16.mxu1 %v8835_v21  ;;  %v8898_v21 = vld [vmem:[#allocation6 + $0x5c8] ss:$28 sps:$4 sm:$0xff]  }
 0x8e5   :  { %6969 = vmatpush2.bf16.msra.mxu0 %v8830_v22  ;;  %v8900_v22 = vld [vmem:[#allocation6 + $0x590] ss:$28 sps:$4 sm:$0xff]  }
 0x8e6   :  { %6970 = vmatprep.subr.bf16.mxu0 %v8838_v23  ;;  %v8902_v23 = vld [vmem:[#allocation6 + $0x558] ss:$28 sps:$4 sm:$0xff]  }
 0x8e7   :  { %7010 = vmatpush2.bf16.msra.mxu1 %v8833_v25  ;;  %v8903_v25 = vld [vmem:[#allocation6 + $0x398] ss:$28 sps:$4 sm:$0xff]  }
 0x8e8   :  { %7011 = vmatprep.subr.bf16.mxu1 %v8841_v30  ;;  %v9442_v30 = vld [vmem:[#allocation11 + $0x15] sm:$0x7f] }
 0x8e9   :  { %6971 = vmatpush2.bf16.msra.mxu0 %v8836_v32  ;;  %v5602_v32 = vrot.slane %v9442_v30, %v9259_v12 }
 0x8ea   :  { %6972 = vmatprep.subr.bf16.mxu0 %v8844_v2  ;;  %v5606_v2 = vrot.slane %v9442_v30, %v9264_v17 }
 0x8eb   :  { %7012 = vmatpush2.bf16.msra.mxu1 %v8839_v33 }
 0x8ec   :  { %7013 = vmatprep.subr.bf16.mxu1 %v8847_v35 }
 0x8ed   :  { %6973 = vmatpush2.bf16.msra.mxu0 %v8842_v58 }
 0x8ee   :  { %6974 = vmatprep.subr.bf16.mxu0 %v8850_v61 }
 0x8ef   :  { %7014 = vmatpush2.bf16.msra.mxu1 %v8845_v24 }
 0x8f0   :  { %7015 = vmatprep.subr.bf16.mxu1 %v8853_v7 }
 0x8f1   :  { %6975 = vmatpush2.bf16.msra.mxu0 %v8848_v36 }
 0x8f2   :  { %6976 = vmatprep.subr.bf16.mxu0 %v8856_v38 }
 0x8f3   :  { %7016 = vmatpush2.bf16.msra.mxu1 %v8851_v39 }
 0x8f4   :  { %7017 = vmatprep.subr.bf16.mxu1 %v8859_v31 }
 0x8f5   :  { %6977 = vmatpush2.bf16.msra.mxu0 %v8854_v44 }
 0x8f6   :  { %6978 = vmatprep.subr.bf16.mxu0 %v8862_v5 }
 0x8f7   :  { %7018 = vmatpush2.bf16.msra.mxu1 %v8857_v9 }
 0x8f8   :  { %7019 = vmatprep.subr.bf16.mxu1 %v8865_v49 }
 0x8f9   :  { %6979 = vmatpush2.bf16.msra.mxu0 %v8860_v50 }
 0x8fa   :  { %6980 = vmatprep.subr.bf16.mxu0 %v8868_v16 }
 0x8fb   :  { %7020 = vmatpush2.bf16.msra.mxu1 %v8863_v18 }
 0x8fc   :  { %7021 = vmatprep.subr.bf16.mxu1 %v8871_v42  ;;  %v5610_v42 = vrot.slane %v9442_v30, %v9304_v41 }
 0x8fd   :  { %6981 = vmatpush2.bf16.msra.mxu0 %v8866_v55  ;;  %v5614_v55 = vrot.slane %v9442_v30, %v9307_v46 }
 0x8fe   :  { %8128 = vmatprep.subr.bf16.mxu0 %v8872_v4 }
 0x8ff   :  { %7022 = vmatpush2.bf16.msra.mxu1 %v8869_v56 }
 0x900   :  { %6983 = vmatmul.mubr.bf16.vlgmr.msra.gmra.mxu0 %v9422_v29 }
 0x901   :  { %8129 = vmatpush3.bf16.msra.mxu0 %v8873_v47  ;;  %7064 = vmatprep.mubr.bf16.mxu0 %v9404_v51  ;;  %v8884_v51 = vld [vmem:[#allocation6 + $0x210] ss:$28 sps:$4 sm:$0xff]  }
 0x902   :  { %7024 = vmatmul.mubr.bf16.vlgmr.msra.gmra.mxu1 %v9427_v28  ;;  %8130 = vmatprep.subr.bf16.mxu0 %v8874_v57 }
 0x905   :  { %8131 = vmatpush3.bf16.msra.mxu0 %v8875_v6 }
 0x906   :  { %8132 = vmatprep.subr.bf16.mxu0 %v8876_v27 }
 0x909   :  { %8133 = vmatpush3.bf16.msra.mxu0 %v8877_v59 }
 0x90a   :  { %8134 = vmatprep.subr.bf16.mxu0 %v8878_v63 }
 0x90d   :  { %8135 = vmatpush3.bf16.msra.mxu0 %v8879_v1 }
 0x90e   :  { %8136 = vmatprep.subr.bf16.mxu0 %v8880_v13 }
 0x911   :  { %8137 = vmatpush3.bf16.msra.mxu0 %v8881_v14 }
 0x912   :  { %8138 = vmatprep.subr.bf16.mxu0 %v8882_v53 }
 0x915   :  { %8139 = vmatpush3.bf16.msra.mxu0 %v8883_v45 }
 0x916   :  { %8140 = vmatprep.subr.bf16.mxu0 %v8884_v51 }
 0x919   :  { %8141 = vmatpush3.bf16.msra.mxu0 %v8885_v3 }
 0x91a   :  { %8142 = vmatprep.subr.bf16.mxu0 %v8886_v8 }
 0x91d   :  { %8143 = vmatpush3.bf16.msra.mxu0 %v8887_v10 }
 0x91e   :  { %8150 = vmatprep.subr.bf16.mxu0 %v8888_v43 }
 0x920   :  { %7065 = vmatmul.mubr.bf16.vlgmr.msra.gmra.mxu0 %v9422_v29  ;;  %v8899_v29 = vld [vmem:[#allocation6 + $0x408] ss:$28 sps:$4 sm:$0xff]  }
 0x921   :  { %8151 = vmatpush3.bf16.msra.mxu0 %v8889_v11  ;;  %7104 = vmatprep.mubr.bf16.mxu0 %v9406_v40  ;;  %v8901_v40 = vld [vmem:[#allocation6 + $0x3d0] ss:$28 sps:$4 sm:$0xff]  }
 0x922   :  { %8152 = vmatprep.subr.bf16.mxu0 %v8890_v48 }
 0x925   :  { %8153 = vmatpush3.bf16.msra.mxu0 %v8891_v15 }
 0x926   :  { %8154 = vmatprep.subr.bf16.mxu0 %v8892_v34 }
 0x929   :  { %8155 = vmatpush3.bf16.msra.mxu0 %v8893_v19 }
 0x92a   :  { %8156 = vmatprep.subr.bf16.mxu0 %v8894_v52 }
 0x92d   :  { %8157 = vmatpush3.bf16.msra.mxu0 %v8895_v62 }
 0x92e   :  { %8158 = vmatprep.subr.bf16.mxu0 %v8896_v37 }
 0x931   :  { %8159 = vmatpush3.bf16.msra.mxu0 %v8897_v20 }
 0x932   :  { %8160 = vmatprep.subr.bf16.mxu0 %v8898_v21 }
 0x935   :  { %8161 = vmatpush3.bf16.msra.mxu0 %v8899_v29 }
 0x936   :  { %8162 = vmatprep.subr.bf16.mxu0 %v8900_v22 }
 0x939   :  { %8163 = vmatpush3.bf16.msra.mxu0 %v8901_v40 }
 0x93a   :  { %8164 = vmatprep.subr.bf16.mxu0 %v8902_v23 }
 0x93d   :  { %8165 = vmatpush3.bf16.msra.mxu0 %v8903_v25 }
 0x940   :  { %v6820_v33 = vpop.f32.mrf.mxu0  ;;  %7105 = vmatmul.mubr.bf16.vlgmr.msra.gmra.mxu0 %v9427_v28 }
 0x941   :  { %v6821_v35 = vadd.f32 %v6820_v33, %v5602_v32 }
 0x942   :  { %v6822_v58 = vpop.f32.mrf.mxu0  ;;  %v6861_v61 = vpop.f32.mrf.mxu1 }
 0x943   :  { %v6823_v24 = vadd.f32 %v6822_v58, %v5606_v2  ;;  %v6862_v7 = vadd.f32 %v6861_v61, %v6821_v35 }
 0x944   :  { %v6824_v36 = vpop.f32.mrf.mxu0  ;;  %v6863_v38 = vpop.f32.mrf.mxu1 }
 0x945   :  { %v7112_v39 = vmul.f32 0.5, %v6862_v7  ;;  %v6864_v31 = vadd.f32 %v6863_v38, %v6823_v24 }
 0x946   :  { %v6825_v44 = vpop.f32.mrf.mxu0  ;;  %v6865_v5 = vpop.f32.mrf.mxu1 }
 0x947   :  { %8904 = vtanh.f32 %v7112_v39  ;;  %v7113_v9 = vmul.f32 0.5, %v6864_v31 }
 0x948   :  { %v6866_v12 = vpop.f32.mrf.mxu1 }
 0x949   :  { %8906 = vtanh.f32 %v7113_v9 }
 0x954   :  { %v8905_v49 = vpop.eup %8904 }
 0x955   :  { %v7126_v17 = vadd.f32 1.0, %v8905_v49 }
 0x956   :  { %v8907_v50 = vpop.eup %8906 }
 0x957   :  { %v7133_v16 = vmul.f32 0.5, %v7126_v17  ;;  %v7127_v28 = vadd.f32 1.0, %v8907_v50 }
 0x959   :  { %7140 = vst [vmem:[%s9497_s10] sm:$0xff] %v7133_v16  ;;  %v7134_v18 = vmul.f32 0.5, %v7127_v28 }
 0x95b   :  { %7141 = vst [vmem:[%s9497_s10 + $0x8] sm:$0xff] %v7134_v18 }
 0x980   :  { %v6902_v4 = vpop.f32.mrf.mxu0 }
 0x981   :  { %v6903_v56 = vadd.f32 %v6902_v4, %v5610_v42 }
 0x982   :  { %v6904_v47 = vpop.f32.mrf.mxu0  ;;  %v6943_v57 = vpop.f32.mrf.mxu1 }
 0x983   :  { %v6905_v6 = vadd.f32 %v6904_v47, %v5614_v55  ;;  %v6944_v27 = vadd.f32 %v6943_v57, %v6903_v56 }
 0x984   :  { %v6906_v59 = vpop.f32.mrf.mxu0  ;;  %v6945_v63 = vpop.f32.mrf.mxu1 }
 0x985   :  { %v7114_v1 = vmul.f32 0.5, %v6944_v27  ;;  %v6946_v13 = vadd.f32 %v6945_v63, %v6905_v6 }
 0x986   :  { %v6907_v14 = vpop.f32.mrf.mxu0  ;;  %v6947_v53 = vpop.f32.mrf.mxu1 }
 0x987   :  { %8908 = vtanh.f32 %v7114_v1  ;;  %v7115_v45 = vmul.f32 0.5, %v6946_v13 }
 0x988   :  { %v6948_v51 = vpop.f32.mrf.mxu1 }
 0x989   :  { %8910 = vtanh.f32 %v7115_v45 }
 0x994   :  { %v8909_v41 = vpop.eup %8908 }
 0x995   :  { %v7128_v3 = vadd.f32 1.0, %v8909_v41 }
 0x996   :  { %v8911_v8 = vpop.eup %8910 }
 0x997   :  { %v7135_v46 = vmul.f32 0.5, %v7128_v3  ;;  %v7129_v10 = vadd.f32 1.0, %v8911_v8 }
 0x999   :  { %7142 = vst [vmem:[%s9497_s10 + $0x10] sm:$0xff] %v7135_v46  ;;  %v7136_v43 = vmul.f32 0.5, %v7129_v10 }
 0x99b   :  { %7143 = vst [vmem:[%s9497_s10 + $0x18] sm:$0xff] %v7136_v43 }
 0x99c   :  { %9069 = shalt.err (!%p9066_p11)
}
 0x99d   :  { %7161 = dma.vmem_to_hbm [thread:$0]  %s7159_s22, 128, %s9496_s9, [#allocation10]   ;;  %v5618_v11 = vrot.slane %v9442_v30, %v539_v0  ;;  %v5622_v48 = vrot.slane %v9442_v30, %v543_v54  ;;  %v5626_v38 = vrot.slane %v9442_v30, %v547_v26 }
 0x9c0   :  { %v6984_v15 = vpop.f32.mrf.mxu0 }
 0x9c1   :  { %v6985_v34 = vadd.f32 %v6984_v15, %v5618_v11 }
 0x9c2   :  { %v6986_v19 = vpop.f32.mrf.mxu0  ;;  %v7025_v52 = vpop.f32.mrf.mxu1 }
 0x9c3   :  { %v6987_v62 = vadd.f32 %v6986_v19, %v5622_v48  ;;  %v7026_v37 = vadd.f32 %v7025_v52, %v6985_v34 }
 0x9c4   :  { %v6988_v20 = vpop.f32.mrf.mxu0  ;;  %v7027_v21 = vpop.f32.mrf.mxu1 }
 0x9c5   :  { %v7116_v29 = vmul.f32 0.5, %v7026_v37  ;;  %v7028_v22 = vadd.f32 %v7027_v21, %v6987_v62 }
 0x9c6   :  { %v6989_v40 = vpop.f32.mrf.mxu0  ;;  %v7029_v23 = vpop.f32.mrf.mxu1 }
 0x9c7   :  { %8912 = vtanh.f32 %v7116_v29  ;;  %v7117_v25 = vmul.f32 0.5, %v7028_v22 }
 0x9c8   :  { %v7030_v32 = vpop.f32.mrf.mxu1 }
 0x9c9   :  { %8914 = vtanh.f32 %v7117_v25 }
 0x9d4   :  { %v8913_v0 = vpop.eup %8912 }
 0x9d5   :  { %v7130_v2 = vadd.f32 1.0, %v8913_v0 }
 0x9d6   :  { %v8915_v33 = vpop.eup %8914 }
 0x9d7   :  { %v7137_v54 = vmul.f32 0.5, %v7130_v2  ;;  %v7131_v35 = vadd.f32 1.0, %v8915_v33 }
 0x9d9   :  { %7144 = vst [vmem:[%s9497_s10 + $0x20] sm:$0xff] %v7137_v54  ;;  %v7138_v58 = vmul.f32 0.5, %v7131_v35 }
 0x9db   :  { %7145 = vst [vmem:[%s9497_s10 + $0x28] sm:$0xff] %v7138_v58 }
 0x9e0   :  { %v8144_v61 = vpop.f32.mrf.mxu0 }
 0x9e2   :  { %v8145_v24 = vpop.f32.mrf.mxu0 }
 0x9e3   :  { %v8146_v39 = vadd.f32 %v8145_v24, %v8144_v61 }
 0x9e4   :  { %v8147_v7 = vpop.f32.mrf.mxu0 }
 0x9e5   :  { %v7067_v5 = vadd.f32 %v8146_v39, %v5626_v38 }
 0x9e6   :  { %v8148_v36 = vpop.f32.mrf.mxu0 }
 0xa00   :  { %v8166_v31 = vpop.f32.mrf.mxu0 }
 0xa02   :  { %v8167_v44 = vpop.f32.mrf.mxu0 }
 0xa03   :  { %v8168_v9 = vadd.f32 %v8167_v44, %v8166_v31 }
 0xa04   :  { %v8169_v12 = vpop.f32.mrf.mxu0 }
 0xa05   :  { %v7107_v49 = vadd.f32 %v8168_v9, %v7067_v5 }
 0xa06   :  { %v8170_v17 = vpop.f32.mrf.mxu0 }
 0xa07   :  { %v7118_v50 = vmul.f32 0.5, %v7107_v49 }
 0xa09   :  { %8916 = vtanh.f32 %v7118_v50 }
 0xa16   :  { %v8917_v16 = vpop.eup %8916 }
 0xa17   :  { %v7132_v28 = vadd.f32 1.0, %v8917_v16 }
 0xa19   :  { %v7139_v18 = vmul.f32 0.5, %v7132_v28 }
 0xa1b   :  { %7146 = vst.msk [vmem:[%s9497_s10 + $0x30] sm:$0xff] %vm2521_vm0, %v7139_v18 }
 0xa1c   :  { %9092 = dma.done.wait [#allocation10], 128  }
 0xa1d   :  { %9093 = vsyncadd [#allocation10], 4294967168 }
 0xa1e   :  { %7171 = vsyncpa [#allocation9], 1 }
 0xa1f   :  { %7172 = vsyncpa [#allocation12], 1 }
 0xa20   :  { %7173 = vsyncpa [#allocation10], 1 }
 0xa21   :  { %7174 = vsyncmov [#allocation7] }
 0xa24   :  { %s7175_s11 = vpop.sfrf %7174 }
 0xa25   :  { %p8101_p12 = scmp.ne.s32.totalorder %s7175_s11, 0 }
 0xa27   :  { %7179 = shalt.err (%p8101_p12)  }
 0xa28   :  { %7181 = vsyncmov [#allocation7 + $0x1] }
 0xa2b   :  { %s7182_s12 = vpop.sfrf %7181 }
 0xa2c   :  { %p8102_p13 = scmp.ne.s32.totalorder %s7182_s12, 0 }
 0xa2e   :  { %7186 = shalt.err (%p8102_p13)  }
 0xa2f   :  { %7188 = vsyncmov [#allocation7 + $0x2] }
 0xa32   :  { %s7189_s13 = vpop.sfrf %7188 }
 0xa33   :  { %p8103_p0 = scmp.ne.s32.totalorder %s7189_s13, 0 }
 0xa35   :  { %7193 = shalt.err (%p8103_p0)  }
 0xa36   :  { %7195 = vsyncmov [#allocation7 + $0x3] }
 0xa39   :  { %s7196_s15 = vpop.sfrf %7195 }
 0xa3a   :  { %p8104_p1 = scmp.ne.s32.totalorder %s7196_s15, 0 }
 0xa3c   :  { %7200 = shalt.err (%p8104_p1)  }
 0xa3d   :  { %7202 = vsyncmov [#allocation7 + $0x4] }
 0xa40   :  { %s7203_s10 = vpop.sfrf %7202 }
 0xa41   :  { %p8105_p2 = scmp.ne.s32.totalorder %s7203_s10, 0 }
 0xa43   :  { %7207 = shalt.err (%p8105_p2)  }

</bundles_post_ra>
